<compile_context>
chip_gen: v6e
topology: v6e:2x2x1
jax: 0.10.0
libtpu: 0.0.40
codegen_flags: <defaults>
</compile_context>

<pallas_src>
import functools
import math

import jax
import jax.numpy as jnp
from jax.experimental import pallas as pl
from jax.experimental.pallas import tpu as pltpu

LANE = 128


def _round_up(x, m):
    return (x + m - 1) // m * m


# ----------------------------------------------------------------------------
# Pallas kernels
# ----------------------------------------------------------------------------
def _gemm_bias_act_kernel(x_ref, w_ref, b_ref, o_ref, *, relu):
    # x: (TM, K)  w: (K, Np)  b: (1, Np)  -> o: (TM, Np)    (Np = 128*k, lane-dense)
    acc = jnp.dot(x_ref[...], w_ref[...], preferred_element_type=jnp.float32)
    acc = acc + b_ref[...]
    if relu:
        acc = jnp.maximum(acc, 0.0)
    o_ref[...] = acc.astype(o_ref.dtype)


def _gemm_vq_kernel(x_ref, w_ref, b_ref, emb_ref, ze_ref, zq_ref):
    # Fused enc3 conv GEMM (+bias+ReLU) and vector-quantization lookup.
    # x: (TM, K)  w: (K, Np)  b: (1, Np)  emb: (Ke, Np)  ->  ze, zq: (TM, Np)
    # Lanes >= true channel count C hold zeros in w/b/emb, so they stay zero in
    # ze/zq and do not perturb the distances.
    ze = jnp.dot(x_ref[...], w_ref[...], preferred_element_type=jnp.float32)
    ze = jnp.maximum(ze + b_ref[...], 0.0)
    ze_ref[...] = ze.astype(ze_ref.dtype)

    emb = emb_ref[...]
    Ke = emb.shape[0]
    emb_sq = jnp.sum(emb * emb, axis=-1, keepdims=True).T            # (1, Ke)
    cross = jnp.dot(ze, emb.T, preferred_element_type=jnp.float32)   # (TM, Ke)
    # ||ze||^2 is constant per row -> dropped; argmin unchanged.
    dist = emb_sq - 2.0 * cross
    lane = jax.lax.broadcasted_iota(jnp.int32, dist.shape, 1)
    dmin = jnp.min(dist, axis=-1, keepdims=True)
    # first index attaining the minimum (matches torch.argmin tie-breaking)
    idx = jnp.min(jnp.where(dist <= dmin, lane, Ke), axis=-1, keepdims=True)
    onehot = (lane == idx).astype(jnp.float32)                       # (TM, Ke)
    zq = jnp.dot(onehot, emb, preferred_element_type=jnp.float32)    # gather via one-hot matmul
    zq_ref[...] = zq.astype(zq_ref.dtype)


# ----------------------------------------------------------------------------
# Pallas-call wrappers
# ----------------------------------------------------------------------------
def _tile_m(M):
    tm = min(128, _round_up(M, 8))      # multiple of 8, no pointless 4x padding
    return tm, _round_up(M, tm)


def matmul_bias_act(x, wp, bp, relu):
    """(M,K) @ (K,Np) + bias (+ReLU).  Np is already lane-padded to 128*k."""
    M, Kd = x.shape
    Np = wp.shape[1]
    tm, mpad = _tile_m(M)
    xp = x if mpad == M else jnp.pad(x, ((0, mpad - M), (0, 0)))
    out = pl.pallas_call(
        functools.partial(_gemm_bias_act_kernel, relu=relu),
        out_shape=jax.ShapeDtypeStruct((mpad, Np), jnp.float32),
        grid_spec=pltpu.PrefetchScalarGridSpec(
            num_scalar_prefetch=0,
            grid=(mpad // tm,),
            in_specs=[
                pl.BlockSpec((tm, Kd), lambda i: (i, 0)),   # activation tile
                pl.BlockSpec((Kd, Np), lambda i: (0, 0)),   # full weight (grid-invariant)
                pl.BlockSpec((1, Np), lambda i: (0, 0)),    # bias
            ],
            out_specs=pl.BlockSpec((tm, Np), lambda i: (i, 0)),
        ),
        compiler_params=pltpu.CompilerParams(dimension_semantics=("parallel",)),
    )(xp, wp, bp)
    return out[:M]


def gemm_vq(x, wp, bp, embp):
    """Fused enc3 GEMM + VQ lookup; returns lane-padded (M, Np) ze and zq."""
    M, Kd = x.shape
    Np = wp.shape[1]
    Ke = embp.shape[0]
    tm, mpad = _tile_m(M)
    xp = x if mpad == M else jnp.pad(x, ((0, mpad - M), (0, 0)))
    ze, zq = pl.pallas_call(
        _gemm_vq_kernel,
        out_shape=(jax.ShapeDtypeStruct((mpad, Np), jnp.float32),
                   jax.ShapeDtypeStruct((mpad, Np), jnp.float32)),
        grid_spec=pltpu.PrefetchScalarGridSpec(
            num_scalar_prefetch=0,
            grid=(mpad // tm,),
            in_specs=[
                pl.BlockSpec((tm, Kd), lambda i: (i, 0)),
                pl.BlockSpec((Kd, Np), lambda i: (0, 0)),
                pl.BlockSpec((1, Np), lambda i: (0, 0)),
                pl.BlockSpec((Ke, Np), lambda i: (0, 0)),
            ],
            out_specs=[
                pl.BlockSpec((tm, Np), lambda i: (i, 0)),
                pl.BlockSpec((tm, Np), lambda i: (i, 0)),
            ],
        ),
        compiler_params=pltpu.CompilerParams(dimension_semantics=("parallel",)),
    )(xp, wp, bp, embp)
    return ze[:M], zq[:M]


# ----------------------------------------------------------------------------
# JAX glue: im2col / dilation / conv wrappers (fused by XLA under the jit)
# ----------------------------------------------------------------------------
def im2col(x_nhwc, k, stride, pad):
    N, H, W, C = x_nhwc.shape
    xp = jnp.pad(x_nhwc, ((0, 0), (pad, pad), (pad, pad), (0, 0)))
    Ho = (H + 2 * pad - k) // stride + 1
    Wo = (W + 2 * pad - k) // stride + 1
    cols = []
    for i in range(k):
        for j in range(k):
            cols.append(
                xp[:, i:i + stride * (Ho - 1) + 1:stride,
                      j:j + stride * (Wo - 1) + 1:stride, :]
            )
    patches = jnp.concatenate(cols, axis=-1)          # (N, Ho, Wo, k*k*C), (i, j, c) order
    return patches.reshape(N * Ho * Wo, k * k * C), (N, Ho, Wo)


def dilate(x_nhwc, s):
    # zero-insertion upsampling via pad+reshape (no scatter)
    if s == 1:
        return x_nhwc
    N, H, W, C = x_nhwc.shape
    xz = jnp.pad(x_nhwc[:, :, None, :, None, :],
                 ((0, 0), (0, 0), (0, s - 1), (0, 0), (0, s - 1), (0, 0)))
    return xz.reshape(N, H * s, W * s, C)[:, :(H - 1) * s + 1, :(W - 1) * s + 1, :]


def conv2d(x_nhwc, wp, bp, *, nout, k, stride, pad, relu):
    patches, (N, Ho, Wo) = im2col(x_nhwc, k, stride, pad)
    out = matmul_bias_act(patches, wp, bp, relu)
    return out[:, :nout].reshape(N, Ho, Wo, nout)


def conv_transpose2d(x_nhwc, wp, bp, *, nout, k, stride, pad, relu):
    # ConvTranspose == conv of zero-dilated input with flipped kernel
    # (the flip/reshape is already baked into wp by prepare_params).
    return conv2d(dilate(x_nhwc, stride), wp, bp,
                  nout=nout, k=k, stride=1, pad=k - 1 - pad, relu=relu)


# ----------------------------------------------------------------------------
# Parameter preparation (done once, outside jit)
# ----------------------------------------------------------------------------
def _pad_lanes(a):
    n = a.shape[-1]
    target = _round_up(max(n, LANE), LANE)
    return jnp.pad(a, [(0, 0)] * (a.ndim - 1) + [(0, target - n)])


def prepare_params(raw):
    """Convert PyTorch-layout weights to lane-padded GEMM matrices (once)."""
    def conv_w(w_oihw):
        cout, cin, k, _ = w_oihw.shape
        wm = jnp.transpose(w_oihw, (2, 3, 1, 0)).reshape(k * k * cin, cout)
        return _pad_lanes(wm)

    def convT_w(w_iohw):
        cin, cout, k, _ = w_iohw.shape
        wm = jnp.transpose(w_iohw[:, :, ::-1, ::-1], (2, 3, 0, 1)).reshape(k * k * cin, cout)
        return _pad_lanes(wm)

    p = {}
    for name in ("enc1", "enc2", "enc3"):
        w, b = raw[name]
        p[name] = (conv_w(w), _pad_lanes(b.reshape(1, -1)))
    for name in ("dec1", "dec2", "dec3"):
        w, b = raw[name]
        p[name] = (convT_w(w), _pad_lanes(b.reshape(1, -1)))
    p["emb"] = _pad_lanes(raw["emb"])
    return p


def init_conv(key, cout, cin, k):
    bound = 1.0 / math.sqrt(cin * k * k)
    kw, kb = jax.random.split(key)
    w = jax.random.uniform(kw, (cout, cin, k, k), jnp.float32, -bound, bound)
    b = jax.random.uniform(kb, (cout,), jnp.float32, -bound, bound)
    return w, b


def init_convT(key, cin, cout, k):
    bound = 1.0 / math.sqrt(cout * k * k)
    kw, kb = jax.random.split(key)
    w = jax.random.uniform(kw, (cin, cout, k, k), jnp.float32, -bound, bound)
    b = jax.random.uniform(kb, (cout,), jnp.float32, -bound, bound)
    return w, b


# ----------------------------------------------------------------------------
# VQVAE forward
# ----------------------------------------------------------------------------
def make_vqvae_forward(input_dim, dim):
    def forward(params, x_nchw):
        x = jnp.transpose(x_nchw, (0, 2, 3, 1))                      # NCHW -> NHWC
        # encoder
        h = conv2d(x, *params["enc1"], nout=32, k=4, stride=2, pad=1, relu=True)
        h = conv2d(h, *params["enc2"], nout=64, k=4, stride=2, pad=1, relu=True)
        # enc3 conv + vector quantization fused in one Pallas kernel
        patches, (N, Ho, Wo) = im2col(h, 3, 1, 1)
        ze_f, zq_f = gemm_vq(patches, *params["enc3"], params["emb"])
        ze = ze_f[:, :dim].reshape(N, Ho, Wo, dim)
        zq = zq_f[:, :dim].reshape(N, Ho, Wo, dim)
        # straight-through estimator: forward value == zq
        dec_in = ze + jax.lax.stop_gradient(zq - ze)
        # decoder
        d = conv_transpose2d(dec_in, *params["dec1"], nout=32, k=3, stride=1, pad=1, relu=True)
        d = conv_transpose2d(d, *params["dec2"], nout=64, k=4, stride=2, pad=1, relu=True)
        x_hat = conv_transpose2d(d, *params["dec3"], nout=input_dim, k=4, stride=2, pad=1,
                                 relu=False)
        to_nchw = lambda a: jnp.transpose(a, (0, 3, 1, 2))
        return to_nchw(x_hat), to_nchw(ze), to_nchw(zq)
    return forward


if __name__ == "__main__":
    input_dim, dim, n_embedding = 4, 32, 16
    batch, spatial = 2, 16

    key = jax.random.PRNGKey(0)
    keys = jax.random.split(key, 8)
    raw_params = {
        "enc1": init_conv(keys[0], 32, input_dim, 4),
        "enc2": init_conv(keys[1], 64, 32, 4),
        "enc3": init_conv(keys[2], dim, 64, 3),
        "emb": jax.random.uniform(keys[3], (n_embedding, dim), jnp.float32,
                                  -1.0 / n_embedding, 1.0 / n_embedding),
        "dec1": init_convT(keys[4], dim, 32, 3),
        "dec2": init_convT(keys[5], 32, 64, 4),
        "dec3": init_convT(keys[6], 64, input_dim, 4),
    }
    params = prepare_params(raw_params)          # GEMM layout + lane padding, once

    x = jax.random.normal(keys[7], (batch, input_dim, spatial, spatial), jnp.float32)

    forward = jax.jit(make_vqvae_forward(input_dim, dim))
    x_hat, ze, zq = jax.block_until_ready(forward(params, x))

    assert x_hat.shape == (batch, input_dim, spatial, spatial), x_hat.shape
    assert ze.shape == (batch, dim, spatial // 4, spatial // 4), ze.shape
    assert zq.shape == ze.shape, zq.shape
    assert bool(jnp.all(jnp.isfinite(x_hat)))
    print("KERNEL_OK")
</pallas_src>

<mosaic_0001>
module attributes {stable_mosaic.version = 11 : i64} {
  func.func @_gemm_bias_act_kernel(%arg0: i32, %arg1: memref<128x64xf32, #tpu.memory_space<vmem>>, %arg2: memref<64x128xf32, #tpu.memory_space<vmem>>, %arg3: memref<1x128xf32, #tpu.memory_space<vmem>>, %arg4: memref<128x128xf32, #tpu.memory_space<vmem>>) attributes {dimension_semantics = [#tpu.dimension_semantics<parallel>], iteration_bounds = array<i64: 1>, scalar_prefetch = 0 : i64, scratch_operands = 0 : i64, tpu.core_type = #tpu.core_type<tc>, window_params = [{transform_indices = @transform_0, window_bounds = array<i64: 128, 64>}, {pipeline_mode = #tpu.pipeline_mode<synchronous>, transform_indices = @transform_1, window_bounds = array<i64: 64, 128>}, {pipeline_mode = #tpu.pipeline_mode<synchronous>, transform_indices = @transform_2, window_bounds = array<i64: 1, 128>}, {transform_indices = @transform_3, window_bounds = array<i64: 128, 128>}]} {
    %c0 = arith.constant 0 : index
    %c0_0 = arith.constant 0 : index
    %0 = vector.load %arg1[%c0, %c0_0] : memref<128x64xf32, #tpu.memory_space<vmem>>, vector<128x64xf32>
    %c0_1 = arith.constant 0 : index
    %c0_2 = arith.constant 0 : index
    %1 = vector.load %arg2[%c0_1, %c0_2] : memref<64x128xf32, #tpu.memory_space<vmem>>, vector<64x128xf32>
    %cst = arith.constant dense<0.000000e+00> : vector<128x128xf32>
    %2 = tpu.matmul %0, %1, %cst {dimension_numbers = #tpu.dot_dimension_numbers<[1], [0], [0], [1], [0, 0, 1, 1], [], []>} : vector<128x64xf32>, vector<64x128xf32>, vector<128x128xf32> -> vector<128x128xf32>
    %c0_3 = arith.constant 0 : index
    %c0_4 = arith.constant 0 : index
    %3 = vector.load %arg3[%c0_3, %c0_4] : memref<1x128xf32, #tpu.memory_space<vmem>>, vector<1x128xf32>
    %4 = vector.broadcast %3 : vector<1x128xf32> to vector<128x128xf32>
    %5 = arith.addf %2, %4 : vector<128x128xf32>
    %cst_5 = arith.constant 0.000000e+00 : f32
    %6 = vector.broadcast %cst_5 : f32 to vector<128x128xf32>
    %7 = arith.maximumf %5, %6 : vector<128x128xf32>
    %c0_6 = arith.constant 0 : index
    %c0_7 = arith.constant 0 : index
    %8 = vector.load %arg4[%c0_6, %c0_7] : memref<128x128xf32, #tpu.memory_space<vmem>>, vector<128x128xf32>
    tpu.vector_store %arg4[%c0_6, %c0_7], %7 {strides = array<i32>} : memref<128x128xf32, #tpu.memory_space<vmem>>, vector<128x128xf32>,
    return
  }
  func.func @transform_0(%arg0: i32) -> (i32, i32) {
    %c0_i32 = arith.constant 0 : i32
    %c0_i32_0 = arith.constant 0 : i32
    return %arg0, %c0_i32 : i32, i32
  }
  func.func @transform_1(%arg0: i32) -> (i32, i32) {
    %c0_i32 = arith.constant 0 : i32
    %c0_i32_0 = arith.constant 0 : i32
    %c0_i32_1 = arith.constant 0 : i32
    return %c0_i32, %c0_i32_0 : i32, i32
  }
  func.func @transform_2(%arg0: i32) -> (i32, i32) {
    %c0_i32 = arith.constant 0 : i32
    %c0_i32_0 = arith.constant 0 : i32
    %c0_i32_1 = arith.constant 0 : i32
    return %c0_i32, %c0_i32_0 : i32, i32
  }
  func.func @transform_3(%arg0: i32) -> (i32, i32) {
    %c0_i32 = arith.constant 0 : i32
    %c0_i32_0 = arith.constant 0 : i32
    return %arg0, %c0_i32 : i32, i32
  }
}

module attributes {stable_mosaic.version = 11 : i64} {
  func.func @_gemm_bias_act_kernel(%arg0: i32, %arg1: memref<32x512xf32, #tpu.memory_space<vmem>>, %arg2: memref<512x128xf32, #tpu.memory_space<vmem>>, %arg3: memref<1x128xf32, #tpu.memory_space<vmem>>, %arg4: memref<32x128xf32, #tpu.memory_space<vmem>>) attributes {dimension_semantics = [#tpu.dimension_semantics<parallel>], iteration_bounds = array<i64: 1>, scalar_prefetch = 0 : i64, scratch_operands = 0 : i64, tpu.core_type = #tpu.core_type<tc>, window_params = [{transform_indices = @transform_0, window_bounds = array<i64: 32, 512>}, {pipeline_mode = #tpu.pipeline_mode<synchronous>, transform_indices = @transform_1, window_bounds = array<i64: 512, 128>}, {pipeline_mode = #tpu.pipeline_mode<synchronous>, transform_indices = @transform_2, window_bounds = array<i64: 1, 128>}, {transform_indices = @transform_3, window_bounds = array<i64: 32, 128>}]} {
    %c0 = arith.constant 0 : index
    %c0_0 = arith.constant 0 : index
    %0 = vector.load %arg1[%c0, %c0_0] : memref<32x512xf32, #tpu.memory_space<vmem>>, vector<32x512xf32>
    %c0_1 = arith.constant 0 : index
    %c0_2 = arith.constant 0 : index
    %1 = vector.load %arg2[%c0_1, %c0_2] : memref<512x128xf32, #tpu.memory_space<vmem>>, vector<512x128xf32>
    %cst = arith.constant dense<0.000000e+00> : vector<32x128xf32>
    %2 = tpu.matmul %0, %1, %cst {dimension_numbers = #tpu.dot_dimension_numbers<[1], [0], [0], [1], [0, 0, 1, 1], [], []>} : vector<32x512xf32>, vector<512x128xf32>, vector<32x128xf32> -> vector<32x128xf32>
    %c0_3 = arith.constant 0 : index
    %c0_4 = arith.constant 0 : index
    %3 = vector.load %arg3[%c0_3, %c0_4] : memref<1x128xf32, #tpu.memory_space<vmem>>, vector<1x128xf32>
    %4 = vector.broadcast %3 : vector<1x128xf32> to vector<32x128xf32>
    %5 = arith.addf %2, %4 : vector<32x128xf32>
    %cst_5 = arith.constant 0.000000e+00 : f32
    %6 = vector.broadcast %cst_5 : f32 to vector<32x128xf32>
    %7 = arith.maximumf %5, %6 : vector<32x128xf32>
    %c0_6 = arith.constant 0 : index
    %c0_7 = arith.constant 0 : index
    %8 = vector.load %arg4[%c0_6, %c0_7] : memref<32x128xf32, #tpu.memory_space<vmem>>, vector<32x128xf32>
    tpu.vector_store %arg4[%c0_6, %c0_7], %7 {strides = array<i32>} : memref<32x128xf32, #tpu.memory_space<vmem>>, vector<32x128xf32>,
    return
  }
  func.func @transform_0(%arg0: i32) -> (i32, i32) {
    %c0_i32 = arith.constant 0 : i32
    %c0_i32_0 = arith.constant 0 : i32
    return %arg0, %c0_i32 : i32, i32
  }
  func.func @transform_1(%arg0: i32) -> (i32, i32) {
    %c0_i32 = arith.constant 0 : i32
    %c0_i32_0 = arith.constant 0 : i32
    %c0_i32_1 = arith.constant 0 : i32
    return %c0_i32, %c0_i32_0 : i32, i32
  }
  func.func @transform_2(%arg0: i32) -> (i32, i32) {
    %c0_i32 = arith.constant 0 : i32
    %c0_i32_0 = arith.constant 0 : i32
    %c0_i32_1 = arith.constant 0 : i32
    return %c0_i32, %c0_i32_0 : i32, i32
  }
  func.func @transform_3(%arg0: i32) -> (i32, i32) {
    %c0_i32 = arith.constant 0 : i32
    %c0_i32_0 = arith.constant 0 : i32
    return %arg0, %c0_i32 : i32, i32
  }
}

module attributes {stable_mosaic.version = 11 : i64} {
  func.func @_gemm_vq_kernel(%arg0: i32, %arg1: memref<32x576xf32, #tpu.memory_space<vmem>>, %arg2: memref<576x128xf32, #tpu.memory_space<vmem>>, %arg3: memref<1x128xf32, #tpu.memory_space<vmem>>, %arg4: memref<16x128xf32, #tpu.memory_space<vmem>>, %arg5: memref<32x128xf32, #tpu.memory_space<vmem>>, %arg6: memref<32x128xf32, #tpu.memory_space<vmem>>) attributes {dimension_semantics = [#tpu.dimension_semantics<parallel>], iteration_bounds = array<i64: 1>, scalar_prefetch = 0 : i64, scratch_operands = 0 : i64, tpu.core_type = #tpu.core_type<tc>, window_params = [{transform_indices = @transform_0, window_bounds = array<i64: 32, 576>}, {pipeline_mode = #tpu.pipeline_mode<synchronous>, transform_indices = @transform_1, window_bounds = array<i64: 576, 128>}, {pipeline_mode = #tpu.pipeline_mode<synchronous>, transform_indices = @transform_2, window_bounds = array<i64: 1, 128>}, {pipeline_mode = #tpu.pipeline_mode<synchronous>, transform_indices = @transform_3, window_bounds = array<i64: 16, 128>}, {transform_indices = @transform_4, window_bounds = array<i64: 32, 128>}, {transform_indices = @transform_5, window_bounds = array<i64: 32, 128>}]} {
    %c0 = arith.constant 0 : index
    %c0_0 = arith.constant 0 : index
    %0 = vector.load %arg1[%c0, %c0_0] : memref<32x576xf32, #tpu.memory_space<vmem>>, vector<32x576xf32>
    %c0_1 = arith.constant 0 : index
    %c0_2 = arith.constant 0 : index
    %1 = vector.load %arg2[%c0_1, %c0_2] : memref<576x128xf32, #tpu.memory_space<vmem>>, vector<576x128xf32>
    %cst = arith.constant dense<0.000000e+00> : vector<32x128xf32>
    %2 = tpu.matmul %0, %1, %cst {dimension_numbers = #tpu.dot_dimension_numbers<[1], [0], [0], [1], [0, 0, 1, 1], [], []>} : vector<32x576xf32>, vector<576x128xf32>, vector<32x128xf32> -> vector<32x128xf32>
    %c0_3 = arith.constant 0 : index
    %c0_4 = arith.constant 0 : index
    %3 = vector.load %arg3[%c0_3, %c0_4] : memref<1x128xf32, #tpu.memory_space<vmem>>, vector<1x128xf32>
    %4 = vector.broadcast %3 : vector<1x128xf32> to vector<32x128xf32>
    %5 = arith.addf %2, %4 : vector<32x128xf32>
    %cst_5 = arith.constant 0.000000e+00 : f32
    %6 = vector.broadcast %cst_5 : f32 to vector<32x128xf32>
    %7 = arith.maximumf %5, %6 : vector<32x128xf32>
    %c0_6 = arith.constant 0 : index
    %c0_7 = arith.constant 0 : index
    %8 = vector.load %arg5[%c0_6, %c0_7] : memref<32x128xf32, #tpu.memory_space<vmem>>, vector<32x128xf32>
    tpu.vector_store %arg5[%c0_6, %c0_7], %7 {strides = array<i32>} : memref<32x128xf32, #tpu.memory_space<vmem>>, vector<32x128xf32>,
    %c0_8 = arith.constant 0 : index
    %c0_9 = arith.constant 0 : index
    %9 = vector.load %arg4[%c0_8, %c0_9] : memref<16x128xf32, #tpu.memory_space<vmem>>, vector<16x128xf32>
    %10 = arith.mulf %9, %9 : vector<16x128xf32>
    %cst_10 = arith.constant dense<0.000000e+00> : vector<16xf32>
    %11 = vector.multi_reduction <add>, %10, %cst_10 [1] : vector<16x128xf32> to vector<16xf32>
    %12 = vector.shape_cast %11 : vector<16xf32> to vector<16x1xf32>
    %13 = tpu.transpose %12, [1, 0] : vector<16x1xf32> -> vector<1x16xf32>
    %14 = tpu.transpose %9, [1, 0] : vector<16x128xf32> -> vector<128x16xf32>
    %cst_11 = arith.constant dense<0.000000e+00> : vector<32x16xf32>
    %15 = tpu.matmul %7, %14, %cst_11 {dimension_numbers = #tpu.dot_dimension_numbers<[1], [0], [0], [1], [0, 0, 1, 1], [], []>} : vector<32x128xf32>, vector<128x16xf32>, vector<32x16xf32> -> vector<32x16xf32>
    %cst_12 = arith.constant 2.000000e+00 : f32
    %16 = vector.broadcast %cst_12 : f32 to vector<32x16xf32>
    %17 = arith.mulf %16, %15 : vector<32x16xf32>
    %18 = vector.broadcast %13 : vector<1x16xf32> to vector<32x16xf32>
    %19 = arith.subf %18, %17 : vector<32x16xf32>
    %20 = tpu.iota {dimensions = array<i32: 1>} : vector<32x16xi32>
    %cst_13 = arith.constant dense<0x7F800000> : vector<32xf32>
    %21 = vector.multi_reduction <minimumf>, %19, %cst_13 [1] : vector<32x16xf32> to vector<32xf32>
    %22 = vector.shape_cast %21 : vector<32xf32> to vector<32x1xf32>
    %23 = vector.broadcast %22 : vector<32x1xf32> to vector<32x16xf32>
    %24 = arith.cmpf ole, %19, %23 : vector<32x16xf32>
    %c16_i32 = arith.constant 16 : i32
    %25 = vector.broadcast %c16_i32 : i32 to vector<32x16xi32>
    %26 = arith.select %24, %20, %25 : vector<32x16xi1>, vector<32x16xi32>
    %cst_14 = arith.constant dense<2147483647> : vector<32xi32>
    %27 = vector.multi_reduction <minsi>, %26, %cst_14 [1] : vector<32x16xi32> to vector<32xi32>
    %28 = vector.shape_cast %27 : vector<32xi32> to vector<32x1xi32>
    %29 = vector.broadcast %28 : vector<32x1xi32> to vector<32x16xi32>
    %30 = arith.cmpi eq, %20, %29 : vector<32x16xi32>
    %31 = arith.extui %30 : vector<32x16xi1> to vector<32x16xi32>
    %32 = arith.sitofp %31 : vector<32x16xi32> to vector<32x16xf32>
    %cst_15 = arith.constant dense<0.000000e+00> : vector<32x128xf32>
    %33 = tpu.matmul %32, %9, %cst_15 {dimension_numbers = #tpu.dot_dimension_numbers<[1], [0], [0], [1], [0, 0, 1, 1], [], []>} : vector<32x16xf32>, vector<16x128xf32>, vector<32x128xf32> -> vector<32x128xf32>
    %c0_16 = arith.constant 0 : index
    %c0_17 = arith.constant 0 : index
    %34 = vector.load %arg6[%c0_16, %c0_17] : memref<32x128xf32, #tpu.memory_space<vmem>>, vector<32x128xf32>
    tpu.vector_store %arg6[%c0_16, %c0_17], %33 {strides = array<i32>} : memref<32x128xf32, #tpu.memory_space<vmem>>, vector<32x128xf32>,
    return
  }
  func.func @transform_0(%arg0: i32) -> (i32, i32) {
    %c0_i32 = arith.constant 0 : i32
    %c0_i32_0 = arith.constant 0 : i32
    return %arg0, %c0_i32 : i32, i32
  }
  func.func @transform_1(%arg0: i32) -> (i32, i32) {
    %c0_i32 = arith.constant 0 : i32
    %c0_i32_0 = arith.constant 0 : i32
    %c0_i32_1 = arith.constant 0 : i32
    return %c0_i32, %c0_i32_0 : i32, i32
  }
  func.func @transform_2(%arg0: i32) -> (i32, i32) {
    %c0_i32 = arith.constant 0 : i32
    %c0_i32_0 = arith.constant 0 : i32
    %c0_i32_1 = arith.constant 0 : i32
    return %c0_i32, %c0_i32_0 : i32, i32
  }
  func.func @transform_3(%arg0: i32) -> (i32, i32) {
    %c0_i32 = arith.constant 0 : i32
    %c0_i32_0 = arith.constant 0 : i32
    %c0_i32_1 = arith.constant 0 : i32
    return %c0_i32, %c0_i32_0 : i32, i32
  }
  func.func @transform_4(%arg0: i32) -> (i32, i32) {
    %c0_i32 = arith.constant 0 : i32
    %c0_i32_0 = arith.constant 0 : i32
    return %arg0, %c0_i32 : i32, i32
  }
  func.func @transform_5(%arg0: i32) -> (i32, i32) {
    %c0_i32 = arith.constant 0 : i32
    %c0_i32_0 = arith.constant 0 : i32
    return %arg0, %c0_i32 : i32, i32
  }
}

module attributes {stable_mosaic.version = 11 : i64} {
  func.func @_gemm_bias_act_kernel(%arg0: i32, %arg1: memref<32x288xf32, #tpu.memory_space<vmem>>, %arg2: memref<288x128xf32, #tpu.memory_space<vmem>>, %arg3: memref<1x128xf32, #tpu.memory_space<vmem>>, %arg4: memref<32x128xf32, #tpu.memory_space<vmem>>) attributes {dimension_semantics = [#tpu.dimension_semantics<parallel>], iteration_bounds = array<i64: 1>, scalar_prefetch = 0 : i64, scratch_operands = 0 : i64, tpu.core_type = #tpu.core_type<tc>, window_params = [{transform_indices = @transform_0, window_bounds = array<i64: 32, 288>}, {pipeline_mode = #tpu.pipeline_mode<synchronous>, transform_indices = @transform_1, window_bounds = array<i64: 288, 128>}, {pipeline_mode = #tpu.pipeline_mode<synchronous>, transform_indices = @transform_2, window_bounds = array<i64: 1, 128>}, {transform_indices = @transform_3, window_bounds = array<i64: 32, 128>}]} {
    %c0 = arith.constant 0 : index
    %c0_0 = arith.constant 0 : index
    %0 = vector.load %arg1[%c0, %c0_0] : memref<32x288xf32, #tpu.memory_space<vmem>>, vector<32x288xf32>
    %c0_1 = arith.constant 0 : index
    %c0_2 = arith.constant 0 : index
    %1 = vector.load %arg2[%c0_1, %c0_2] : memref<288x128xf32, #tpu.memory_space<vmem>>, vector<288x128xf32>
    %cst = arith.constant dense<0.000000e+00> : vector<32x128xf32>
    %2 = tpu.matmul %0, %1, %cst {dimension_numbers = #tpu.dot_dimension_numbers<[1], [0], [0], [1], [0, 0, 1, 1], [], []>} : vector<32x288xf32>, vector<288x128xf32>, vector<32x128xf32> -> vector<32x128xf32>
    %c0_3 = arith.constant 0 : index
    %c0_4 = arith.constant 0 : index
    %3 = vector.load %arg3[%c0_3, %c0_4] : memref<1x128xf32, #tpu.memory_space<vmem>>, vector<1x128xf32>
    %4 = vector.broadcast %3 : vector<1x128xf32> to vector<32x128xf32>
    %5 = arith.addf %2, %4 : vector<32x128xf32>
    %cst_5 = arith.constant 0.000000e+00 : f32
    %6 = vector.broadcast %cst_5 : f32 to vector<32x128xf32>
    %7 = arith.maximumf %5, %6 : vector<32x128xf32>
    %c0_6 = arith.constant 0 : index
    %c0_7 = arith.constant 0 : index
    %8 = vector.load %arg4[%c0_6, %c0_7] : memref<32x128xf32, #tpu.memory_space<vmem>>, vector<32x128xf32>
    tpu.vector_store %arg4[%c0_6, %c0_7], %7 {strides = array<i32>} : memref<32x128xf32, #tpu.memory_space<vmem>>, vector<32x128xf32>,
    return
  }
  func.func @transform_0(%arg0: i32) -> (i32, i32) {
    %c0_i32 = arith.constant 0 : i32
    %c0_i32_0 = arith.constant 0 : i32
    return %arg0, %c0_i32 : i32, i32
  }
  func.func @transform_1(%arg0: i32) -> (i32, i32) {
    %c0_i32 = arith.constant 0 : i32
    %c0_i32_0 = arith.constant 0 : i32
    %c0_i32_1 = arith.constant 0 : i32
    return %c0_i32, %c0_i32_0 : i32, i32
  }
  func.func @transform_2(%arg0: i32) -> (i32, i32) {
    %c0_i32 = arith.constant 0 : i32
    %c0_i32_0 = arith.constant 0 : i32
    %c0_i32_1 = arith.constant 0 : i32
    return %c0_i32, %c0_i32_0 : i32, i32
  }
  func.func @transform_3(%arg0: i32) -> (i32, i32) {
    %c0_i32 = arith.constant 0 : i32
    %c0_i32_0 = arith.constant 0 : i32
    return %arg0, %c0_i32 : i32, i32
  }
}

module attributes {stable_mosaic.version = 11 : i64} {
  func.func @_gemm_bias_act_kernel(%arg0: i32, %arg1: memref<128x512xf32, #tpu.memory_space<vmem>>, %arg2: memref<512x128xf32, #tpu.memory_space<vmem>>, %arg3: memref<1x128xf32, #tpu.memory_space<vmem>>, %arg4: memref<128x128xf32, #tpu.memory_space<vmem>>) attributes {dimension_semantics = [#tpu.dimension_semantics<parallel>], iteration_bounds = array<i64: 1>, scalar_prefetch = 0 : i64, scratch_operands = 0 : i64, tpu.core_type = #tpu.core_type<tc>, window_params = [{transform_indices = @transform_0, window_bounds = array<i64: 128, 512>}, {pipeline_mode = #tpu.pipeline_mode<synchronous>, transform_indices = @transform_1, window_bounds = array<i64: 512, 128>}, {pipeline_mode = #tpu.pipeline_mode<synchronous>, transform_indices = @transform_2, window_bounds = array<i64: 1, 128>}, {transform_indices = @transform_3, window_bounds = array<i64: 128, 128>}]} {
    %c0 = arith.constant 0 : index
    %c0_0 = arith.constant 0 : index
    %0 = vector.load %arg1[%c0, %c0_0] : memref<128x512xf32, #tpu.memory_space<vmem>>, vector<128x512xf32>
    %c0_1 = arith.constant 0 : index
    %c0_2 = arith.constant 0 : index
    %1 = vector.load %arg2[%c0_1, %c0_2] : memref<512x128xf32, #tpu.memory_space<vmem>>, vector<512x128xf32>
    %cst = arith.constant dense<0.000000e+00> : vector<128x128xf32>
    %2 = tpu.matmul %0, %1, %cst {dimension_numbers = #tpu.dot_dimension_numbers<[1], [0], [0], [1], [0, 0, 1, 1], [], []>} : vector<128x512xf32>, vector<512x128xf32>, vector<128x128xf32> -> vector<128x128xf32>
    %c0_3 = arith.constant 0 : index
    %c0_4 = arith.constant 0 : index
    %3 = vector.load %arg3[%c0_3, %c0_4] : memref<1x128xf32, #tpu.memory_space<vmem>>, vector<1x128xf32>
    %4 = vector.broadcast %3 : vector<1x128xf32> to vector<128x128xf32>
    %5 = arith.addf %2, %4 : vector<128x128xf32>
    %cst_5 = arith.constant 0.000000e+00 : f32
    %6 = vector.broadcast %cst_5 : f32 to vector<128x128xf32>
    %7 = arith.maximumf %5, %6 : vector<128x128xf32>
    %c0_6 = arith.constant 0 : index
    %c0_7 = arith.constant 0 : index
    %8 = vector.load %arg4[%c0_6, %c0_7] : memref<128x128xf32, #tpu.memory_space<vmem>>, vector<128x128xf32>
    tpu.vector_store %arg4[%c0_6, %c0_7], %7 {strides = array<i32>} : memref<128x128xf32, #tpu.memory_space<vmem>>, vector<128x128xf32>,
    return
  }
  func.func @transform_0(%arg0: i32) -> (i32, i32) {
    %c0_i32 = arith.constant 0 : i32
    %c0_i32_0 = arith.constant 0 : i32
    return %arg0, %c0_i32 : i32, i32
  }
  func.func @transform_1(%arg0: i32) -> (i32, i32) {
    %c0_i32 = arith.constant 0 : i32
    %c0_i32_0 = arith.constant 0 : i32
    %c0_i32_1 = arith.constant 0 : i32
    return %c0_i32, %c0_i32_0 : i32, i32
  }
  func.func @transform_2(%arg0: i32) -> (i32, i32) {
    %c0_i32 = arith.constant 0 : i32
    %c0_i32_0 = arith.constant 0 : i32
    %c0_i32_1 = arith.constant 0 : i32
    return %c0_i32, %c0_i32_0 : i32, i32
  }
  func.func @transform_3(%arg0: i32) -> (i32, i32) {
    %c0_i32 = arith.constant 0 : i32
    %c0_i32_0 = arith.constant 0 : i32
    return %arg0, %c0_i32 : i32, i32
  }
}

module attributes {stable_mosaic.version = 11 : i64} {
  func.func @_gemm_bias_act_kernel(%arg0: i32, %arg1: memref<128x1024xf32, #tpu.memory_space<vmem>>, %arg2: memref<1024x128xf32, #tpu.memory_space<vmem>>, %arg3: memref<1x128xf32, #tpu.memory_space<vmem>>, %arg4: memref<128x128xf32, #tpu.memory_space<vmem>>) attributes {dimension_semantics = [#tpu.dimension_semantics<parallel>], iteration_bounds = array<i64: 4>, scalar_prefetch = 0 : i64, scratch_operands = 0 : i64, tpu.core_type = #tpu.core_type<tc>, window_params = [{transform_indices = @transform_0, window_bounds = array<i64: 128, 1024>}, {pipeline_mode = #tpu.pipeline_mode<synchronous>, transform_indices = @transform_1, window_bounds = array<i64: 1024, 128>}, {pipeline_mode = #tpu.pipeline_mode<synchronous>, transform_indices = @transform_2, window_bounds = array<i64: 1, 128>}, {transform_indices = @transform_3, window_bounds = array<i64: 128, 128>}]} {
    %c0 = arith.constant 0 : index
    %c0_0 = arith.constant 0 : index
    %0 = vector.load %arg1[%c0, %c0_0] : memref<128x1024xf32, #tpu.memory_space<vmem>>, vector<128x1024xf32>
    %c0_1 = arith.constant 0 : index
    %c0_2 = arith.constant 0 : index
    %1 = vector.load %arg2[%c0_1, %c0_2] : memref<1024x128xf32, #tpu.memory_space<vmem>>, vector<1024x128xf32>
    %cst = arith.constant dense<0.000000e+00> : vector<128x128xf32>
    %2 = tpu.matmul %0, %1, %cst {dimension_numbers = #tpu.dot_dimension_numbers<[1], [0], [0], [1], [0, 0, 1, 1], [], []>} : vector<128x1024xf32>, vector<1024x128xf32>, vector<128x128xf32> -> vector<128x128xf32>
    %c0_3 = arith.constant 0 : index
    %c0_4 = arith.constant 0 : index
    %3 = vector.load %arg3[%c0_3, %c0_4] : memref<1x128xf32, #tpu.memory_space<vmem>>, vector<1x128xf32>
    %4 = vector.broadcast %3 : vector<1x128xf32> to vector<128x128xf32>
    %5 = arith.addf %2, %4 : vector<128x128xf32>
    %c0_5 = arith.constant 0 : index
    %c0_6 = arith.constant 0 : index
    %6 = vector.load %arg4[%c0_5, %c0_6] : memref<128x128xf32, #tpu.memory_space<vmem>>, vector<128x128xf32>
    tpu.vector_store %arg4[%c0_5, %c0_6], %5 {strides = array<i32>} : memref<128x128xf32, #tpu.memory_space<vmem>>, vector<128x128xf32>,
    return
  }
  func.func @transform_0(%arg0: i32) -> (i32, i32) {
    %c0_i32 = arith.constant 0 : i32
    %c0_i32_0 = arith.constant 0 : i32
    return %arg0, %c0_i32 : i32, i32
  }
  func.func @transform_1(%arg0: i32) -> (i32, i32) {
    %c0_i32 = arith.constant 0 : i32
    %c0_i32_0 = arith.constant 0 : i32
    %c0_i32_1 = arith.constant 0 : i32
    return %c0_i32, %c0_i32_0 : i32, i32
  }
  func.func @transform_2(%arg0: i32) -> (i32, i32) {
    %c0_i32 = arith.constant 0 : i32
    %c0_i32_0 = arith.constant 0 : i32
    %c0_i32_1 = arith.constant 0 : i32
    return %c0_i32, %c0_i32_0 : i32, i32
  }
  func.func @transform_3(%arg0: i32) -> (i32, i32) {
    %c0_i32 = arith.constant 0 : i32
    %c0_i32_0 = arith.constant 0 : i32
    return %arg0, %c0_i32 : i32, i32
  }
}

</mosaic_0001>

<bundles_post_ra>
// kernel: forward.6
= control target key start
LH: loop header
LB: loop body
LE: loop exit
PB: predicated region body
PF: predicated region fallthrough
CT: control target
= control target key end

     0   :  { %vm45_vm0 = vcmask 523264   ;;  %s531_s1 = inlined_call_operand.vmem [shape: f32[64,128], index: 1, kind: input, shape index: {}]   ;;  %s532_s0 = inlined_call_operand.vmem [shape: f32[128,64], index: 0, kind: input, shape index: {}]   ;;  %s533_s2 = inlined_call_operand.vmem [shape: f32[1,128], index: 2, kind: input, shape index: {}]   ;;  %s534_s3 = inlined_call_operand.vmem [shape: f32[128,128], index: 3, kind: output, shape index: {}]  }
   0x1   :  { %v37_v0 = vld [vmem:[%s531_s1 + $0x38] sm:$0xff]  ;;  %v36_v1 = vld [vmem:[%s531_s1 + $0x30] sm:$0xff]  ;;  %v35_v2 = vld [vmem:[%s531_s1 + $0x28] sm:$0xff] }
   0x2   :  { %316 = vmatprep.subr.mxu0 %v37_v0  ;;  %356 = vmatprep.subr.mxu1 %v37_v0  ;;  %v34_v3 = vld [vmem:[%s531_s1 + $0x20] sm:$0xff]  ;;  %v33_v4 = vld [vmem:[%s531_s1 + $0x18] sm:$0xff]  ;;  %v32_v5 = vld [vmem:[%s531_s1 + $0x10] sm:$0xff] }
   0x3   :  { %317 = vmatpush3.msra.mxu0 %v37_v0  ;;  %364 = vmatpush3.msra.mxu1 %v37_v0  ;;  %v31_v6 = vld [vmem:[%s531_s1 + $0x8] sm:$0xff]  ;;  %v30_v7 = vld [vmem:[%s531_s1] sm:$0xff]  ;;  %v16_v12 = vld [vmem:[%s532_s0 + $0x10] sm:$0xff] }
   0x4   :  { %318 = vmatprep.subr.mxu0 %v36_v1  ;;  %357 = vmatprep.subr.mxu1 %v36_v1  ;;  %v14_v8 = vld [vmem:[%s532_s0] sm:$0xff]  ;;  %v15_v10 = vld [vmem:[%s532_s0 + $0x8] sm:$0xff]  ;;  %v24_v13 = vld [vmem:[%s532_s0 + $0x50] sm:$0xff] }
   0x5   :  { %319 = vmatpush3.msra.mxu0 %v36_v1  ;;  %365 = vmatpush3.msra.mxu1 %v36_v1  ;;  %v22_v9 = vld [vmem:[%s532_s0 + $0x40] sm:$0xff]  ;;  %v23_v11 = vld [vmem:[%s532_s0 + $0x48] sm:$0xff]  ;;  %v17_v14 = vld [vmem:[%s532_s0 + $0x18] sm:$0xff] }
   0x6   :  { %320 = vmatprep.subr.mxu0 %v35_v2  ;;  %358 = vmatprep.subr.mxu1 %v35_v2  ;;  %v25_v15 = vld [vmem:[%s532_s0 + $0x58] sm:$0xff]  ;;  %v18_v16 = vld [vmem:[%s532_s0 + $0x20] sm:$0xff]  ;;  %v19_v18 = vld [vmem:[%s532_s0 + $0x28] sm:$0xff] }
   0x7   :  { %321 = vmatpush3.msra.mxu0 %v35_v2  ;;  %366 = vmatpush3.msra.mxu1 %v35_v2  ;;  %v26_v17 = vld [vmem:[%s532_s0 + $0x60] sm:$0xff]  ;;  %v27_v19 = vld [vmem:[%s532_s0 + $0x68] sm:$0xff]  ;;  %v20_v20 = vld [vmem:[%s532_s0 + $0x30] sm:$0xff] }
   0x8   :  { %322 = vmatprep.subr.mxu0 %v34_v3  ;;  %359 = vmatprep.subr.mxu1 %v34_v3  ;;  %v28_v21 = vld [vmem:[%s532_s0 + $0x70] sm:$0xff]  ;;  %v21_v22 = vld [vmem:[%s532_s0 + $0x38] sm:$0xff]  ;;  %v275_v24 = vld [vmem:[%s533_s2] ss:$0 sm:$0xff] }
   0x9   :  { %323 = vmatpush3.msra.mxu0 %v34_v3  ;;  %367 = vmatpush3.msra.mxu1 %v34_v3  ;;  %v29_v23 = vld [vmem:[%s532_s0 + $0x78] sm:$0xff] }
   0xa   :  { %324 = vmatprep.subr.mxu0 %v33_v4  ;;  %360 = vmatprep.subr.mxu1 %v33_v4 }
   0xb   :  { %325 = vmatpush3.msra.mxu0 %v33_v4  ;;  %368 = vmatpush3.msra.mxu1 %v33_v4 }
   0xc   :  { %326 = vmatprep.subr.mxu0 %v32_v5  ;;  %361 = vmatprep.subr.mxu1 %v32_v5 }
   0xd   :  { %327 = vmatpush3.msra.mxu0 %v32_v5  ;;  %369 = vmatpush3.msra.mxu1 %v32_v5 }
   0xe   :  { %328 = vmatprep.subr.mxu0 %v31_v6  ;;  %362 = vmatprep.subr.mxu1 %v31_v6 }
   0xf   :  { %329 = vmatpush3.msra.mxu0 %v31_v6  ;;  %370 = vmatpush3.msra.mxu1 %v31_v6 }
  0x10   :  { %330 = vmatprep.subr.mxu0 %v30_v7  ;;  %363 = vmatprep.subr.mxu1 %v30_v7 }
  0x11   :  { %331 = vmatpush3.msra.mxu0 %v30_v7  ;;  %371 = vmatpush3.msra.mxu1 %v30_v7 }
  0x12   :  { %332 = vmatprep.mubr.msk.f32.mxu0 %vm45_vm0, %v14_v8  ;;  %344 = vmatprep.mubr.msk.f32.mxu1 %vm45_vm0, %v22_v9 }
  0x13   :  { %333 = vmatmul.mubr.msk.f32.vlgmr.msra.gmra.mxu0 %vm45_vm0, %v15_v10  ;;  %345 = vmatmul.mubr.msk.f32.vlgmr.msra.gmra.mxu1 %vm45_vm0, %v23_v11 }
  0x14   :  { %335 = vmatprep.mubr.msk.f32.mxu0 %vm45_vm0, %v16_v12  ;;  %347 = vmatprep.mubr.msk.f32.mxu1 %vm45_vm0, %v24_v13 }
  0x17   :  { %336 = vmatmul.mubr.msk.f32.gmra.mxu0 %vm45_vm0, %v17_v14  ;;  %348 = vmatmul.mubr.msk.f32.gmra.mxu1 %vm45_vm0, %v25_v15 }
  0x18   :  { %338 = vmatprep.mubr.msk.f32.mxu0 %vm45_vm0, %v18_v16  ;;  %350 = vmatprep.mubr.msk.f32.mxu1 %vm45_vm0, %v26_v17 }
  0x1b   :  { %339 = vmatmul.mubr.msk.f32.gmra.mxu0 %vm45_vm0, %v19_v18  ;;  %351 = vmatmul.mubr.msk.f32.gmra.mxu1 %vm45_vm0, %v27_v19 }
  0x1c   :  { %341 = vmatprep.mubr.msk.f32.mxu0 %vm45_vm0, %v20_v20  ;;  %353 = vmatprep.mubr.msk.f32.mxu1 %vm45_vm0, %v28_v21 }
  0x1f   :  { %342 = vmatmul.mubr.msk.f32.gmra.mxu0 %vm45_vm0, %v21_v22  ;;  %354 = vmatmul.mubr.msk.f32.gmra.mxu1 %vm45_vm0, %v29_v23 }
  0xd3   :  { %v334_v25 = vpop.f32.mrf.mxu0  ;;  %v346_v26 = vpop.f32.mrf.mxu1 }
  0xd4   :  { %v166_v27 = vadd.f32 %v334_v25, %v275_v24  ;;  %v206_v28 = vadd.f32 %v346_v26, %v275_v24 }
  0xd5   :  { %v160_v29 = vpop.f32.mrf.mxu0  ;;  %v200_v30 = vpop.f32.mrf.mxu1 }
  0xd6   :  { %v240_v31 = vmax.f32 %v166_v27, 0.0  ;;  %v248_v32 = vmax.f32 %v206_v28, 0.0  ;;  %v161_v33 = vadd.f32 %v275_v24, %v160_v29  ;;  %v201_v34 = vadd.f32 %v275_v24, %v200_v30 }
  0xd7   :  { %v337_v35 = vpop.f32.mrf.mxu0  ;;  %v349_v36 = vpop.f32.mrf.mxu1 }
  0xd8   :  { %256 = vst [vmem:[%s534_s3 + $0x8] sm:$0xff] %v240_v31  ;;  %264 = vst [vmem:[%s534_s3 + $0x48] sm:$0xff] %v248_v32  ;;  %v239_v37 = vmax.f32 %v161_v33, 0.0  ;;  %v247_v38 = vmax.f32 %v201_v34, 0.0  ;;  %v176_v39 = vadd.f32 %v337_v35, %v275_v24  ;;  %v216_v40 = vadd.f32 %v349_v36, %v275_v24 }
  0xd9   :  { %v170_v41 = vpop.f32.mrf.mxu0  ;;  %v210_v42 = vpop.f32.mrf.mxu1 }
  0xda   :  { %255 = vst [vmem:[%s534_s3] sm:$0xff] %v239_v37  ;;  %263 = vst [vmem:[%s534_s3 + $0x40] sm:$0xff] %v247_v38  ;;  %v242_v43 = vmax.f32 %v176_v39, 0.0  ;;  %v250_v44 = vmax.f32 %v216_v40, 0.0  ;;  %v171_v45 = vadd.f32 %v275_v24, %v170_v41  ;;  %v211_v46 = vadd.f32 %v275_v24, %v210_v42 }
  0xdb   :  { %v340_v47 = vpop.f32.mrf.mxu0  ;;  %v352_v48 = vpop.f32.mrf.mxu1 }
  0xdc   :  { %258 = vst [vmem:[%s534_s3 + $0x18] sm:$0xff] %v242_v43  ;;  %266 = vst [vmem:[%s534_s3 + $0x58] sm:$0xff] %v250_v44  ;;  %v241_v49 = vmax.f32 %v171_v45, 0.0  ;;  %v249_v50 = vmax.f32 %v211_v46, 0.0  ;;  %v186_v51 = vadd.f32 %v340_v47, %v275_v24  ;;  %v226_v52 = vadd.f32 %v352_v48, %v275_v24 }
  0xdd   :  { %v180_v53 = vpop.f32.mrf.mxu0  ;;  %v220_v54 = vpop.f32.mrf.mxu1 }
  0xde   :  { %257 = vst [vmem:[%s534_s3 + $0x10] sm:$0xff] %v241_v49  ;;  %265 = vst [vmem:[%s534_s3 + $0x50] sm:$0xff] %v249_v50  ;;  %v244_v55 = vmax.f32 %v186_v51, 0.0  ;;  %v252_v56 = vmax.f32 %v226_v52, 0.0  ;;  %v181_v57 = vadd.f32 %v275_v24, %v180_v53  ;;  %v221_v58 = vadd.f32 %v275_v24, %v220_v54 }
  0xdf   :  { %v343_v59 = vpop.f32.mrf.mxu0  ;;  %v355_v60 = vpop.f32.mrf.mxu1 }
  0xe0   :  { %260 = vst [vmem:[%s534_s3 + $0x28] sm:$0xff] %v244_v55  ;;  %268 = vst [vmem:[%s534_s3 + $0x68] sm:$0xff] %v252_v56  ;;  %v243_v61 = vmax.f32 %v181_v57, 0.0  ;;  %v251_v62 = vmax.f32 %v221_v58, 0.0  ;;  %v196_v63 = vadd.f32 %v343_v59, %v275_v24  ;;  %v236_v0 = vadd.f32 %v355_v60, %v275_v24 }
  0xe1   :  { %v190_v1 = vpop.f32.mrf.mxu0  ;;  %v230_v2 = vpop.f32.mrf.mxu1 }
  0xe2   :  { %259 = vst [vmem:[%s534_s3 + $0x20] sm:$0xff] %v243_v61  ;;  %267 = vst [vmem:[%s534_s3 + $0x60] sm:$0xff] %v251_v62  ;;  %v246_v3 = vmax.f32 %v196_v63, 0.0  ;;  %v254_v4 = vmax.f32 %v236_v0, 0.0  ;;  %v191_v5 = vadd.f32 %v275_v24, %v190_v1  ;;  %v231_v6 = vadd.f32 %v275_v24, %v230_v2 }
  0xe4   :  { %262 = vst [vmem:[%s534_s3 + $0x38] sm:$0xff] %v246_v3  ;;  %270 = vst [vmem:[%s534_s3 + $0x78] sm:$0xff] %v254_v4  ;;  %v245_v7 = vmax.f32 %v191_v5, 0.0  ;;  %v253_v8 = vmax.f32 %v231_v6, 0.0 }
  0xe6   :  { %261 = vst [vmem:[%s534_s3 + $0x30] sm:$0xff] %v245_v7  ;;  %269 = vst [vmem:[%s534_s3 + $0x70] sm:$0xff] %v253_v8 }

// kernel: forward.7
= control target key start
LH: loop header
LB: loop body
LE: loop exit
PB: predicated region body
PF: predicated region fallthrough
CT: control target
= control target key end

     0   :  { %s647_s1 = inlined_call_operand.vmem [shape: f32[512,128], index: 1, kind: input, shape index: {}]   ;;  %s648_s0 = inlined_call_operand.vmem [shape: f32[32,512], index: 0, kind: input, shape index: {}]   ;;  %s649_s2 = inlined_call_operand.vmem [shape: f32[1,128], index: 2, kind: input, shape index: {}]   ;;  %s650_s3 = inlined_call_operand.vmem [shape: f32[32,128], index: 3, kind: output, shape index: {}]  }
   0x1   :  { %v61_v0 = vld [vmem:[%s647_s1 + $0xf8] sm:$0xff]  ;;  %v60_v4 = vld [vmem:[%s647_s1 + $0xf0] sm:$0xff]  ;;  %v59_v8 = vld [vmem:[%s647_s1 + $0xe8] sm:$0xff] }
   0x2   :  { %v93_v1 = vld [vmem:[%s647_s1 + $0x1f8] sm:$0xff]  ;;  %284 = vmatprep.subr.mxu0 %v61_v0  ;;  %v92_v5 = vld [vmem:[%s647_s1 + $0x1f0] sm:$0xff]  ;;  %v91_v9 = vld [vmem:[%s647_s1 + $0x1e8] sm:$0xff] }
   0x3   :  { %v45_v2 = vld [vmem:[%s647_s1 + $0x78] sm:$0xff]  ;;  %328 = vmatprep.subr.mxu1 %v93_v1  ;;  %v44_v6 = vld [vmem:[%s647_s1 + $0x70] sm:$0xff]  ;;  %v43_v10 = vld [vmem:[%s647_s1 + $0x68] sm:$0xff] }
   0x4   :  { %v77_v3 = vld [vmem:[%s647_s1 + $0x178] sm:$0xff]  ;;  %285 = vmatpush3.msra.mxu0 %v45_v2  ;;  %v76_v7 = vld [vmem:[%s647_s1 + $0x170] sm:$0xff]  ;;  %v75_v11 = vld [vmem:[%s647_s1 + $0x168] sm:$0xff] }
   0x5   :  { %329 = vmatpush3.msra.mxu1 %v77_v3  ;;  %286 = vmatprep.subr.mxu0 %v60_v4  ;;  %v58_v12 = vld [vmem:[%s647_s1 + $0xe0] sm:$0xff]  ;;  %v57_v16 = vld [vmem:[%s647_s1 + $0xd8] sm:$0xff]  ;;  %v56_v20 = vld [vmem:[%s647_s1 + $0xd0] sm:$0xff] }
   0x6   :  { %330 = vmatprep.subr.mxu1 %v92_v5  ;;  %287 = vmatpush3.msra.mxu0 %v44_v6  ;;  %v90_v13 = vld [vmem:[%s647_s1 + $0x1e0] sm:$0xff]  ;;  %v89_v17 = vld [vmem:[%s647_s1 + $0x1d8] sm:$0xff]  ;;  %v88_v21 = vld [vmem:[%s647_s1 + $0x1d0] sm:$0xff] }
   0x7   :  { %331 = vmatpush3.msra.mxu1 %v76_v7  ;;  %288 = vmatprep.subr.mxu0 %v59_v8  ;;  %v42_v14 = vld [vmem:[%s647_s1 + $0x60] sm:$0xff]  ;;  %v41_v18 = vld [vmem:[%s647_s1 + $0x58] sm:$0xff]  ;;  %v40_v22 = vld [vmem:[%s647_s1 + $0x50] sm:$0xff] }
   0x8   :  { %332 = vmatprep.subr.mxu1 %v91_v9  ;;  %v74_v15 = vld [vmem:[%s647_s1 + $0x160] sm:$0xff]  ;;  %289 = vmatpush3.msra.mxu0 %v43_v10  ;;  %v73_v19 = vld [vmem:[%s647_s1 + $0x158] sm:$0xff]  ;;  %v72_v23 = vld [vmem:[%s647_s1 + $0x150] sm:$0xff] }
   0x9   :  { %333 = vmatpush3.msra.mxu1 %v75_v11  ;;  %290 = vmatprep.subr.mxu0 %v58_v12  ;;  %v55_v24 = vld [vmem:[%s647_s1 + $0xc8] sm:$0xff]  ;;  %v54_v28 = vld [vmem:[%s647_s1 + $0xc0] sm:$0xff]  ;;  %v53_v32 = vld [vmem:[%s647_s1 + $0xb8] sm:$0xff] }
   0xa   :  { %334 = vmatprep.subr.mxu1 %v90_v13  ;;  %291 = vmatpush3.msra.mxu0 %v42_v14  ;;  %v87_v25 = vld [vmem:[%s647_s1 + $0x1c8] sm:$0xff]  ;;  %v86_v29 = vld [vmem:[%s647_s1 + $0x1c0] sm:$0xff]  ;;  %v85_v33 = vld [vmem:[%s647_s1 + $0x1b8] sm:$0xff] }
   0xb   :  { %335 = vmatpush3.msra.mxu1 %v74_v15  ;;  %292 = vmatprep.subr.mxu0 %v57_v16  ;;  %v39_v26 = vld [vmem:[%s647_s1 + $0x48] sm:$0xff]  ;;  %v38_v30 = vld [vmem:[%s647_s1 + $0x40] sm:$0xff]  ;;  %v37_v34 = vld [vmem:[%s647_s1 + $0x38] sm:$0xff] }
   0xc   :  { %336 = vmatprep.subr.mxu1 %v89_v17  ;;  %293 = vmatpush3.msra.mxu0 %v41_v18  ;;  %v71_v27 = vld [vmem:[%s647_s1 + $0x148] sm:$0xff]  ;;  %v70_v31 = vld [vmem:[%s647_s1 + $0x140] sm:$0xff]  ;;  %v69_v35 = vld [vmem:[%s647_s1 + $0x138] sm:$0xff] }
   0xd   :  { %337 = vmatpush3.msra.mxu1 %v73_v19  ;;  %294 = vmatprep.subr.mxu0 %v56_v20  ;;  %v52_v36 = vld [vmem:[%s647_s1 + $0xb0] sm:$0xff]  ;;  %v51_v40 = vld [vmem:[%s647_s1 + $0xa8] sm:$0xff]  ;;  %v50_v44 = vld [vmem:[%s647_s1 + $0xa0] sm:$0xff] }
   0xe   :  { %338 = vmatprep.subr.mxu1 %v88_v21  ;;  %295 = vmatpush3.msra.mxu0 %v40_v22  ;;  %v84_v37 = vld [vmem:[%s647_s1 + $0x1b0] sm:$0xff]  ;;  %v83_v41 = vld [vmem:[%s647_s1 + $0x1a8] sm:$0xff]  ;;  %v82_v45 = vld [vmem:[%s647_s1 + $0x1a0] sm:$0xff] }
   0xf   :  { %339 = vmatpush3.msra.mxu1 %v72_v23  ;;  %296 = vmatprep.subr.mxu0 %v55_v24  ;;  %v36_v38 = vld [vmem:[%s647_s1 + $0x30] sm:$0xff]  ;;  %v35_v42 = vld [vmem:[%s647_s1 + $0x28] sm:$0xff]  ;;  %v34_v46 = vld [vmem:[%s647_s1 + $0x20] sm:$0xff] }
  0x10   :  { %340 = vmatprep.subr.mxu1 %v87_v25  ;;  %297 = vmatpush3.msra.mxu0 %v39_v26  ;;  %v68_v39 = vld [vmem:[%s647_s1 + $0x130] sm:$0xff]  ;;  %v67_v43 = vld [vmem:[%s647_s1 + $0x128] sm:$0xff]  ;;  %v66_v47 = vld [vmem:[%s647_s1 + $0x120] sm:$0xff] }
  0x11   :  { %341 = vmatpush3.msra.mxu1 %v71_v27  ;;  %298 = vmatprep.subr.mxu0 %v54_v28  ;;  %v49_v48 = vld [vmem:[%s647_s1 + $0x98] sm:$0xff]  ;;  %v48_v52 = vld [vmem:[%s647_s1 + $0x90] sm:$0xff]  ;;  %v47_v56 = vld [vmem:[%s647_s1 + $0x88] sm:$0xff] }
  0x12   :  { %342 = vmatprep.subr.mxu1 %v86_v29  ;;  %299 = vmatpush3.msra.mxu0 %v38_v30  ;;  %v81_v49 = vld [vmem:[%s647_s1 + $0x198] sm:$0xff]  ;;  %v80_v53 = vld [vmem:[%s647_s1 + $0x190] sm:$0xff]  ;;  %v79_v57 = vld [vmem:[%s647_s1 + $0x188] sm:$0xff] }
  0x13   :  { %343 = vmatpush3.msra.mxu1 %v70_v31  ;;  %300 = vmatprep.subr.mxu0 %v53_v32  ;;  %v33_v50 = vld [vmem:[%s647_s1 + $0x18] sm:$0xff]  ;;  %v32_v54 = vld [vmem:[%s647_s1 + $0x10] sm:$0xff]  ;;  %v31_v58 = vld [vmem:[%s647_s1 + $0x8] sm:$0xff] }
  0x14   :  { %344 = vmatprep.subr.mxu1 %v85_v33  ;;  %301 = vmatpush3.msra.mxu0 %v37_v34  ;;  %v65_v51 = vld [vmem:[%s647_s1 + $0x118] sm:$0xff]  ;;  %v64_v55 = vld [vmem:[%s647_s1 + $0x110] sm:$0xff]  ;;  %v63_v59 = vld [vmem:[%s647_s1 + $0x108] sm:$0xff] }
  0x15   :  { %345 = vmatpush3.msra.mxu1 %v69_v35  ;;  %302 = vmatprep.subr.mxu0 %v52_v36  ;;  %v46_v60 = vld [vmem:[%s647_s1 + $0x80] sm:$0xff]  ;;  %v15_v63 = vld [vmem:[%s648_s0 + $0x8] sm:$0xff]  ;;  %v17_v1 = vld [vmem:[%s648_s0 + $0x18] sm:$0xff] }
  0x16   :  { %346 = vmatprep.subr.mxu1 %v84_v37  ;;  %303 = vmatpush3.msra.mxu0 %v36_v38  ;;  %v78_v61 = vld [vmem:[%s647_s1 + $0x180] sm:$0xff]  ;;  %v16_v3 = vld [vmem:[%s648_s0 + $0x10] sm:$0xff]  ;;  %v19_v4 = vld [vmem:[%s648_s0 + $0x28] sm:$0xff] }
  0x17   :  { %347 = vmatpush3.msra.mxu1 %v68_v39  ;;  %304 = vmatprep.subr.mxu0 %v51_v40  ;;  %v30_v62 = vld [vmem:[%s647_s1] sm:$0xff]  ;;  %v21_v5 = vld [vmem:[%s648_s0 + $0x38] sm:$0xff]  ;;  %v20_v7 = vld [vmem:[%s648_s0 + $0x30] sm:$0xff] }
  0x18   :  { %348 = vmatprep.subr.mxu1 %v83_v41  ;;  %305 = vmatpush3.msra.mxu0 %v35_v42  ;;  %v62_v0 = vld [vmem:[%s647_s1 + $0x100] sm:$0xff]  ;;  %v23_v8 = vld [vmem:[%s648_s0 + $0x48] sm:$0xff]  ;;  %v25_v9 = vld [vmem:[%s648_s0 + $0x58] sm:$0xff] }
  0x19   :  { %349 = vmatpush3.msra.mxu1 %v67_v43  ;;  %306 = vmatprep.subr.mxu0 %v50_v44  ;;  %v14_v2 = vld [vmem:[%s648_s0] sm:$0xff]  ;;  %v24_v11 = vld [vmem:[%s648_s0 + $0x50] sm:$0xff]  ;;  %v27_v12 = vld [vmem:[%s648_s0 + $0x68] sm:$0xff] }
  0x1a   :  { %350 = vmatprep.subr.mxu1 %v82_v45  ;;  %307 = vmatpush3.msra.mxu0 %v34_v46  ;;  %v18_v6 = vld [vmem:[%s648_s0 + $0x20] sm:$0xff]  ;;  %v29_v13 = vld [vmem:[%s648_s0 + $0x78] sm:$0xff]  ;;  %v28_v15 = vld [vmem:[%s648_s0 + $0x70] sm:$0xff] }
  0x1b   :  { %351 = vmatpush3.msra.mxu1 %v66_v47  ;;  %308 = vmatprep.subr.mxu0 %v49_v48  ;;  %v22_v10 = vld [vmem:[%s648_s0 + $0x40] sm:$0xff] }
  0x1c   :  { %352 = vmatprep.subr.mxu1 %v81_v49  ;;  %309 = vmatpush3.msra.mxu0 %v33_v50  ;;  %v26_v14 = vld [vmem:[%s648_s0 + $0x60] sm:$0xff] }
  0x1d   :  { %353 = vmatpush3.msra.mxu1 %v65_v51  ;;  %310 = vmatprep.subr.mxu0 %v48_v52  ;;  %v283_v18 = vld [vmem:[%s649_s2] ss:$0 sm:$0xff] }
  0x1e   :  { %354 = vmatprep.subr.mxu1 %v80_v53  ;;  %311 = vmatpush3.msra.mxu0 %v32_v54 }
  0x1f   :  { %355 = vmatpush3.msra.mxu1 %v64_v55  ;;  %312 = vmatprep.subr.mxu0 %v47_v56 }
  0x20   :  { %356 = vmatprep.subr.mxu1 %v79_v57  ;;  %313 = vmatpush3.msra.mxu0 %v31_v58 }
  0x21   :  { %357 = vmatpush3.msra.mxu1 %v63_v59  ;;  %314 = vmatprep.subr.mxu0 %v46_v60 }
  0x22   :  { %358 = vmatprep.subr.mxu1 %v78_v61  ;;  %315 = vmatpush3.msra.mxu0 %v30_v62 }
  0x23   :  { %165 = vmatprep.mubr.f32.mxu0 %v15_v63  ;;  %359 = vmatpush3.msra.mxu1 %v62_v0 }
  0x24   :  { %250 = vmatprep.mubr.f32.mxu1 %v17_v1  ;;  %166 = vmatmul.mubr.f32.vlgmr.msra.gmra.mxu0 %v14_v2 }
  0x25   :  { %251 = vmatmul.mubr.f32.vlgmr.msra.gmra.mxu1 %v16_v3  ;;  %170 = vmatprep.mubr.f32.mxu0 %v19_v4 }
  0x26   :  { %255 = vmatprep.mubr.f32.mxu1 %v21_v5 }
  0x28   :  { %171 = vmatmul.mubr.f32.gmra.mxu0 %v18_v6 }
  0x29   :  { %256 = vmatmul.mubr.f32.gmra.mxu1 %v20_v7  ;;  %175 = vmatprep.mubr.f32.mxu0 %v23_v8 }
  0x2a   :  { %260 = vmatprep.mubr.f32.mxu1 %v25_v9 }
  0x2c   :  { %176 = vmatmul.mubr.f32.gmra.mxu0 %v22_v10 }
  0x2d   :  { %261 = vmatmul.mubr.f32.gmra.mxu1 %v24_v11  ;;  %180 = vmatprep.mubr.f32.mxu0 %v27_v12 }
  0x2e   :  { %265 = vmatprep.mubr.f32.mxu1 %v29_v13 }
  0x30   :  { %181 = vmatmul.mubr.f32.gmra.mxu0 %v26_v14 }
  0x31   :  { %266 = vmatmul.mubr.f32.gmra.mxu1 %v28_v15 }
  0xe4   :  { %v316_v16 = vpop.f32.mrf.mxu0 }
  0xe5   :  { %v360_v17 = vpop.f32.mrf.mxu1 }
  0xe6   :  { %v317_v19 = vpop.f32.mrf.mxu0 }
  0xe7   :  { %v361_v20 = vpop.f32.mrf.mxu1  ;;  %v318_v21 = vadd.f32 %v317_v19, %v316_v16 }
  0xe8   :  { %v319_v22 = vpop.f32.mrf.mxu0  ;;  %v362_v25 = vadd.f32 %v361_v20, %v360_v17 }
  0xe9   :  { %v363_v23 = vpop.f32.mrf.mxu1  ;;  %v168_v24 = vadd.f32 %v318_v21, %v283_v18 }
  0xea   :  { %v320_v26 = vpop.f32.mrf.mxu0 }
  0xeb   :  { %v364_v27 = vpop.f32.mrf.mxu1  ;;  %v253_v28 = vadd.f32 %v362_v25, %v168_v24  ;;  %v321_v29 = vadd.f32 %v320_v26, %v319_v22 }
  0xec   :  { %v322_v30 = vpop.f32.mrf.mxu0  ;;  %v365_v34 = vadd.f32 %v364_v27, %v363_v23 }
  0xed   :  { %v366_v31 = vpop.f32.mrf.mxu1  ;;  %v271_v32 = vmax.f32 %v253_v28, 0.0  ;;  %v173_v33 = vadd.f32 %v321_v29, %v283_v18 }
  0xee   :  { %v323_v35 = vpop.f32.mrf.mxu0 }
  0xef   :  { %v367_v36 = vpop.f32.mrf.mxu1  ;;  %275 = vst [vmem:[%s650_s3] sm:$0xff] %v271_v32  ;;  %v258_v37 = vadd.f32 %v365_v34, %v173_v33  ;;  %v324_v38 = vadd.f32 %v323_v35, %v322_v30 }
  0xf0   :  { %v325_v39 = vpop.f32.mrf.mxu0  ;;  %v368_v43 = vadd.f32 %v367_v36, %v366_v31 }
  0xf1   :  { %v369_v40 = vpop.f32.mrf.mxu1  ;;  %v272_v41 = vmax.f32 %v258_v37, 0.0  ;;  %v178_v42 = vadd.f32 %v324_v38, %v283_v18 }
  0xf2   :  { %v326_v44 = vpop.f32.mrf.mxu0 }
  0xf3   :  { %v370_v45 = vpop.f32.mrf.mxu1  ;;  %276 = vst [vmem:[%s650_s3 + $0x8] sm:$0xff] %v272_v41  ;;  %v263_v46 = vadd.f32 %v368_v43, %v178_v42  ;;  %v327_v47 = vadd.f32 %v326_v44, %v325_v39 }
  0xf4   :  { %v371_v50 = vadd.f32 %v370_v45, %v369_v40 }
  0xf5   :  { %v273_v48 = vmax.f32 %v263_v46, 0.0  ;;  %v183_v49 = vadd.f32 %v327_v47, %v283_v18 }
  0xf7   :  { %277 = vst [vmem:[%s650_s3 + $0x10] sm:$0xff] %v273_v48  ;;  %v268_v51 = vadd.f32 %v371_v50, %v183_v49 }
  0xf9   :  { %v274_v52 = vmax.f32 %v268_v51, 0.0 }
  0xfb   :  { %278 = vst [vmem:[%s650_s3 + $0x18] sm:$0xff] %v274_v52 }

// kernel: forward.8
= control target key start
LH: loop header
LB: loop body
LE: loop exit
PB: predicated region body
PF: predicated region fallthrough
CT: control target
= control target key end

     0   :  { %vm118_vm0 = vcmask 523264   ;;  %vm533_vm1 = vcmask 130048   ;;  %s1293_s1 = inlined_call_operand.vmem [shape: f32[576,128], index: 1, kind: input, shape index: {}]   ;;  %s1294_s0 = inlined_call_operand.vmem [shape: f32[32,576], index: 0, kind: input, shape index: {}]   ;;  %s1295_s3 = inlined_call_operand.vmem [shape: f32[16,128], index: 3, kind: input, shape index: {}]   ;;  %s1296_s2 = inlined_call_operand.vmem [shape: f32[1,128], index: 2, kind: input, shape index: {}]   ;;  %s1297_s4 = inlined_call_operand.vmem [shape: f32[32,128], index: 4, kind: output, shape index: {0}]   ;;  %s1298_s5 = inlined_call_operand.vmem [shape: f32[32,128], index: 5, kind: output, shape index: {1}]  }
   0x1   :  { %v70_v0 = vld [vmem:[%s1293_s1 + $0xf8] sm:$0xff]  ;;  %v69_v2 = vld [vmem:[%s1293_s1 + $0xf0] sm:$0xff]  ;;  %v68_v6 = vld [vmem:[%s1293_s1 + $0xe8] sm:$0xff] }
   0x2   :  { %v54_v1 = vld [vmem:[%s1293_s1 + $0x78] sm:$0xff]  ;;  %748 = vmatprep.subr.mxu0 %v70_v0  ;;  %v53_v4 = vld [vmem:[%s1293_s1 + $0x70] sm:$0xff]  ;;  %v52_v8 = vld [vmem:[%s1293_s1 + $0x68] sm:$0xff] }
   0x3   :  { %v102_v3 = vld [vmem:[%s1293_s1 + $0x1f8] sm:$0xff]  ;;  %749 = vmatpush3.msra.mxu0 %v54_v1  ;;  %v101_v7 = vld [vmem:[%s1293_s1 + $0x1f0] sm:$0xff]  ;;  %v100_v10 = vld [vmem:[%s1293_s1 + $0x1e8] sm:$0xff] }
   0x4   :  { %v86_v5 = vld [vmem:[%s1293_s1 + $0x178] sm:$0xff]  ;;  %792 = vmatprep.subr.mxu1 %v102_v3  ;;  %750 = vmatprep.subr.mxu0 %v69_v2  ;;  %v85_v9 = vld [vmem:[%s1293_s1 + $0x170] sm:$0xff]  ;;  %v67_v11 = vld [vmem:[%s1293_s1 + $0xe0] sm:$0xff] }
   0x5   :  { %793 = vmatpush3.msra.mxu1 %v86_v5  ;;  %751 = vmatpush3.msra.mxu0 %v53_v4  ;;  %v84_v12 = vld [vmem:[%s1293_s1 + $0x168] sm:$0xff]  ;;  %v51_v13 = vld [vmem:[%s1293_s1 + $0x60] sm:$0xff]  ;;  %v66_v15 = vld [vmem:[%s1293_s1 + $0xd8] sm:$0xff] }
   0x6   :  { %794 = vmatprep.subr.mxu1 %v101_v7  ;;  %752 = vmatprep.subr.mxu0 %v68_v6  ;;  %v99_v14 = vld [vmem:[%s1293_s1 + $0x1e0] sm:$0xff]  ;;  %v50_v17 = vld [vmem:[%s1293_s1 + $0x58] sm:$0xff]  ;;  %v65_v19 = vld [vmem:[%s1293_s1 + $0xd0] sm:$0xff] }
   0x7   :  { %795 = vmatpush3.msra.mxu1 %v85_v9  ;;  %753 = vmatpush3.msra.mxu0 %v52_v8  ;;  %v83_v16 = vld [vmem:[%s1293_s1 + $0x160] sm:$0xff]  ;;  %v98_v18 = vld [vmem:[%s1293_s1 + $0x1d8] sm:$0xff]  ;;  %v49_v21 = vld [vmem:[%s1293_s1 + $0x50] sm:$0xff] }
   0x8   :  { %796 = vmatprep.subr.mxu1 %v100_v10  ;;  %754 = vmatprep.subr.mxu0 %v67_v11  ;;  %v82_v20 = vld [vmem:[%s1293_s1 + $0x158] sm:$0xff]  ;;  %v97_v22 = vld [vmem:[%s1293_s1 + $0x1d0] sm:$0xff]  ;;  %v64_v23 = vld [vmem:[%s1293_s1 + $0xc8] sm:$0xff] }
   0x9   :  { %797 = vmatpush3.msra.mxu1 %v84_v12  ;;  %755 = vmatpush3.msra.mxu0 %v51_v13  ;;  %v81_v24 = vld [vmem:[%s1293_s1 + $0x150] sm:$0xff]  ;;  %v48_v25 = vld [vmem:[%s1293_s1 + $0x48] sm:$0xff]  ;;  %v63_v27 = vld [vmem:[%s1293_s1 + $0xc0] sm:$0xff] }
   0xa   :  { %798 = vmatprep.subr.mxu1 %v99_v14  ;;  %756 = vmatprep.subr.mxu0 %v66_v15  ;;  %v96_v26 = vld [vmem:[%s1293_s1 + $0x1c8] sm:$0xff]  ;;  %v47_v29 = vld [vmem:[%s1293_s1 + $0x40] sm:$0xff]  ;;  %v62_v31 = vld [vmem:[%s1293_s1 + $0xb8] sm:$0xff] }
   0xb   :  { %799 = vmatpush3.msra.mxu1 %v83_v16  ;;  %757 = vmatpush3.msra.mxu0 %v50_v17  ;;  %v80_v28 = vld [vmem:[%s1293_s1 + $0x148] sm:$0xff]  ;;  %v95_v30 = vld [vmem:[%s1293_s1 + $0x1c0] sm:$0xff]  ;;  %v46_v33 = vld [vmem:[%s1293_s1 + $0x38] sm:$0xff] }
   0xc   :  { %800 = vmatprep.subr.mxu1 %v98_v18  ;;  %758 = vmatprep.subr.mxu0 %v65_v19  ;;  %v79_v32 = vld [vmem:[%s1293_s1 + $0x140] sm:$0xff]  ;;  %v94_v34 = vld [vmem:[%s1293_s1 + $0x1b8] sm:$0xff]  ;;  %v61_v35 = vld [vmem:[%s1293_s1 + $0xb0] sm:$0xff] }
   0xd   :  { %801 = vmatpush3.msra.mxu1 %v82_v20  ;;  %759 = vmatpush3.msra.mxu0 %v49_v21  ;;  %v78_v36 = vld [vmem:[%s1293_s1 + $0x138] sm:$0xff]  ;;  %v45_v37 = vld [vmem:[%s1293_s1 + $0x30] sm:$0xff]  ;;  %v60_v39 = vld [vmem:[%s1293_s1 + $0xa8] sm:$0xff] }
   0xe   :  { %802 = vmatprep.subr.mxu1 %v97_v22  ;;  %760 = vmatprep.subr.mxu0 %v64_v23  ;;  %v93_v38 = vld [vmem:[%s1293_s1 + $0x1b0] sm:$0xff]  ;;  %v44_v41 = vld [vmem:[%s1293_s1 + $0x28] sm:$0xff]  ;;  %v59_v43 = vld [vmem:[%s1293_s1 + $0xa0] sm:$0xff] }
   0xf   :  { %803 = vmatpush3.msra.mxu1 %v81_v24  ;;  %761 = vmatpush3.msra.mxu0 %v48_v25  ;;  %v77_v40 = vld [vmem:[%s1293_s1 + $0x130] sm:$0xff]  ;;  %v92_v42 = vld [vmem:[%s1293_s1 + $0x1a8] sm:$0xff]  ;;  %v43_v45 = vld [vmem:[%s1293_s1 + $0x20] sm:$0xff] }
  0x10   :  { %804 = vmatprep.subr.mxu1 %v96_v26  ;;  %762 = vmatprep.subr.mxu0 %v63_v27  ;;  %v76_v44 = vld [vmem:[%s1293_s1 + $0x128] sm:$0xff]  ;;  %v91_v46 = vld [vmem:[%s1293_s1 + $0x1a0] sm:$0xff]  ;;  %v58_v47 = vld [vmem:[%s1293_s1 + $0x98] sm:$0xff] }
  0x11   :  { %805 = vmatpush3.msra.mxu1 %v80_v28  ;;  %763 = vmatpush3.msra.mxu0 %v47_v29  ;;  %v75_v48 = vld [vmem:[%s1293_s1 + $0x120] sm:$0xff]  ;;  %v42_v49 = vld [vmem:[%s1293_s1 + $0x18] sm:$0xff]  ;;  %v57_v51 = vld [vmem:[%s1293_s1 + $0x90] sm:$0xff] }
  0x12   :  { %806 = vmatprep.subr.mxu1 %v95_v30  ;;  %764 = vmatprep.subr.mxu0 %v62_v31  ;;  %v90_v50 = vld [vmem:[%s1293_s1 + $0x198] sm:$0xff]  ;;  %v41_v53 = vld [vmem:[%s1293_s1 + $0x10] sm:$0xff]  ;;  %v56_v55 = vld [vmem:[%s1293_s1 + $0x88] sm:$0xff] }
  0x13   :  { %807 = vmatpush3.msra.mxu1 %v79_v32  ;;  %765 = vmatpush3.msra.mxu0 %v46_v33  ;;  %v74_v52 = vld [vmem:[%s1293_s1 + $0x118] sm:$0xff]  ;;  %v89_v54 = vld [vmem:[%s1293_s1 + $0x190] sm:$0xff]  ;;  %v40_v57 = vld [vmem:[%s1293_s1 + $0x8] sm:$0xff] }
  0x14   :  { %808 = vmatprep.subr.mxu1 %v94_v34  ;;  %766 = vmatprep.subr.mxu0 %v61_v35  ;;  %v73_v56 = vld [vmem:[%s1293_s1 + $0x110] sm:$0xff]  ;;  %v88_v58 = vld [vmem:[%s1293_s1 + $0x188] sm:$0xff]  ;;  %v55_v59 = vld [vmem:[%s1293_s1 + $0x80] sm:$0xff] }
  0x15   :  { %809 = vmatpush3.msra.mxu1 %v78_v36  ;;  %767 = vmatpush3.msra.mxu0 %v45_v37  ;;  %v20_v60 = vld [vmem:[%s1294_s0 + $0x8] sm:$0xff]  ;;  %v39_v61 = vld [vmem:[%s1293_s1] sm:$0xff]  ;;  %v110_v1 = vld [vmem:[%s1293_s1 + $0x238] sm:$0xff] }
  0x16   :  { %810 = vmatprep.subr.mxu1 %v93_v38  ;;  %768 = vmatprep.subr.mxu0 %v60_v39  ;;  %v72_v62 = vld [vmem:[%s1293_s1 + $0x108] sm:$0xff]  ;;  %v19_v63 = vld [vmem:[%s1294_s0] sm:$0xff]  ;;  %v22_v3 = vld [vmem:[%s1294_s0 + $0x18] sm:$0xff] }
  0x17   :  { %811 = vmatpush3.msra.mxu1 %v77_v40  ;;  %769 = vmatpush3.msra.mxu0 %v44_v41  ;;  %v87_v0 = vld [vmem:[%s1293_s1 + $0x180] sm:$0xff]  ;;  %v21_v4 = vld [vmem:[%s1294_s0 + $0x10] sm:$0xff]  ;;  %v24_v7 = vld [vmem:[%s1294_s0 + $0x28] sm:$0xff] }
  0x18   :  { %812 = vmatprep.subr.mxu1 %v92_v42  ;;  %770 = vmatprep.subr.mxu0 %v59_v43  ;;  %v71_v2 = vld [vmem:[%s1293_s1 + $0x100] sm:$0xff]  ;;  %v109_v5 = vld [vmem:[%s1293_s1 + $0x230] sm:$0xff]  ;;  %v108_v8 = vld [vmem:[%s1293_s1 + $0x228] sm:$0xff] }
  0x19   :  { %813 = vmatpush3.msra.mxu1 %v76_v44  ;;  %771 = vmatpush3.msra.mxu0 %v43_v45  ;;  %v25_v6 = vld [vmem:[%s1294_s0 + $0x30] sm:$0xff]  ;;  %v27_v9 = vld [vmem:[%s1294_s0 + $0x40] sm:$0xff]  ;;  %v26_v10 = vld [vmem:[%s1294_s0 + $0x38] sm:$0xff] }
  0x1a   :  { %814 = vmatprep.subr.mxu1 %v91_v46  ;;  %772 = vmatprep.subr.mxu0 %v58_v47  ;;  %v107_v11 = vld [vmem:[%s1293_s1 + $0x220] sm:$0xff]  ;;  %v30_v12 = vld [vmem:[%s1294_s0 + $0x58] sm:$0xff]  ;;  %v29_v13 = vld [vmem:[%s1294_s0 + $0x50] sm:$0xff] }
  0x1b   :  { %815 = vmatpush3.msra.mxu1 %v75_v48  ;;  %773 = vmatpush3.msra.mxu0 %v42_v49  ;;  %v106_v14 = vld [vmem:[%s1293_s1 + $0x218] sm:$0xff]  ;;  %v32_v15 = vld [vmem:[%s1294_s0 + $0x68] sm:$0xff]  ;;  %v31_v16 = vld [vmem:[%s1294_s0 + $0x60] sm:$0xff] }
  0x1c   :  { %816 = vmatprep.subr.mxu1 %v90_v50  ;;  %774 = vmatprep.subr.mxu0 %v57_v51  ;;  %v105_v17 = vld [vmem:[%s1293_s1 + $0x210] sm:$0xff]  ;;  %v35_v18 = vld [vmem:[%s1294_s0 + $0x80] sm:$0xff]  ;;  %v34_v19 = vld [vmem:[%s1294_s0 + $0x78] sm:$0xff] }
  0x1d   :  { %817 = vmatpush3.msra.mxu1 %v74_v52  ;;  %775 = vmatpush3.msra.mxu0 %v41_v53  ;;  %v104_v20 = vld [vmem:[%s1293_s1 + $0x208] sm:$0xff]  ;;  %v1196_v21 = vld [vmem:[%s1295_s3] sm:$0xff]  ;;  %v37_v22 = vld [vmem:[%s1294_s0 + $0x90] sm:$0xff] }
  0x1e   :  { %818 = vmatprep.subr.mxu1 %v89_v54  ;;  %776 = vmatprep.subr.mxu0 %v56_v55  ;;  %v36_v23 = vld [vmem:[%s1294_s0 + $0x88] sm:$0xff]  ;;  %v103_v24 = vld [vmem:[%s1293_s1 + $0x200] sm:$0xff]  ;;  %v396_v26 = vmul.f32 %v1196_v21, %v1196_v21  ;;  %v33_v29 = vld [vmem:[%s1294_s0 + $0x70] sm:$0xff] }
  0x1f   :  { %819 = vmatpush3.msra.mxu1 %v73_v56  ;;  %777 = vmatpush3.msra.mxu0 %v40_v57  ;;  %v23_v25 = vld [vmem:[%s1294_s0 + $0x20] sm:$0xff]  ;;  %v28_v27 = vld [vmem:[%s1294_s0 + $0x48] sm:$0xff]  ;;  %v38_v31 = vld [vmem:[%s1294_s0 + $0x98] sm:$0xff] }
  0x20   :  { %820 = vmatprep.subr.mxu1 %v88_v58  ;;  %778 = vmatprep.subr.mxu0 %v55_v59  ;;  %v1218_v28 = vld [vmem:[%s1295_s3 + $0x8] sm:$0xff]  ;;  %v735_v45 = vld [vmem:[%s1296_s2] ss:$0 sm:$0xff] }
  0x21   :  { %195 = vmatprep.mubr.f32.mxu0 %v20_v60  ;;  %779 = vmatpush3.msra.mxu0 %v39_v61  ;;  %v397_v30 = vmul.f32 %v1218_v28, %v1218_v28 }
  0x22   :  { %821 = vmatpush3.msra.mxu1 %v72_v62  ;;  %196 = vmatmul.mubr.f32.vlgmr.msra.gmra.mxu0 %v19_v63 }
  0x23   :  { %822 = vmatprep.subr.mxu1 %v87_v0  ;;  %860 = vmatprep.subr.mxu0 %v110_v1 }
  0x24   :  { %823 = vmatpush3.msra.mxu1 %v71_v2  ;;  %280 = vmatprep.mubr.f32.mxu1 %v22_v3 }
  0x25   :  { %861 = vmatpush3.msra.mxu0 %v110_v1  ;;  %281 = vmatmul.mubr.f32.vlgmr.msra.gmra.mxu1 %v21_v4 }
  0x26   :  { %862 = vmatprep.subr.mxu0 %v109_v5  ;;  %200 = vmatprep.mubr.f32.mxu0 %v25_v6 }
  0x27   :  { %863 = vmatpush3.msra.mxu0 %v109_v5  ;;  %285 = vmatprep.mubr.f32.mxu1 %v27_v9 }
  0x28   :  { %201 = vmatmul.mubr.f32.gmra.mxu0 %v24_v7  ;;  %864 = vmatprep.subr.mxu0 %v108_v8 }
  0x29   :  { %865 = vmatpush3.msra.mxu0 %v108_v8  ;;  %286 = vmatmul.mubr.f32.gmra.mxu1 %v26_v10 }
  0x2a   :  { %866 = vmatprep.subr.mxu0 %v107_v11  ;;  %205 = vmatprep.mubr.f32.mxu0 %v30_v12 }
  0x2b   :  { %867 = vmatpush3.msra.mxu0 %v107_v11  ;;  %290 = vmatprep.mubr.f32.mxu1 %v32_v15  ;;  %v523_v15 = vlaneseq }
  0x2c   :  { %206 = vmatmul.mubr.f32.gmra.mxu0 %v29_v13  ;;  %868 = vmatprep.subr.mxu0 %v106_v14 }
  0x2d   :  { %869 = vmatpush3.msra.mxu0 %v106_v14  ;;  %291 = vmatmul.mubr.f32.gmra.mxu1 %v31_v16  ;;  %v524_v16 = vshrl.u32 %v523_v15, 7 }
  0x2e   :  { %870 = vmatprep.subr.mxu0 %v105_v17  ;;  %210 = vmatprep.mubr.f32.mxu0 %v35_v18 }
  0x2f   :  { %871 = vmatpush3.msra.mxu0 %v105_v17  ;;  %295 = vmatprep.mubr.f32.mxu1 %v37_v22  ;;  %v525_v17 = vsub.s32 0, %v524_v16 }
  0x30   :  { %211 = vmatmul.mubr.f32.gmra.mxu0 %v34_v19  ;;  %872 = vmatprep.subr.mxu0 %v104_v20 }
  0x31   :  { %873 = vmatpush3.msra.mxu0 %v104_v20  ;;  %296 = vmatmul.mubr.f32.gmra.mxu1 %v36_v23 }
  0x32   :  { %874 = vmatprep.subr.mxu0 %v103_v24  ;;  %876 = vmatprep.mubr.msk.f32.mxu0 %vm118_vm0, %v23_v25 }
  0x33   :  { %875 = vmatpush3.msra.mxu0 %v103_v24  ;;  %398 = vadd.xlane.f32.xlu0 %v396_v26 }
  0x34   :  { %877 = vmatmul.mubr.msk.f32.vlgmr.msra.gmra.mxu0 %vm118_vm0, %v28_v27  ;;  %882 = vmatprep.subr.mxu1 %v1218_v28 }
  0x35   :  { %879 = vmatprep.mubr.msk.f32.mxu0 %vm118_vm0, %v33_v29  ;;  %883 = vmatpush3.xpose.msra.mxu1 %v1218_v28 }
  0x36   :  { %892 = vmatprep.subr.mxu0 %v1218_v28  ;;  %884 = vmatprep.subr.mxu1 %v1196_v21 }
  0x37   :  { %893 = vmatpush3.msra.mxu0 %v1218_v28  ;;  %400 = vadd.xlane.f32.xlu0 %v397_v30 }
  0x38   :  { %880 = vmatmul.mubr.msk.f32.gmra.mxu0 %vm118_vm0, %v38_v31  ;;  %894 = vmatprep.subr.mxu0 %v1196_v21 }
  0x39   :  { %885 = vmatpush3.xpose.msra.mxu1 %v1196_v21  ;;  %895 = vmatpush3.msra.mxu0 %v1196_v21 }
  0x3a   :  { %902 = vmatprep.subr.mxu1 %v1218_v28 }
  0xbc   :  { %v399_v32 = vpop.xlane.xlu0 %398 }
  0xbd   :  { %402 = vxpose.xlu1.b32.start [1/2] (short) (narrow) %v399_v32, 8 }
  0xc0   :  { %v401_v33 = vpop.xlane.xlu0 %400 }
  0xc1   :  { %403 = vxpose.xlu1.b32.end [2/2] (short) (narrow) %v401_v33, 8 }
  0xe2   :  { %v780_v34 = vpop.f32.mrf.mxu0 }
  0xe4   :  { %v781_v35 = vpop.f32.mrf.mxu0 }
  0xe5   :  { %v824_v36 = vpop.f32.mrf.mxu1  ;;  %v782_v42 = vadd.f32 %v781_v35, %v780_v34 }
  0xe7   :  { %v825_v38 = vpop.f32.mrf.mxu1  ;;  %v198_v50 = vadd.f32 %v782_v42, %v735_v45 }
  0xe8   :  { %v783_v37 = vpop.f32.mrf.mxu0  ;;  %v826_v51 = vadd.f32 %v825_v38, %v824_v36  ;;  %v1263_v36 = vand.u32 127, %v523_v15 }
  0xe9   :  { %v827_v40 = vpop.f32.mrf.mxu1 }
  0xea   :  { %v784_v39 = vpop.f32.mrf.mxu0  ;;  %v283_v62 = vadd.f32 %v826_v51, %v198_v50 }
  0xeb   :  { %v785_v41 = vadd.f32 %v784_v39, %v783_v37  ;;  %v828_v44 = vpop.f32.mrf.mxu1 }
  0xec   :  { %v786_v43 = vpop.f32.mrf.mxu0  ;;  %v829_v49 = vadd.f32 %v828_v44, %v827_v40 }
  0xed   :  { %v830_v47 = vpop.f32.mrf.mxu1  ;;  %v203_v48 = vadd.f32 %v785_v41, %v735_v45 }
  0xee   :  { %v787_v46 = vpop.f32.mrf.mxu0 }
  0xef   :  { %v788_v52 = vadd.f32 %v787_v46, %v786_v43  ;;  %v831_v54 = vpop.f32.mrf.mxu1  ;;  %v288_v58 = vadd.f32 %v829_v49, %v203_v48 }
  0xf0   :  { %v789_v53 = vpop.f32.mrf.mxu0  ;;  %v832_v63 = vadd.f32 %v831_v54, %v830_v47 }
  0xf1   :  { %v833_v56 = vpop.f32.mrf.mxu1  ;;  %v208_v59 = vadd.f32 %v788_v52, %v735_v45 }
  0xf2   :  { %v790_v55 = vpop.f32.mrf.mxu0 }
  0xf3   :  { %v791_v57 = vadd.f32 %v790_v55, %v789_v53  ;;  %v834_v60 = vpop.f32.mrf.mxu1  ;;  %v293_v10 = vadd.f32 %v832_v63, %v208_v59 }
  0xf4   :  { %v878_v61 = vpop.f32.mrf.mxu0  ;;  %v835_v1 = vadd.f32 %v834_v60, %v833_v56 }
  0xf5   :  { %v213_v0 = vadd.f32 %v791_v57, %v735_v45  ;;  %v373_v2 = vadd.f32 %v878_v61, %v288_v58 }
  0xf6   :  { %v367_v3 = vpop.f32.mrf.mxu0 }
  0xf7   :  { %v387_v4 = vmax.f32 %v373_v2, 0.0  ;;  %v368_v5 = vadd.f32 %v367_v3, %v283_v62  ;;  %v298_v6 = vadd.f32 %v835_v1, %v213_v0 }
  0xf8   :  { %v881_v7 = vpop.f32.mrf.mxu0 }
  0xf9   :  { %391 = vst [vmem:[%s1297_s4 + $0x8] sm:$0xff] %v387_v4  ;;  %v386_v8 = vmax.f32 %v368_v5, 0.0  ;;  %v383_v9 = vadd.f32 %v881_v7, %v298_v6 }
  0xfa   :  { %v377_v11 = vpop.f32.mrf.mxu0 }
  0xfb   :  { %390 = vst [vmem:[%s1297_s4] sm:$0xff] %v386_v8  ;;  %v389_v12 = vmax.f32 %v383_v9, 0.0  ;;  %v378_v13 = vadd.f32 %v377_v11, %v293_v10  ;;  %886 = vmatprep.mubr.f32.mxu1 %v386_v8 }
  0xfc   :  { %887 = vmatmul.mubr.f32.vlgmr.msra.gmra.mxu1 %v387_v4 }
  0xfd   :  { %393 = vst [vmem:[%s1297_s4 + $0x18] sm:$0xff] %v389_v12  ;;  %v388_v14 = vmax.f32 %v378_v13, 0.0  ;;  %904 = vmatpush3.msra.mxu1 %v1218_v28 }
  0xfe   :  { %903 = vmatprep.subr.mxu1 %v1196_v21 }
  0xff   :  { %392 = vst [vmem:[%s1297_s4 + $0x10] sm:$0xff] %v388_v14  ;;  %889 = vmatprep.mubr.f32.mxu1 %v388_v14  ;;  %905 = vmatpush3.msra.mxu1 %v1196_v21 }
 0x100   :  { %890 = vmatmul.mubr.f32.gmra.mxu1 %v389_v12 }
 0x139   :  { %v418_v18 = vpop.trf.xlu1 }
 0x13a   :  { %v526_v22 = vrot.slane %v418_v18, %v525_v17 }
 0x1bc   :  { %v888_v19 = vpop.f32.mrf.mxu1 }
 0x1bd   :  { %v520_v23 = vmul.f32 2.0, %v888_v19 }
 0x1be   :  { %v500_v20 = vpop.f32.mrf.mxu1 }
 0x1bf   :  { %v519_v24 = vmul.f32 2.0, %v500_v20  ;;  %v528_v31 = vsub.f32 %v526_v22, %v520_v23  ;;  %v907_v20 = vmov 0.0  }
 0x1c0   :  { %v891_v25 = vpop.f32.mrf.mxu1 }
 0x1c1   :  { %v527_v26 = vsub.f32 %v526_v22, %v519_v24  ;;  %v522_v28 = vmul.f32 2.0, %v891_v25  ;;  %v537_v32 = vsel %vm533_vm1, %v528_v31, inf }
 0x1c2   :  { %v510_v27 = vpop.f32.mrf.mxu1 }
 0x1c3   :  { %v521_v29 = vmul.f32 2.0, %v510_v27  ;;  %v534_v30 = vsel %vm533_vm1, %v527_v26, inf  ;;  %v530_v34 = vsub.f32 %v526_v22, %v522_v28 }
 0x1c4   :  { %535 = vmin.xlane.f32.xlu0 %v534_v30 }
 0x1c5   :  { %v529_v21 = vsub.f32 %v526_v22, %v521_v29  ;;  %v543_v35 = vsel %vm533_vm1, %v530_v34, inf }
 0x1c7   :  { %v540_v33 = vsel %vm533_vm1, %v529_v21, inf }
 0x1c8   :  { %538 = vmin.xlane.f32.xlu0 %v537_v32  ;;  %541 = vmin.xlane.f32.xlu1 %v540_v33 }
 0x1cc   :  { %544 = vmin.xlane.f32.xlu0 %v543_v35 }
 0x24d   :  { %v536_v37 = vpop.xlane.xlu0 %535 }
 0x24e   :  { %vm546_vm2 = vcmp.le.f32.partialorder %v527_v26, %v536_v37 }
 0x24f   :  { %v550_v38 = vsel %vm546_vm2, %v1263_v36, 16 }
 0x250   :  { %v554_v42 = vsel %vm533_vm1, %v550_v38, 2147483647 }
 0x251   :  { %v539_v39 = vpop.xlane.xlu0 %538  ;;  %v542_v40 = vpop.xlane.xlu1 %541  ;;  %v556_v48 = vshra.s32 %v554_v42, 16  ;;  %v555_v58 = vand.u32 65535, %v554_v42 }
 0x252   :  { %vm547_vm3 = vcmp.le.f32.partialorder %v528_v31, %v539_v39  ;;  %vm548_vm4 = vcmp.le.f32.partialorder %v529_v21, %v542_v40 }
 0x253   :  { %v551_v41 = vsel %vm547_vm3, %v1263_v36, 16  ;;  %v552_v44 = vsel %vm548_vm4, %v1263_v36, 16  ;;  %v558_v51 = vcvt.s32.f32 %v556_v48  ;;  %v557_v60 = vcvt.s32.f32 %v555_v58 }
 0x254   :  { %v569_v43 = vsel %vm533_vm1, %v551_v41, 2147483647  ;;  %v584_v49 = vsel %vm533_vm1, %v552_v44, 2147483647 }
 0x255   :  { %v545_v45 = vpop.xlane.xlu0 %544  ;;  %v571_v46 = vshra.s32 %v569_v43, 16  ;;  %v586_v52 = vshra.s32 %v584_v49, 16  ;;  %v585_v61 = vand.u32 65535, %v584_v49  ;;  %v570_v2 = vand.u32 65535, %v569_v43 }
 0x256   :  { %vm549_vm5 = vcmp.le.f32.partialorder %v530_v34, %v545_v45 }
 0x257   :  { %v573_v47 = vcvt.s32.f32 %v571_v46  ;;  %v553_v50 = vsel %vm549_vm5, %v1263_v36, 16  ;;  %v588_v54 = vcvt.s32.f32 %v586_v52  ;;  %v587_v0 = vcvt.s32.f32 %v585_v61 }
 0x258   :  { %v599_v53 = vsel %vm533_vm1, %v553_v50, 2147483647  ;;  %v572_v6 = vcvt.s32.f32 %v570_v2 }
 0x259   :  { %574 = vmin.xlane.f32.xlu0 %v573_v47  ;;  %v601_v55 = vshra.s32 %v599_v53, 16  ;;  %v600_v1 = vand.u32 65535, %v599_v53 }
 0x25b   :  { %v603_v56 = vcvt.s32.f32 %v601_v55  ;;  %v602_v5 = vcvt.s32.f32 %v600_v1 }
 0x25d   :  { %559 = vmin.xlane.f32.xlu0 %v558_v51 }
 0x261   :  { %589 = vmin.xlane.f32.xlu0 %v588_v54 }
 0x265   :  { %604 = vmin.xlane.f32.xlu0 %v603_v56 }
 0x2e2   :  { %v575_v57 = vpop.xlane.xlu0 %574 }
 0x2e3   :  { %vm576_vm8 = vcmp.eq.f32.partialorder %v573_v47, %v575_v57  ;;  %v581_v15 = vcvt.f32.s32 %v575_v57 }
 0x2e4   :  { %v577_v8 = vsel %vm576_vm8, %v572_v6, inf }
 0x2e5   :  { %v582_v24 = vshll.u32 %v581_v15, 16 }
 0x2e6   :  { %v560_v59 = vpop.xlane.xlu0 %559 }
 0x2e7   :  { %vm561_vm6 = vcmp.eq.f32.partialorder %v558_v51, %v560_v59  ;;  %v566_v9 = vcvt.f32.s32 %v560_v59 }
 0x2e8   :  { %v562_v62 = vsel %vm561_vm6, %v557_v60, inf }
 0x2e9   :  { %563 = vmin.xlane.f32.xlu0 %v562_v62  ;;  %v567_v11 = vshll.u32 %v566_v9, 16 }
 0x2ea   :  { %v590_v63 = vpop.xlane.xlu0 %589 }
 0x2eb   :  { %vm591_vm7 = vcmp.eq.f32.partialorder %v588_v54, %v590_v63  ;;  %v596_v12 = vcvt.f32.s32 %v590_v63 }
 0x2ec   :  { %v592_v3 = vsel %vm591_vm7, %v587_v0, inf }
 0x2ed   :  { %593 = vmin.xlane.f32.xlu0 %v592_v3  ;;  %v597_v17 = vshll.u32 %v596_v12, 16 }
 0x2ee   :  { %v605_v4 = vpop.xlane.xlu0 %604 }
 0x2ef   :  { %vm606_vm9 = vcmp.eq.f32.partialorder %v603_v56, %v605_v4  ;;  %v611_v18 = vcvt.f32.s32 %v605_v4 }
 0x2f0   :  { %v607_v7 = vsel %vm606_vm9, %v602_v5, inf }
 0x2f1   :  { %608 = vmin.xlane.f32.xlu1 %v607_v7  ;;  %578 = vmin.xlane.f32.xlu0 %v577_v8  ;;  %v612_v27 = vshll.u32 %v611_v18, 16 }
 0x372   :  { %v564_v10 = vpop.xlane.xlu0 %563 }
 0x373   :  { %v565_v13 = vcvt.f32.s32 %v564_v10 }
 0x375   :  { %v568_v14 = vadd.s32 %v567_v11, %v565_v13 }
 0x376   :  { %v594_v16 = vpop.xlane.xlu0 %593 }
 0x377   :  { %v595_v19 = vcvt.f32.s32 %v594_v16  ;;  %vm614_vm10 = vcmp.eq.s32.totalorder %v1263_v36, %v568_v14 }
 0x378   :  { %v740_v22 = vsel %vm614_vm10, 1.0, %v907_v20 }
 0x379   :  { %v598_v23 = vadd.s32 %v597_v17, %v595_v19  ;;  %896 = vmatprep.mubr.msk.f32.mxu0 %vm533_vm1, %v740_v22 }
 0x37a   :  { %v609_v25 = vpop.xlane.xlu1 %608  ;;  %v579_v26 = vpop.xlane.xlu0 %578 }
 0x37b   :  { %v610_v28 = vcvt.f32.s32 %v609_v25  ;;  %v580_v29 = vcvt.f32.s32 %v579_v26  ;;  %vm616_vm11 = vcmp.eq.s32.totalorder %v1263_v36, %v598_v23 }
 0x37c   :  { %v742_v30 = vsel %vm616_vm11, 1.0, %v907_v20 }
 0x37d   :  { %v613_v31 = vadd.s32 %v612_v27, %v610_v28  ;;  %v583_v21 = vadd.s32 %v582_v24, %v580_v29  ;;  %899 = vmatprep.mubr.msk.f32.mxu1 %vm533_vm1, %v742_v30 }
 0x37f   :  { %vm617_vm12 = vcmp.eq.s32.totalorder %v1263_v36, %v613_v31  ;;  %vm615_vm13 = vcmp.eq.s32.totalorder %v1263_v36, %v583_v21 }
 0x380   :  { %v743_v32 = vsel %vm617_vm12, 1.0, %v907_v20  ;;  %v741_v33 = vsel %vm615_vm13, 1.0, %v907_v20 }
 0x381   :  { %897 = vmatmul.mubr.msk.f32.vlgmr.msra.gmra.mxu0 %vm533_vm1, %v741_v33  ;;  %900 = vmatmul.mubr.msk.f32.vlgmr.msra.gmra.mxu1 %vm533_vm1, %v743_v32 }
 0x441   :  { %v898_v34 = vpop.f32.mrf.mxu0  ;;  %v901_v35 = vpop.f32.mrf.mxu1 }
 0x442   :  { %724 = vst [vmem:[%s1298_s5 + $0x8] sm:$0xff] %v898_v34  ;;  %726 = vst [vmem:[%s1298_s5 + $0x18] sm:$0xff] %v901_v35 }
 0x443   :  { %v704_v37 = vpop.f32.mrf.mxu0  ;;  %v714_v38 = vpop.f32.mrf.mxu1 }
 0x444   :  { %723 = vst [vmem:[%s1298_s5] sm:$0xff] %v704_v37  ;;  %725 = vst [vmem:[%s1298_s5 + $0x10] sm:$0xff] %v714_v38 }

// kernel: forward.9
= control target key start
LH: loop header
LB: loop body
LE: loop exit
PB: predicated region body
PF: predicated region fallthrough
CT: control target
= control target key end

     0   :  { %vm69_vm0 = vcmask 261120   ;;  %s518_s1 = inlined_call_operand.vmem [shape: f32[288,128], index: 1, kind: input, shape index: {}]   ;;  %s519_s0 = inlined_call_operand.vmem [shape: f32[32,288], index: 0, kind: input, shape index: {}]   ;;  %s520_s2 = inlined_call_operand.vmem [shape: f32[1,128], index: 2, kind: input, shape index: {}]   ;;  %s521_s3 = inlined_call_operand.vmem [shape: f32[32,128], index: 3, kind: output, shape index: {}]  }
   0x1   :  { %v57_v0 = vld [vmem:[%s518_s1 + $0xf8] sm:$0xff]  ;;  %v56_v2 = vld [vmem:[%s518_s1 + $0xf0] sm:$0xff]  ;;  %v55_v4 = vld [vmem:[%s518_s1 + $0xe8] sm:$0xff] }
   0x2   :  { %v41_v1 = vld [vmem:[%s518_s1 + $0x78] sm:$0xff]  ;;  %269 = vmatprep.subr.mxu0 %v57_v0  ;;  %v40_v3 = vld [vmem:[%s518_s1 + $0x70] sm:$0xff]  ;;  %v39_v5 = vld [vmem:[%s518_s1 + $0x68] sm:$0xff] }
   0x3   :  { %270 = vmatpush3.msra.mxu0 %v41_v1  ;;  %v54_v6 = vld [vmem:[%s518_s1 + $0xe0] sm:$0xff]  ;;  %v53_v8 = vld [vmem:[%s518_s1 + $0xd8] sm:$0xff]  ;;  %v52_v10 = vld [vmem:[%s518_s1 + $0xd0] sm:$0xff] }
   0x4   :  { %271 = vmatprep.subr.mxu0 %v56_v2  ;;  %v38_v7 = vld [vmem:[%s518_s1 + $0x60] sm:$0xff]  ;;  %v37_v9 = vld [vmem:[%s518_s1 + $0x58] sm:$0xff]  ;;  %v36_v11 = vld [vmem:[%s518_s1 + $0x50] sm:$0xff] }
   0x5   :  { %272 = vmatpush3.msra.mxu0 %v40_v3  ;;  %v61_v12 = vld [vmem:[%s518_s1 + $0x118] sm:$0xff]  ;;  %v51_v13 = vld [vmem:[%s518_s1 + $0xc8] sm:$0xff]  ;;  %v60_v14 = vld [vmem:[%s518_s1 + $0x110] sm:$0xff] }
   0x6   :  { %273 = vmatprep.subr.mxu0 %v55_v4  ;;  %321 = vmatprep.subr.mxu1 %v61_v12  ;;  %v35_v15 = vld [vmem:[%s518_s1 + $0x48] sm:$0xff]  ;;  %v50_v17 = vld [vmem:[%s518_s1 + $0xc0] sm:$0xff]  ;;  %v49_v20 = vld [vmem:[%s518_s1 + $0xb8] sm:$0xff] }
   0x7   :  { %274 = vmatpush3.msra.mxu0 %v39_v5  ;;  %322 = vmatpush3.msra.mxu1 %v61_v12  ;;  %v15_v16 = vld [vmem:[%s519_s0 + $0x8] sm:$0xff]  ;;  %v34_v19 = vld [vmem:[%s518_s1 + $0x40] sm:$0xff]  ;;  %v33_v22 = vld [vmem:[%s518_s1 + $0x38] sm:$0xff] }
   0x8   :  { %275 = vmatprep.subr.mxu0 %v54_v6  ;;  %323 = vmatprep.subr.mxu1 %v60_v14  ;;  %v59_v18 = vld [vmem:[%s518_s1 + $0x108] sm:$0xff]  ;;  %v58_v21 = vld [vmem:[%s518_s1 + $0x100] sm:$0xff]  ;;  %v48_v23 = vld [vmem:[%s518_s1 + $0xb0] sm:$0xff] }
   0x9   :  { %276 = vmatpush3.msra.mxu0 %v38_v7  ;;  %146 = vmatprep.mubr.f32.mxu0 %v15_v16  ;;  %v16_v24 = vld [vmem:[%s519_s0 + $0x10] sm:$0xff]  ;;  %v19_v26 = vld [vmem:[%s519_s0 + $0x28] sm:$0xff]  ;;  %v22_v28 = vld [vmem:[%s519_s0 + $0x40] sm:$0xff] }
   0xa   :  { %277 = vmatprep.subr.mxu0 %v53_v8  ;;  %324 = vmatpush3.msra.mxu1 %v60_v14  ;;  %v32_v25 = vld [vmem:[%s518_s1 + $0x30] sm:$0xff]  ;;  %v47_v27 = vld [vmem:[%s518_s1 + $0xa8] sm:$0xff]  ;;  %v46_v30 = vld [vmem:[%s518_s1 + $0xa0] sm:$0xff] }
   0xb   :  { %278 = vmatpush3.msra.mxu0 %v37_v9  ;;  %325 = vmatprep.subr.mxu1 %v59_v18  ;;  %v31_v29 = vld [vmem:[%s518_s1 + $0x28] sm:$0xff]  ;;  %v30_v31 = vld [vmem:[%s518_s1 + $0x20] sm:$0xff]  ;;  %v25_v32 = vld [vmem:[%s519_s0 + $0x58] sm:$0xff] }
   0xc   :  { %279 = vmatprep.subr.mxu0 %v52_v10  ;;  %326 = vmatpush3.msra.mxu1 %v59_v18  ;;  %v45_v33 = vld [vmem:[%s518_s1 + $0x98] sm:$0xff]  ;;  %v44_v35 = vld [vmem:[%s518_s1 + $0x90] sm:$0xff]  ;;  %v43_v37 = vld [vmem:[%s518_s1 + $0x88] sm:$0xff] }
   0xd   :  { %280 = vmatpush3.msra.mxu0 %v36_v11  ;;  %327 = vmatprep.subr.mxu1 %v58_v21  ;;  %v29_v34 = vld [vmem:[%s518_s1 + $0x18] sm:$0xff]  ;;  %v28_v36 = vld [vmem:[%s518_s1 + $0x10] sm:$0xff]  ;;  %v27_v38 = vld [vmem:[%s518_s1 + $0x8] sm:$0xff] }
   0xe   :  { %281 = vmatprep.subr.mxu0 %v51_v13  ;;  %328 = vmatpush3.msra.mxu1 %v58_v21  ;;  %v42_v39 = vld [vmem:[%s518_s1 + $0x80] sm:$0xff]  ;;  %v17_v43 = vld [vmem:[%s519_s0 + $0x18] sm:$0xff]  ;;  %v20_v45 = vld [vmem:[%s519_s0 + $0x30] sm:$0xff] }
   0xf   :  { %282 = vmatpush3.msra.mxu0 %v35_v15  ;;  %329 = vmatprep.mubr.msk.f32.mxu1 %vm69_vm0, %v16_v24  ;;  %v26_v40 = vld [vmem:[%s518_s1] sm:$0xff]  ;;  %v21_v44 = vld [vmem:[%s519_s0 + $0x38] sm:$0xff]  ;;  %v24_v46 = vld [vmem:[%s519_s0 + $0x50] sm:$0xff] }
  0x10   :  { %283 = vmatprep.subr.mxu0 %v50_v17  ;;  %330 = vmatmul.mubr.msk.f32.vlgmr.msra.gmra.mxu1 %vm69_vm0, %v19_v26  ;;  %v14_v41 = vld [vmem:[%s519_s0] sm:$0xff]  ;;  %v23_v47 = vld [vmem:[%s519_s0 + $0x48] sm:$0xff] }
  0x11   :  { %284 = vmatpush3.msra.mxu0 %v34_v19  ;;  %332 = vmatprep.mubr.msk.f32.mxu1 %vm69_vm0, %v22_v28  ;;  %v18_v42 = vld [vmem:[%s519_s0 + $0x20] sm:$0xff] }
  0x12   :  { %285 = vmatprep.subr.mxu0 %v49_v20  ;;  %v264_v51 = vld [vmem:[%s520_s2] ss:$0 sm:$0xff] }
  0x13   :  { %286 = vmatpush3.msra.mxu0 %v33_v22 }
  0x14   :  { %287 = vmatprep.subr.mxu0 %v48_v23  ;;  %333 = vmatmul.mubr.msk.f32.gmra.mxu1 %vm69_vm0, %v25_v32 }
  0x15   :  { %288 = vmatpush3.msra.mxu0 %v32_v25 }
  0x16   :  { %289 = vmatprep.subr.mxu0 %v47_v27 }
  0x17   :  { %290 = vmatpush3.msra.mxu0 %v31_v29 }
  0x18   :  { %291 = vmatprep.subr.mxu0 %v46_v30 }
  0x19   :  { %292 = vmatpush3.msra.mxu0 %v30_v31 }
  0x1a   :  { %293 = vmatprep.subr.mxu0 %v45_v33 }
  0x1b   :  { %294 = vmatpush3.msra.mxu0 %v29_v34 }
  0x1c   :  { %295 = vmatprep.subr.mxu0 %v44_v35 }
  0x1d   :  { %296 = vmatpush3.msra.mxu0 %v28_v36 }
  0x1e   :  { %297 = vmatprep.subr.mxu0 %v43_v37 }
  0x1f   :  { %298 = vmatpush3.msra.mxu0 %v27_v38 }
  0x20   :  { %299 = vmatprep.subr.mxu0 %v42_v39 }
  0x21   :  { %300 = vmatpush3.msra.mxu0 %v26_v40 }
  0x22   :  { %147 = vmatmul.mubr.f32.vlgmr.msra.gmra.mxu0 %v14_v41 }
  0x23   :  { %151 = vmatprep.mubr.f32.mxu0 %v18_v42 }
  0x26   :  { %152 = vmatmul.mubr.f32.gmra.mxu0 %v17_v43 }
  0x27   :  { %156 = vmatprep.mubr.f32.mxu0 %v21_v44 }
  0x2a   :  { %157 = vmatmul.mubr.f32.gmra.mxu0 %v20_v45 }
  0x2b   :  { %161 = vmatprep.mubr.f32.mxu0 %v24_v46 }
  0x2e   :  { %162 = vmatmul.mubr.f32.gmra.mxu0 %v23_v47 }
  0xd0   :  { %v331_v49 = vpop.f32.mrf.mxu1 }
  0xd2   :  { %v233_v54 = vpop.f32.mrf.mxu1 }
  0xd4   :  { %v334_v60 = vpop.f32.mrf.mxu1 }
  0xd6   :  { %v243_v3 = vpop.f32.mrf.mxu1 }
  0xe2   :  { %v301_v48 = vpop.f32.mrf.mxu0 }
  0xe4   :  { %v302_v50 = vpop.f32.mrf.mxu0 }
  0xe5   :  { %v303_v52 = vadd.f32 %v302_v50, %v301_v48 }
  0xe6   :  { %v304_v53 = vpop.f32.mrf.mxu0 }
  0xe7   :  { %v149_v55 = vadd.f32 %v303_v52, %v264_v51 }
  0xe8   :  { %v305_v56 = vpop.f32.mrf.mxu0 }
  0xe9   :  { %v306_v57 = vadd.f32 %v305_v56, %v304_v53  ;;  %v234_v58 = vadd.f32 %v233_v54, %v149_v55 }
  0xea   :  { %v307_v59 = vpop.f32.mrf.mxu0 }
  0xeb   :  { %v154_v61 = vadd.f32 %v306_v57, %v264_v51  ;;  %v252_v62 = vmax.f32 %v234_v58, 0.0 }
  0xec   :  { %v308_v63 = vpop.f32.mrf.mxu0 }
  0xed   :  { %v239_v0 = vadd.f32 %v331_v49, %v154_v61  ;;  %256 = vst [vmem:[%s521_s3] sm:$0xff] %v252_v62  ;;  %v309_v1 = vadd.f32 %v308_v63, %v307_v59 }
  0xee   :  { %v310_v2 = vpop.f32.mrf.mxu0 }
  0xef   :  { %v253_v4 = vmax.f32 %v239_v0, 0.0  ;;  %v159_v5 = vadd.f32 %v309_v1, %v264_v51 }
  0xf0   :  { %v311_v6 = vpop.f32.mrf.mxu0 }
  0xf1   :  { %257 = vst [vmem:[%s521_s3 + $0x8] sm:$0xff] %v253_v4  ;;  %v312_v7 = vadd.f32 %v311_v6, %v310_v2  ;;  %v244_v8 = vadd.f32 %v243_v3, %v159_v5 }
  0xf3   :  { %v164_v9 = vadd.f32 %v312_v7, %v264_v51  ;;  %v254_v10 = vmax.f32 %v244_v8, 0.0 }
  0xf5   :  { %v249_v11 = vadd.f32 %v334_v60, %v164_v9  ;;  %258 = vst [vmem:[%s521_s3 + $0x10] sm:$0xff] %v254_v10 }
  0xf7   :  { %v255_v12 = vmax.f32 %v249_v11, 0.0 }
  0xf9   :  { %259 = vst [vmem:[%s521_s3 + $0x18] sm:$0xff] %v255_v12 }

// kernel: forward.10
= control target key start
LH: loop header
LB: loop body
LE: loop exit
PB: predicated region body
PF: predicated region fallthrough
CT: control target
= control target key end

     0   :  { %s1109_s1 = inlined_call_operand.vmem [shape: f32[512,128], index: 1, kind: input, shape index: {}]   ;;  %s1110_s0 = inlined_call_operand.vmem [shape: f32[128,512], index: 0, kind: input, shape index: {}]   ;;  %s1111_s2 = inlined_call_operand.vmem [shape: f32[1,128], index: 2, kind: input, shape index: {}]   ;;  %s1112_s3 = inlined_call_operand.vmem [shape: f32[128,128], index: 3, kind: output, shape index: {}]  }
   0x1   :  { %v109_v0 = vld [vmem:[%s1109_s1 + $0xf8] sm:$0xff]  ;;  %v108_v4 = vld [vmem:[%s1109_s1 + $0xf0] sm:$0xff]  ;;  %v107_v8 = vld [vmem:[%s1109_s1 + $0xe8] sm:$0xff] }
   0x2   :  { %v141_v1 = vld [vmem:[%s1109_s1 + $0x1f8] sm:$0xff]  ;;  %476 = vmatprep.subr.mxu0 %v109_v0  ;;  %v140_v5 = vld [vmem:[%s1109_s1 + $0x1f0] sm:$0xff]  ;;  %v139_v9 = vld [vmem:[%s1109_s1 + $0x1e8] sm:$0xff] }
   0x3   :  { %v93_v2 = vld [vmem:[%s1109_s1 + $0x78] sm:$0xff]  ;;  %556 = vmatprep.subr.mxu1 %v141_v1  ;;  %v92_v6 = vld [vmem:[%s1109_s1 + $0x70] sm:$0xff]  ;;  %v91_v10 = vld [vmem:[%s1109_s1 + $0x68] sm:$0xff] }
   0x4   :  { %v125_v3 = vld [vmem:[%s1109_s1 + $0x178] sm:$0xff]  ;;  %477 = vmatpush3.msra.mxu0 %v93_v2  ;;  %v124_v7 = vld [vmem:[%s1109_s1 + $0x170] sm:$0xff]  ;;  %v123_v11 = vld [vmem:[%s1109_s1 + $0x168] sm:$0xff] }
   0x5   :  { %557 = vmatpush3.msra.mxu1 %v125_v3  ;;  %478 = vmatprep.subr.mxu0 %v108_v4  ;;  %v106_v12 = vld [vmem:[%s1109_s1 + $0xe0] sm:$0xff]  ;;  %v105_v16 = vld [vmem:[%s1109_s1 + $0xd8] sm:$0xff]  ;;  %v104_v20 = vld [vmem:[%s1109_s1 + $0xd0] sm:$0xff] }
   0x6   :  { %558 = vmatprep.subr.mxu1 %v140_v5  ;;  %479 = vmatpush3.msra.mxu0 %v92_v6  ;;  %v138_v13 = vld [vmem:[%s1109_s1 + $0x1e0] sm:$0xff]  ;;  %v137_v17 = vld [vmem:[%s1109_s1 + $0x1d8] sm:$0xff]  ;;  %v136_v21 = vld [vmem:[%s1109_s1 + $0x1d0] sm:$0xff] }
   0x7   :  { %559 = vmatpush3.msra.mxu1 %v124_v7  ;;  %480 = vmatprep.subr.mxu0 %v107_v8  ;;  %v90_v14 = vld [vmem:[%s1109_s1 + $0x60] sm:$0xff]  ;;  %v89_v18 = vld [vmem:[%s1109_s1 + $0x58] sm:$0xff]  ;;  %v88_v22 = vld [vmem:[%s1109_s1 + $0x50] sm:$0xff] }
   0x8   :  { %560 = vmatprep.subr.mxu1 %v139_v9  ;;  %v122_v15 = vld [vmem:[%s1109_s1 + $0x160] sm:$0xff]  ;;  %481 = vmatpush3.msra.mxu0 %v91_v10  ;;  %v121_v19 = vld [vmem:[%s1109_s1 + $0x158] sm:$0xff]  ;;  %v120_v23 = vld [vmem:[%s1109_s1 + $0x150] sm:$0xff] }
   0x9   :  { %561 = vmatpush3.msra.mxu1 %v123_v11  ;;  %482 = vmatprep.subr.mxu0 %v106_v12  ;;  %v103_v24 = vld [vmem:[%s1109_s1 + $0xc8] sm:$0xff]  ;;  %v102_v28 = vld [vmem:[%s1109_s1 + $0xc0] sm:$0xff]  ;;  %v101_v32 = vld [vmem:[%s1109_s1 + $0xb8] sm:$0xff] }
   0xa   :  { %562 = vmatprep.subr.mxu1 %v138_v13  ;;  %483 = vmatpush3.msra.mxu0 %v90_v14  ;;  %v135_v25 = vld [vmem:[%s1109_s1 + $0x1c8] sm:$0xff]  ;;  %v134_v29 = vld [vmem:[%s1109_s1 + $0x1c0] sm:$0xff]  ;;  %v133_v33 = vld [vmem:[%s1109_s1 + $0x1b8] sm:$0xff] }
   0xb   :  { %563 = vmatpush3.msra.mxu1 %v122_v15  ;;  %484 = vmatprep.subr.mxu0 %v105_v16  ;;  %v87_v26 = vld [vmem:[%s1109_s1 + $0x48] sm:$0xff]  ;;  %v86_v30 = vld [vmem:[%s1109_s1 + $0x40] sm:$0xff]  ;;  %v85_v34 = vld [vmem:[%s1109_s1 + $0x38] sm:$0xff] }
   0xc   :  { %564 = vmatprep.subr.mxu1 %v137_v17  ;;  %485 = vmatpush3.msra.mxu0 %v89_v18  ;;  %v119_v27 = vld [vmem:[%s1109_s1 + $0x148] sm:$0xff]  ;;  %v118_v31 = vld [vmem:[%s1109_s1 + $0x140] sm:$0xff]  ;;  %v117_v35 = vld [vmem:[%s1109_s1 + $0x138] sm:$0xff] }
   0xd   :  { %565 = vmatpush3.msra.mxu1 %v121_v19  ;;  %486 = vmatprep.subr.mxu0 %v104_v20  ;;  %v100_v36 = vld [vmem:[%s1109_s1 + $0xb0] sm:$0xff]  ;;  %v99_v40 = vld [vmem:[%s1109_s1 + $0xa8] sm:$0xff]  ;;  %v98_v44 = vld [vmem:[%s1109_s1 + $0xa0] sm:$0xff] }
   0xe   :  { %566 = vmatprep.subr.mxu1 %v136_v21  ;;  %487 = vmatpush3.msra.mxu0 %v88_v22  ;;  %v132_v37 = vld [vmem:[%s1109_s1 + $0x1b0] sm:$0xff]  ;;  %v131_v41 = vld [vmem:[%s1109_s1 + $0x1a8] sm:$0xff]  ;;  %v130_v45 = vld [vmem:[%s1109_s1 + $0x1a0] sm:$0xff] }
   0xf   :  { %567 = vmatpush3.msra.mxu1 %v120_v23  ;;  %488 = vmatprep.subr.mxu0 %v103_v24  ;;  %v84_v38 = vld [vmem:[%s1109_s1 + $0x30] sm:$0xff]  ;;  %v83_v42 = vld [vmem:[%s1109_s1 + $0x28] sm:$0xff]  ;;  %v82_v46 = vld [vmem:[%s1109_s1 + $0x20] sm:$0xff] }
  0x10   :  { %568 = vmatprep.subr.mxu1 %v135_v25  ;;  %489 = vmatpush3.msra.mxu0 %v87_v26  ;;  %v116_v39 = vld [vmem:[%s1109_s1 + $0x130] sm:$0xff]  ;;  %v115_v43 = vld [vmem:[%s1109_s1 + $0x128] sm:$0xff]  ;;  %v114_v47 = vld [vmem:[%s1109_s1 + $0x120] sm:$0xff] }
  0x11   :  { %569 = vmatpush3.msra.mxu1 %v119_v27  ;;  %490 = vmatprep.subr.mxu0 %v102_v28  ;;  %v97_v48 = vld [vmem:[%s1109_s1 + $0x98] sm:$0xff]  ;;  %v96_v52 = vld [vmem:[%s1109_s1 + $0x90] sm:$0xff]  ;;  %v95_v56 = vld [vmem:[%s1109_s1 + $0x88] sm:$0xff] }
  0x12   :  { %570 = vmatprep.subr.mxu1 %v134_v29  ;;  %491 = vmatpush3.msra.mxu0 %v86_v30  ;;  %v129_v49 = vld [vmem:[%s1109_s1 + $0x198] sm:$0xff]  ;;  %v128_v53 = vld [vmem:[%s1109_s1 + $0x190] sm:$0xff]  ;;  %v127_v57 = vld [vmem:[%s1109_s1 + $0x188] sm:$0xff] }
  0x13   :  { %571 = vmatpush3.msra.mxu1 %v118_v31  ;;  %492 = vmatprep.subr.mxu0 %v101_v32  ;;  %v81_v50 = vld [vmem:[%s1109_s1 + $0x18] sm:$0xff]  ;;  %v80_v54 = vld [vmem:[%s1109_s1 + $0x10] sm:$0xff]  ;;  %v79_v58 = vld [vmem:[%s1109_s1 + $0x8] sm:$0xff] }
  0x14   :  { %572 = vmatprep.subr.mxu1 %v133_v33  ;;  %493 = vmatpush3.msra.mxu0 %v85_v34  ;;  %v113_v51 = vld [vmem:[%s1109_s1 + $0x118] sm:$0xff]  ;;  %v112_v55 = vld [vmem:[%s1109_s1 + $0x110] sm:$0xff]  ;;  %v111_v59 = vld [vmem:[%s1109_s1 + $0x108] sm:$0xff] }
  0x15   :  { %573 = vmatpush3.msra.mxu1 %v117_v35  ;;  %494 = vmatprep.subr.mxu0 %v100_v36  ;;  %v94_v60 = vld [vmem:[%s1109_s1 + $0x80] sm:$0xff]  ;;  %v15_v63 = vld [vmem:[%s1110_s0 + $0x8] sm:$0xff]  ;;  %v17_v1 = vld [vmem:[%s1110_s0 + $0x18] sm:$0xff] }
  0x16   :  { %574 = vmatprep.subr.mxu1 %v132_v37  ;;  %495 = vmatpush3.msra.mxu0 %v84_v38  ;;  %v126_v61 = vld [vmem:[%s1109_s1 + $0x180] sm:$0xff]  ;;  %v16_v3 = vld [vmem:[%s1110_s0 + $0x10] sm:$0xff]  ;;  %v19_v4 = vld [vmem:[%s1110_s0 + $0x28] sm:$0xff] }
  0x17   :  { %575 = vmatpush3.msra.mxu1 %v116_v39  ;;  %496 = vmatprep.subr.mxu0 %v99_v40  ;;  %v78_v62 = vld [vmem:[%s1109_s1] sm:$0xff]  ;;  %v21_v5 = vld [vmem:[%s1110_s0 + $0x38] sm:$0xff]  ;;  %v20_v7 = vld [vmem:[%s1110_s0 + $0x30] sm:$0xff] }
  0x18   :  { %576 = vmatprep.subr.mxu1 %v131_v41  ;;  %497 = vmatpush3.msra.mxu0 %v83_v42  ;;  %v110_v0 = vld [vmem:[%s1109_s1 + $0x100] sm:$0xff]  ;;  %v23_v8 = vld [vmem:[%s1110_s0 + $0x48] sm:$0xff]  ;;  %v25_v9 = vld [vmem:[%s1110_s0 + $0x58] sm:$0xff] }
  0x19   :  { %577 = vmatpush3.msra.mxu1 %v115_v43  ;;  %498 = vmatprep.subr.mxu0 %v98_v44  ;;  %v14_v2 = vld [vmem:[%s1110_s0] sm:$0xff]  ;;  %v24_v11 = vld [vmem:[%s1110_s0 + $0x50] sm:$0xff]  ;;  %v27_v12 = vld [vmem:[%s1110_s0 + $0x68] sm:$0xff] }
  0x1a   :  { %578 = vmatprep.subr.mxu1 %v130_v45  ;;  %499 = vmatpush3.msra.mxu0 %v82_v46  ;;  %v18_v6 = vld [vmem:[%s1110_s0 + $0x20] sm:$0xff]  ;;  %v29_v13 = vld [vmem:[%s1110_s0 + $0x78] sm:$0xff]  ;;  %v28_v15 = vld [vmem:[%s1110_s0 + $0x70] sm:$0xff] }
  0x1b   :  { %579 = vmatpush3.msra.mxu1 %v114_v47  ;;  %500 = vmatprep.subr.mxu0 %v97_v48  ;;  %v22_v10 = vld [vmem:[%s1110_s0 + $0x40] sm:$0xff]  ;;  %v31_v16 = vld [vmem:[%s1110_s0 + $0x88] sm:$0xff]  ;;  %v33_v17 = vld [vmem:[%s1110_s0 + $0x98] sm:$0xff] }
  0x1c   :  { %580 = vmatprep.subr.mxu1 %v129_v49  ;;  %501 = vmatpush3.msra.mxu0 %v81_v50  ;;  %v26_v14 = vld [vmem:[%s1110_s0 + $0x60] sm:$0xff]  ;;  %v32_v19 = vld [vmem:[%s1110_s0 + $0x90] sm:$0xff]  ;;  %v35_v20 = vld [vmem:[%s1110_s0 + $0xa8] sm:$0xff] }
  0x1d   :  { %581 = vmatpush3.msra.mxu1 %v113_v51  ;;  %502 = vmatprep.subr.mxu0 %v96_v52  ;;  %v30_v18 = vld [vmem:[%s1110_s0 + $0x80] sm:$0xff]  ;;  %v37_v21 = vld [vmem:[%s1110_s0 + $0xb8] sm:$0xff]  ;;  %v36_v23 = vld [vmem:[%s1110_s0 + $0xb0] sm:$0xff] }
  0x1e   :  { %582 = vmatprep.subr.mxu1 %v128_v53  ;;  %503 = vmatpush3.msra.mxu0 %v80_v54  ;;  %v34_v22 = vld [vmem:[%s1110_s0 + $0xa0] sm:$0xff]  ;;  %v39_v24 = vld [vmem:[%s1110_s0 + $0xc8] sm:$0xff]  ;;  %v41_v25 = vld [vmem:[%s1110_s0 + $0xd8] sm:$0xff] }
  0x1f   :  { %583 = vmatpush3.msra.mxu1 %v112_v55  ;;  %504 = vmatprep.subr.mxu0 %v95_v56  ;;  %v38_v26 = vld [vmem:[%s1110_s0 + $0xc0] sm:$0xff]  ;;  %v40_v27 = vld [vmem:[%s1110_s0 + $0xd0] sm:$0xff]  ;;  %v43_v28 = vld [vmem:[%s1110_s0 + $0xe8] sm:$0xff] }
  0x20   :  { %584 = vmatprep.subr.mxu1 %v127_v57  ;;  %505 = vmatpush3.msra.mxu0 %v79_v58  ;;  %v45_v29 = vld [vmem:[%s1110_s0 + $0xf8] sm:$0xff]  ;;  %v42_v30 = vld [vmem:[%s1110_s0 + $0xe0] sm:$0xff]  ;;  %v44_v31 = vld [vmem:[%s1110_s0 + $0xf0] sm:$0xff] }
  0x21   :  { %585 = vmatpush3.msra.mxu1 %v111_v59  ;;  %506 = vmatprep.subr.mxu0 %v94_v60  ;;  %v47_v32 = vld [vmem:[%s1110_s0 + $0x108] sm:$0xff]  ;;  %v49_v33 = vld [vmem:[%s1110_s0 + $0x118] sm:$0xff]  ;;  %v46_v34 = vld [vmem:[%s1110_s0 + $0x100] sm:$0xff] }
  0x22   :  { %586 = vmatprep.subr.mxu1 %v126_v61  ;;  %507 = vmatpush3.msra.mxu0 %v78_v62  ;;  %v48_v35 = vld [vmem:[%s1110_s0 + $0x110] sm:$0xff]  ;;  %v51_v36 = vld [vmem:[%s1110_s0 + $0x128] sm:$0xff]  ;;  %v53_v37 = vld [vmem:[%s1110_s0 + $0x138] sm:$0xff] }
  0x23   :  { %213 = vmatprep.mubr.f32.mxu0 %v15_v63  ;;  %587 = vmatpush3.msra.mxu1 %v110_v0  ;;  %v50_v38 = vld [vmem:[%s1110_s0 + $0x120] sm:$0xff]  ;;  %v52_v39 = vld [vmem:[%s1110_s0 + $0x130] sm:$0xff]  ;;  %v55_v40 = vld [vmem:[%s1110_s0 + $0x148] sm:$0xff] }
  0x24   :  { %358 = vmatprep.mubr.f32.mxu1 %v17_v1  ;;  %214 = vmatmul.mubr.f32.vlgmr.msra.gmra.mxu0 %v14_v2  ;;  %v57_v41 = vld [vmem:[%s1110_s0 + $0x158] sm:$0xff]  ;;  %v54_v42 = vld [vmem:[%s1110_s0 + $0x140] sm:$0xff]  ;;  %v56_v43 = vld [vmem:[%s1110_s0 + $0x150] sm:$0xff] }
  0x25   :  { %359 = vmatmul.mubr.f32.vlgmr.msra.gmra.mxu1 %v16_v3  ;;  %218 = vmatprep.mubr.f32.mxu0 %v19_v4  ;;  %v59_v44 = vld [vmem:[%s1110_s0 + $0x168] sm:$0xff]  ;;  %v61_v45 = vld [vmem:[%s1110_s0 + $0x178] sm:$0xff]  ;;  %v58_v46 = vld [vmem:[%s1110_s0 + $0x160] sm:$0xff] }
  0x26   :  { %363 = vmatprep.mubr.f32.mxu1 %v21_v5  ;;  %v60_v47 = vld [vmem:[%s1110_s0 + $0x170] sm:$0xff]  ;;  %v63_v48 = vld [vmem:[%s1110_s0 + $0x188] sm:$0xff]  ;;  %v65_v49 = vld [vmem:[%s1110_s0 + $0x198] sm:$0xff] }
  0x27   :  { %v62_v50 = vld [vmem:[%s1110_s0 + $0x180] sm:$0xff]  ;;  %v64_v51 = vld [vmem:[%s1110_s0 + $0x190] sm:$0xff]  ;;  %v67_v52 = vld [vmem:[%s1110_s0 + $0x1a8] sm:$0xff] }
  0x28   :  { %219 = vmatmul.mubr.f32.gmra.mxu0 %v18_v6  ;;  %v69_v53 = vld [vmem:[%s1110_s0 + $0x1b8] sm:$0xff]  ;;  %v66_v54 = vld [vmem:[%s1110_s0 + $0x1a0] sm:$0xff]  ;;  %v68_v55 = vld [vmem:[%s1110_s0 + $0x1b0] sm:$0xff] }
  0x29   :  { %364 = vmatmul.mubr.f32.gmra.mxu1 %v20_v7  ;;  %223 = vmatprep.mubr.f32.mxu0 %v23_v8  ;;  %v71_v56 = vld [vmem:[%s1110_s0 + $0x1c8] sm:$0xff]  ;;  %v73_v57 = vld [vmem:[%s1110_s0 + $0x1d8] sm:$0xff]  ;;  %v70_v58 = vld [vmem:[%s1110_s0 + $0x1c0] sm:$0xff] }
  0x2a   :  { %368 = vmatprep.mubr.f32.mxu1 %v25_v9  ;;  %v72_v59 = vld [vmem:[%s1110_s0 + $0x1d0] sm:$0xff]  ;;  %v75_v60 = vld [vmem:[%s1110_s0 + $0x1e8] sm:$0xff]  ;;  %v77_v61 = vld [vmem:[%s1110_s0 + $0x1f8] sm:$0xff] }
  0x2b   :  { %v74_v62 = vld [vmem:[%s1110_s0 + $0x1e0] sm:$0xff]  ;;  %v76_v63 = vld [vmem:[%s1110_s0 + $0x1f0] sm:$0xff] }
  0x2c   :  { %224 = vmatmul.mubr.f32.gmra.mxu0 %v22_v10  ;;  %v1043_v2 = vld [vmem:[%s1111_s2] ss:$0 sm:$0xff] }
  0x2d   :  { %369 = vmatmul.mubr.f32.gmra.mxu1 %v24_v11  ;;  %228 = vmatprep.mubr.f32.mxu0 %v27_v12 }
  0x2e   :  { %373 = vmatprep.mubr.f32.mxu1 %v29_v13 }
  0x30   :  { %229 = vmatmul.mubr.f32.gmra.mxu0 %v26_v14 }
  0x31   :  { %374 = vmatmul.mubr.f32.gmra.mxu1 %v28_v15  ;;  %233 = vmatprep.mubr.f32.mxu0 %v31_v16 }
  0x32   :  { %378 = vmatprep.mubr.f32.mxu1 %v33_v17 }
  0x34   :  { %234 = vmatmul.mubr.f32.gmra.mxu0 %v30_v18 }
  0x35   :  { %379 = vmatmul.mubr.f32.gmra.mxu1 %v32_v19  ;;  %238 = vmatprep.mubr.f32.mxu0 %v35_v20 }
  0x36   :  { %383 = vmatprep.mubr.f32.mxu1 %v37_v21 }
  0x38   :  { %239 = vmatmul.mubr.f32.gmra.mxu0 %v34_v22 }
  0x39   :  { %384 = vmatmul.mubr.f32.gmra.mxu1 %v36_v23  ;;  %243 = vmatprep.mubr.f32.mxu0 %v39_v24 }
  0x3a   :  { %388 = vmatprep.mubr.f32.mxu1 %v41_v25 }
  0x3c   :  { %244 = vmatmul.mubr.f32.gmra.mxu0 %v38_v26 }
  0x3d   :  { %389 = vmatmul.mubr.f32.gmra.mxu1 %v40_v27  ;;  %248 = vmatprep.mubr.f32.mxu0 %v43_v28 }
  0x3e   :  { %393 = vmatprep.mubr.f32.mxu1 %v45_v29 }
  0x40   :  { %249 = vmatmul.mubr.f32.gmra.mxu0 %v42_v30 }
  0x41   :  { %394 = vmatmul.mubr.f32.gmra.mxu1 %v44_v31  ;;  %253 = vmatprep.mubr.f32.mxu0 %v47_v32 }
  0x42   :  { %398 = vmatprep.mubr.f32.mxu1 %v49_v33 }
  0x44   :  { %254 = vmatmul.mubr.f32.gmra.mxu0 %v46_v34 }
  0x45   :  { %399 = vmatmul.mubr.f32.gmra.mxu1 %v48_v35  ;;  %258 = vmatprep.mubr.f32.mxu0 %v51_v36 }
  0x46   :  { %403 = vmatprep.mubr.f32.mxu1 %v53_v37 }
  0x48   :  { %259 = vmatmul.mubr.f32.gmra.mxu0 %v50_v38 }
  0x49   :  { %404 = vmatmul.mubr.f32.gmra.mxu1 %v52_v39  ;;  %263 = vmatprep.mubr.f32.mxu0 %v55_v40 }
  0x4a   :  { %408 = vmatprep.mubr.f32.mxu1 %v57_v41 }
  0x4c   :  { %264 = vmatmul.mubr.f32.gmra.mxu0 %v54_v42 }
  0x4d   :  { %409 = vmatmul.mubr.f32.gmra.mxu1 %v56_v43  ;;  %268 = vmatprep.mubr.f32.mxu0 %v59_v44 }
  0x4e   :  { %413 = vmatprep.mubr.f32.mxu1 %v61_v45 }
  0x50   :  { %269 = vmatmul.mubr.f32.gmra.mxu0 %v58_v46 }
  0x51   :  { %414 = vmatmul.mubr.f32.gmra.mxu1 %v60_v47  ;;  %273 = vmatprep.mubr.f32.mxu0 %v63_v48 }
  0x52   :  { %418 = vmatprep.mubr.f32.mxu1 %v65_v49 }
  0x54   :  { %274 = vmatmul.mubr.f32.gmra.mxu0 %v62_v50 }
  0x55   :  { %419 = vmatmul.mubr.f32.gmra.mxu1 %v64_v51  ;;  %278 = vmatprep.mubr.f32.mxu0 %v67_v52 }
  0x56   :  { %423 = vmatprep.mubr.f32.mxu1 %v69_v53 }
  0x58   :  { %279 = vmatmul.mubr.f32.gmra.mxu0 %v66_v54 }
  0x59   :  { %424 = vmatmul.mubr.f32.gmra.mxu1 %v68_v55  ;;  %283 = vmatprep.mubr.f32.mxu0 %v71_v56 }
  0x5a   :  { %428 = vmatprep.mubr.f32.mxu1 %v73_v57 }
  0x5c   :  { %284 = vmatmul.mubr.f32.gmra.mxu0 %v70_v58 }
  0x5d   :  { %429 = vmatmul.mubr.f32.gmra.mxu1 %v72_v59  ;;  %288 = vmatprep.mubr.f32.mxu0 %v75_v60 }
  0x5e   :  { %433 = vmatprep.mubr.f32.mxu1 %v77_v61 }
  0x60   :  { %289 = vmatmul.mubr.f32.gmra.mxu0 %v74_v62 }
  0x61   :  { %434 = vmatmul.mubr.f32.gmra.mxu1 %v76_v63 }
  0xe4   :  { %v508_v0 = vpop.f32.mrf.mxu0 }
  0xe5   :  { %v588_v1 = vpop.f32.mrf.mxu1 }
  0xe6   :  { %v509_v3 = vpop.f32.mrf.mxu0 }
  0xe7   :  { %v589_v4 = vpop.f32.mrf.mxu1  ;;  %v510_v5 = vadd.f32 %v509_v3, %v508_v0 }
  0xe8   :  { %v511_v6 = vpop.f32.mrf.mxu0  ;;  %v590_v9 = vadd.f32 %v589_v4, %v588_v1 }
  0xe9   :  { %v591_v7 = vpop.f32.mrf.mxu1  ;;  %v216_v8 = vadd.f32 %v510_v5, %v1043_v2 }
  0xea   :  { %v512_v10 = vpop.f32.mrf.mxu0 }
  0xeb   :  { %v592_v11 = vpop.f32.mrf.mxu1  ;;  %v361_v12 = vadd.f32 %v590_v9, %v216_v8  ;;  %v513_v13 = vadd.f32 %v512_v10, %v511_v6 }
  0xec   :  { %v514_v14 = vpop.f32.mrf.mxu0  ;;  %v593_v18 = vadd.f32 %v592_v11, %v591_v7 }
  0xed   :  { %v594_v15 = vpop.f32.mrf.mxu1  ;;  %v439_v16 = vmax.f32 %v361_v12, 0.0  ;;  %v221_v17 = vadd.f32 %v513_v13, %v1043_v2 }
  0xee   :  { %v515_v19 = vpop.f32.mrf.mxu0 }
  0xef   :  { %v595_v20 = vpop.f32.mrf.mxu1  ;;  %455 = vst [vmem:[%s1112_s3] sm:$0xff] %v439_v16  ;;  %v366_v21 = vadd.f32 %v593_v18, %v221_v17  ;;  %v516_v22 = vadd.f32 %v515_v19, %v514_v14 }
  0xf0   :  { %v517_v23 = vpop.f32.mrf.mxu0  ;;  %v596_v27 = vadd.f32 %v595_v20, %v594_v15 }
  0xf1   :  { %v597_v24 = vpop.f32.mrf.mxu1  ;;  %v440_v25 = vmax.f32 %v366_v21, 0.0  ;;  %v226_v26 = vadd.f32 %v516_v22, %v1043_v2 }
  0xf2   :  { %v518_v28 = vpop.f32.mrf.mxu0 }
  0xf3   :  { %v598_v29 = vpop.f32.mrf.mxu1  ;;  %456 = vst [vmem:[%s1112_s3 + $0x8] sm:$0xff] %v440_v25  ;;  %v371_v30 = vadd.f32 %v596_v27, %v226_v26  ;;  %v519_v31 = vadd.f32 %v518_v28, %v517_v23 }
  0xf4   :  { %v520_v32 = vpop.f32.mrf.mxu0  ;;  %v599_v36 = vadd.f32 %v598_v29, %v597_v24 }
  0xf5   :  { %v600_v33 = vpop.f32.mrf.mxu1  ;;  %v441_v34 = vmax.f32 %v371_v30, 0.0  ;;  %v231_v35 = vadd.f32 %v519_v31, %v1043_v2 }
  0xf6   :  { %v521_v37 = vpop.f32.mrf.mxu0 }
  0xf7   :  { %v601_v38 = vpop.f32.mrf.mxu1  ;;  %457 = vst [vmem:[%s1112_s3 + $0x10] sm:$0xff] %v441_v34  ;;  %v376_v39 = vadd.f32 %v599_v36, %v231_v35  ;;  %v522_v40 = vadd.f32 %v521_v37, %v520_v32 }
  0xf8   :  { %v523_v41 = vpop.f32.mrf.mxu0  ;;  %v602_v45 = vadd.f32 %v601_v38, %v600_v33 }
  0xf9   :  { %v603_v42 = vpop.f32.mrf.mxu1  ;;  %v442_v43 = vmax.f32 %v376_v39, 0.0  ;;  %v236_v44 = vadd.f32 %v522_v40, %v1043_v2 }
  0xfa   :  { %v524_v46 = vpop.f32.mrf.mxu0 }
  0xfb   :  { %v604_v47 = vpop.f32.mrf.mxu1  ;;  %458 = vst [vmem:[%s1112_s3 + $0x18] sm:$0xff] %v442_v43  ;;  %v381_v48 = vadd.f32 %v602_v45, %v236_v44  ;;  %v525_v49 = vadd.f32 %v524_v46, %v523_v41 }
  0xfc   :  { %v526_v50 = vpop.f32.mrf.mxu0  ;;  %v605_v54 = vadd.f32 %v604_v47, %v603_v42 }
  0xfd   :  { %v606_v51 = vpop.f32.mrf.mxu1  ;;  %v443_v52 = vmax.f32 %v381_v48, 0.0  ;;  %v241_v53 = vadd.f32 %v525_v49, %v1043_v2 }
  0xfe   :  { %v527_v55 = vpop.f32.mrf.mxu0 }
  0xff   :  { %v607_v56 = vpop.f32.mrf.mxu1  ;;  %459 = vst [vmem:[%s1112_s3 + $0x20] sm:$0xff] %v443_v52  ;;  %v386_v57 = vadd.f32 %v605_v54, %v241_v53  ;;  %v528_v58 = vadd.f32 %v527_v55, %v526_v50 }
 0x100   :  { %v529_v59 = vpop.f32.mrf.mxu0  ;;  %v608_v63 = vadd.f32 %v607_v56, %v606_v51 }
 0x101   :  { %v609_v60 = vpop.f32.mrf.mxu1  ;;  %v444_v61 = vmax.f32 %v386_v57, 0.0  ;;  %v246_v62 = vadd.f32 %v528_v58, %v1043_v2 }
 0x102   :  { %v530_v0 = vpop.f32.mrf.mxu0 }
 0x103   :  { %v610_v1 = vpop.f32.mrf.mxu1  ;;  %460 = vst [vmem:[%s1112_s3 + $0x28] sm:$0xff] %v444_v61  ;;  %v391_v3 = vadd.f32 %v608_v63, %v246_v62  ;;  %v531_v4 = vadd.f32 %v530_v0, %v529_v59 }
 0x104   :  { %v532_v5 = vpop.f32.mrf.mxu0  ;;  %v611_v9 = vadd.f32 %v610_v1, %v609_v60 }
 0x105   :  { %v612_v6 = vpop.f32.mrf.mxu1  ;;  %v445_v7 = vmax.f32 %v391_v3, 0.0  ;;  %v251_v8 = vadd.f32 %v531_v4, %v1043_v2 }
 0x106   :  { %v533_v10 = vpop.f32.mrf.mxu0 }
 0x107   :  { %v613_v11 = vpop.f32.mrf.mxu1  ;;  %461 = vst [vmem:[%s1112_s3 + $0x30] sm:$0xff] %v445_v7  ;;  %v396_v12 = vadd.f32 %v611_v9, %v251_v8  ;;  %v534_v13 = vadd.f32 %v533_v10, %v532_v5 }
 0x108   :  { %v535_v14 = vpop.f32.mrf.mxu0  ;;  %v614_v18 = vadd.f32 %v613_v11, %v612_v6 }
 0x109   :  { %v615_v15 = vpop.f32.mrf.mxu1  ;;  %v446_v16 = vmax.f32 %v396_v12, 0.0  ;;  %v256_v17 = vadd.f32 %v534_v13, %v1043_v2 }
 0x10a   :  { %v536_v19 = vpop.f32.mrf.mxu0 }
 0x10b   :  { %v616_v20 = vpop.f32.mrf.mxu1  ;;  %462 = vst [vmem:[%s1112_s3 + $0x38] sm:$0xff] %v446_v16  ;;  %v401_v21 = vadd.f32 %v614_v18, %v256_v17  ;;  %v537_v22 = vadd.f32 %v536_v19, %v535_v14 }
 0x10c   :  { %v538_v23 = vpop.f32.mrf.mxu0  ;;  %v617_v27 = vadd.f32 %v616_v20, %v615_v15 }
 0x10d   :  { %v618_v24 = vpop.f32.mrf.mxu1  ;;  %v447_v25 = vmax.f32 %v401_v21, 0.0  ;;  %v261_v26 = vadd.f32 %v537_v22, %v1043_v2 }
 0x10e   :  { %v539_v28 = vpop.f32.mrf.mxu0 }
 0x10f   :  { %v619_v29 = vpop.f32.mrf.mxu1  ;;  %463 = vst [vmem:[%s1112_s3 + $0x40] sm:$0xff] %v447_v25  ;;  %v406_v30 = vadd.f32 %v617_v27, %v261_v26  ;;  %v540_v31 = vadd.f32 %v539_v28, %v538_v23 }
 0x110   :  { %v541_v32 = vpop.f32.mrf.mxu0  ;;  %v620_v36 = vadd.f32 %v619_v29, %v618_v24 }
 0x111   :  { %v621_v33 = vpop.f32.mrf.mxu1  ;;  %v448_v34 = vmax.f32 %v406_v30, 0.0  ;;  %v266_v35 = vadd.f32 %v540_v31, %v1043_v2 }
 0x112   :  { %v542_v37 = vpop.f32.mrf.mxu0 }
 0x113   :  { %v622_v38 = vpop.f32.mrf.mxu1  ;;  %464 = vst [vmem:[%s1112_s3 + $0x48] sm:$0xff] %v448_v34  ;;  %v411_v39 = vadd.f32 %v620_v36, %v266_v35  ;;  %v543_v40 = vadd.f32 %v542_v37, %v541_v32 }
 0x114   :  { %v544_v41 = vpop.f32.mrf.mxu0  ;;  %v623_v45 = vadd.f32 %v622_v38, %v621_v33 }
 0x115   :  { %v624_v42 = vpop.f32.mrf.mxu1  ;;  %v449_v43 = vmax.f32 %v411_v39, 0.0  ;;  %v271_v44 = vadd.f32 %v543_v40, %v1043_v2 }
 0x116   :  { %v545_v46 = vpop.f32.mrf.mxu0 }
 0x117   :  { %v625_v47 = vpop.f32.mrf.mxu1  ;;  %465 = vst [vmem:[%s1112_s3 + $0x50] sm:$0xff] %v449_v43  ;;  %v416_v48 = vadd.f32 %v623_v45, %v271_v44  ;;  %v546_v49 = vadd.f32 %v545_v46, %v544_v41 }
 0x118   :  { %v547_v50 = vpop.f32.mrf.mxu0  ;;  %v626_v54 = vadd.f32 %v625_v47, %v624_v42 }
 0x119   :  { %v627_v51 = vpop.f32.mrf.mxu1  ;;  %v450_v52 = vmax.f32 %v416_v48, 0.0  ;;  %v276_v53 = vadd.f32 %v546_v49, %v1043_v2 }
 0x11a   :  { %v548_v55 = vpop.f32.mrf.mxu0 }
 0x11b   :  { %v628_v56 = vpop.f32.mrf.mxu1  ;;  %466 = vst [vmem:[%s1112_s3 + $0x58] sm:$0xff] %v450_v52  ;;  %v421_v57 = vadd.f32 %v626_v54, %v276_v53  ;;  %v549_v58 = vadd.f32 %v548_v55, %v547_v50 }
 0x11c   :  { %v550_v59 = vpop.f32.mrf.mxu0  ;;  %v629_v63 = vadd.f32 %v628_v56, %v627_v51 }
 0x11d   :  { %v630_v60 = vpop.f32.mrf.mxu1  ;;  %v451_v61 = vmax.f32 %v421_v57, 0.0  ;;  %v281_v62 = vadd.f32 %v549_v58, %v1043_v2 }
 0x11e   :  { %v551_v0 = vpop.f32.mrf.mxu0 }
 0x11f   :  { %v631_v1 = vpop.f32.mrf.mxu1  ;;  %467 = vst [vmem:[%s1112_s3 + $0x60] sm:$0xff] %v451_v61  ;;  %v426_v3 = vadd.f32 %v629_v63, %v281_v62  ;;  %v552_v4 = vadd.f32 %v551_v0, %v550_v59 }
 0x120   :  { %v553_v5 = vpop.f32.mrf.mxu0  ;;  %v632_v9 = vadd.f32 %v631_v1, %v630_v60 }
 0x121   :  { %v633_v6 = vpop.f32.mrf.mxu1  ;;  %v452_v7 = vmax.f32 %v426_v3, 0.0  ;;  %v286_v8 = vadd.f32 %v552_v4, %v1043_v2 }
 0x122   :  { %v554_v10 = vpop.f32.mrf.mxu0 }
 0x123   :  { %v634_v11 = vpop.f32.mrf.mxu1  ;;  %468 = vst [vmem:[%s1112_s3 + $0x68] sm:$0xff] %v452_v7  ;;  %v431_v12 = vadd.f32 %v632_v9, %v286_v8  ;;  %v555_v13 = vadd.f32 %v554_v10, %v553_v5 }
 0x124   :  { %v635_v16 = vadd.f32 %v634_v11, %v633_v6 }
 0x125   :  { %v453_v14 = vmax.f32 %v431_v12, 0.0  ;;  %v291_v15 = vadd.f32 %v555_v13, %v1043_v2 }
 0x127   :  { %469 = vst [vmem:[%s1112_s3 + $0x70] sm:$0xff] %v453_v14  ;;  %v436_v17 = vadd.f32 %v635_v16, %v291_v15 }
 0x129   :  { %v454_v18 = vmax.f32 %v436_v17, 0.0 }
 0x12b   :  { %470 = vst [vmem:[%s1112_s3 + $0x78] sm:$0xff] %v454_v18 }

// kernel: forward.11
= control target key start
LH: loop header
LB: loop body
LE: loop exit
PB: predicated region body
PF: predicated region fallthrough
CT: control target
= control target key end

     0   :  { %s1462_s12 = smov 0   ;;  %s2224_s0 = inlined_call_operand.vmem [shape: f32[512,1024], index: 0, kind: input, shape index: {}]   ;;  %s2225_s1 = inlined_call_operand.vmem [shape: f32[1024,128], index: 1, kind: input, shape index: {}]   ;;  %s2226_s2 = inlined_call_operand.vmem [shape: f32[1,128], index: 2, kind: input, shape index: {}]   ;;  %s2227_s3 = inlined_call_operand.vmem [shape: f32[512,128], index: 3, kind: output, shape index: {}]  }
   0x1 LB: > { %s1092_s13 = sadd.s32 4294967295, %s1440_s12   ;;  %p1096_p0 = scmp.ge.s32.totalorder %s1440_s12, 1  ;;  %s1440_s12 = sphi %s1462_s12, %s13_s12  }
   0x2   : > { %p139_p1 = scmp.lt.s32.totalorder %s1440_s12, 5 }
   0x4   : > { %p140_p2 = pnand %p1096_p0, %p139_p1 }
   0x6   : > { %143 = sbr.rel (%p140_p2) target bundleno = 371 (0x173), region = 32 }
   0xb   : > { %v336_v0 = vld [vmem:[%s2225_s1 + $0xf8] sm:$0xff]  ;;  %v335_v3 = vld [vmem:[%s2225_s1 + $0xf0] sm:$0xff]  ;;  %v334_v7 = vld [vmem:[%s2225_s1 + $0xe8] sm:$0xff]  ;;  %s1556_s20 = sshll.u32 %s1092_s13, 4 }
   0xc   : > { %v320_v1 = vld [vmem:[%s2225_s1 + $0x78] sm:$0xff]  ;;  %1106 = vmatprep.subr.mxu0 %v336_v0  ;;  %v319_v5 = vld [vmem:[%s2225_s1 + $0x70] sm:$0xff]  ;;  %v318_v9 = vld [vmem:[%s2225_s1 + $0x68] sm:$0xff]  ;;  %p165_p3 = scmp.lt.s32.totalorder %s1556_s20, 63 }
   0xd   : > { %v368_v2 = vld [vmem:[%s2225_s1 + $0x1f8] sm:$0xff]  ;;  %1107 = vmatpush3.msra.mxu0 %v320_v1  ;;  %v367_v6 = vld [vmem:[%s2225_s1 + $0x1f0] sm:$0xff]  ;;  %v366_v10 = vld [vmem:[%s2225_s1 + $0x1e8] sm:$0xff] }
   0xe   : > { %1186 = vmatprep.subr.mxu1 %v368_v2  ;;  %v352_v4 = vld [vmem:[%s2225_s1 + $0x178] sm:$0xff]  ;;  %v351_v8 = vld [vmem:[%s2225_s1 + $0x170] sm:$0xff]  ;;  %1108 = vmatprep.subr.mxu0 %v335_v3  ;;  %v333_v11 = vld [vmem:[%s2225_s1 + $0xe0] sm:$0xff]  ;;  %s2255_s20 = smov (!%p165_p3, %s1556_s20), 63 }
   0xf   : > { %1187 = vmatpush3.msra.mxu1 %v352_v4  ;;  %1109 = vmatpush3.msra.mxu0 %v319_v5  ;;  %v350_v12 = vld [vmem:[%s2225_s1 + $0x168] sm:$0xff]  ;;  %v365_v13 = vld [vmem:[%s2225_s1 + $0x1e0] sm:$0xff]  ;;  %v332_v16 = vld [vmem:[%s2225_s1 + $0xd8] sm:$0xff]  ;;  %s1105_s14 = sshll.u32 %s2255_s20, 6  ;;  %s1101_s4 = sshll.u32 %s2255_s20, 3 }
  0x10   : > { %1188 = vmatprep.subr.mxu1 %v367_v6  ;;  %1110 = vmatprep.subr.mxu0 %v334_v7  ;;  %v317_v14 = vld [vmem:[%s2225_s1 + $0x60] sm:$0xff]  ;;  %v364_v17 = vld [vmem:[%s2225_s1 + $0x1d8] sm:$0xff]  ;;  %v331_v20 = vld [vmem:[%s2225_s1 + $0xd0] sm:$0xff]  ;;  %s1652_s29 = scalar_lea.vmem %s2224_s0, %s1105_s14  ;;  %s2135_s7 = scalar_lea.vmem %s2227_s3, %s1101_s4 }
  0x11   : > { %1189 = vmatpush3.msra.mxu1 %v351_v8  ;;  %v349_v15 = vld [vmem:[%s2225_s1 + $0x160] sm:$0xff]  ;;  %1111 = vmatpush3.msra.mxu0 %v318_v9  ;;  %v316_v18 = vld [vmem:[%s2225_s1 + $0x58] sm:$0xff]  ;;  %v363_v21 = vld [vmem:[%s2225_s1 + $0x1d0] sm:$0xff] }
  0x12   : > { %1190 = vmatprep.subr.mxu1 %v366_v10  ;;  %1112 = vmatprep.subr.mxu0 %v333_v11  ;;  %v348_v19 = vld [vmem:[%s2225_s1 + $0x158] sm:$0xff]  ;;  %v315_v22 = vld [vmem:[%s2225_s1 + $0x50] sm:$0xff]  ;;  %v330_v24 = vld [vmem:[%s2225_s1 + $0xc8] sm:$0xff] }
  0x13   : > { %1191 = vmatpush3.msra.mxu1 %v350_v12  ;;  %1113 = vmatpush3.msra.mxu0 %v317_v14  ;;  %v347_v23 = vld [vmem:[%s2225_s1 + $0x150] sm:$0xff]  ;;  %v362_v25 = vld [vmem:[%s2225_s1 + $0x1c8] sm:$0xff]  ;;  %v329_v28 = vld [vmem:[%s2225_s1 + $0xc0] sm:$0xff] }
  0x14   : > { %1192 = vmatprep.subr.mxu1 %v365_v13  ;;  %1114 = vmatprep.subr.mxu0 %v332_v16  ;;  %v314_v26 = vld [vmem:[%s2225_s1 + $0x48] sm:$0xff]  ;;  %v361_v29 = vld [vmem:[%s2225_s1 + $0x1c0] sm:$0xff]  ;;  %v328_v32 = vld [vmem:[%s2225_s1 + $0xb8] sm:$0xff] }
  0x15   : > { %1193 = vmatpush3.msra.mxu1 %v349_v15  ;;  %1115 = vmatpush3.msra.mxu0 %v316_v18  ;;  %v346_v27 = vld [vmem:[%s2225_s1 + $0x148] sm:$0xff]  ;;  %v313_v30 = vld [vmem:[%s2225_s1 + $0x40] sm:$0xff]  ;;  %v360_v33 = vld [vmem:[%s2225_s1 + $0x1b8] sm:$0xff] }
  0x16   : > { %1194 = vmatprep.subr.mxu1 %v364_v17  ;;  %1116 = vmatprep.subr.mxu0 %v331_v20  ;;  %v345_v31 = vld [vmem:[%s2225_s1 + $0x140] sm:$0xff]  ;;  %v312_v34 = vld [vmem:[%s2225_s1 + $0x38] sm:$0xff]  ;;  %v327_v36 = vld [vmem:[%s2225_s1 + $0xb0] sm:$0xff] }
  0x17   : > { %1195 = vmatpush3.msra.mxu1 %v348_v19  ;;  %1117 = vmatpush3.msra.mxu0 %v315_v22  ;;  %v344_v35 = vld [vmem:[%s2225_s1 + $0x138] sm:$0xff]  ;;  %v359_v37 = vld [vmem:[%s2225_s1 + $0x1b0] sm:$0xff]  ;;  %v326_v40 = vld [vmem:[%s2225_s1 + $0xa8] sm:$0xff] }
  0x18   : > { %1196 = vmatprep.subr.mxu1 %v363_v21  ;;  %1118 = vmatprep.subr.mxu0 %v330_v24  ;;  %v311_v38 = vld [vmem:[%s2225_s1 + $0x30] sm:$0xff]  ;;  %v358_v41 = vld [vmem:[%s2225_s1 + $0x1a8] sm:$0xff]  ;;  %v325_v44 = vld [vmem:[%s2225_s1 + $0xa0] sm:$0xff] }
  0x19   : > { %1197 = vmatpush3.msra.mxu1 %v347_v23  ;;  %1119 = vmatpush3.msra.mxu0 %v314_v26  ;;  %v343_v39 = vld [vmem:[%s2225_s1 + $0x130] sm:$0xff]  ;;  %v310_v42 = vld [vmem:[%s2225_s1 + $0x28] sm:$0xff]  ;;  %v357_v45 = vld [vmem:[%s2225_s1 + $0x1a0] sm:$0xff] }
  0x1a   : > { %1198 = vmatprep.subr.mxu1 %v362_v25  ;;  %1120 = vmatprep.subr.mxu0 %v329_v28  ;;  %v342_v43 = vld [vmem:[%s2225_s1 + $0x128] sm:$0xff]  ;;  %v309_v46 = vld [vmem:[%s2225_s1 + $0x20] sm:$0xff]  ;;  %v324_v48 = vld [vmem:[%s2225_s1 + $0x98] sm:$0xff] }
  0x1b   : > { %1199 = vmatpush3.msra.mxu1 %v346_v27  ;;  %1121 = vmatpush3.msra.mxu0 %v313_v30  ;;  %v341_v47 = vld [vmem:[%s2225_s1 + $0x120] sm:$0xff]  ;;  %v356_v49 = vld [vmem:[%s2225_s1 + $0x198] sm:$0xff]  ;;  %v323_v52 = vld [vmem:[%s2225_s1 + $0x90] sm:$0xff] }
  0x1c   : > { %1200 = vmatprep.subr.mxu1 %v361_v29  ;;  %1122 = vmatprep.subr.mxu0 %v328_v32  ;;  %v308_v50 = vld [vmem:[%s2225_s1 + $0x18] sm:$0xff]  ;;  %v355_v53 = vld [vmem:[%s2225_s1 + $0x190] sm:$0xff]  ;;  %v322_v56 = vld [vmem:[%s2225_s1 + $0x88] sm:$0xff] }
  0x1d   : > { %1201 = vmatpush3.msra.mxu1 %v345_v31  ;;  %1123 = vmatpush3.msra.mxu0 %v312_v34  ;;  %v340_v51 = vld [vmem:[%s2225_s1 + $0x118] sm:$0xff]  ;;  %v307_v54 = vld [vmem:[%s2225_s1 + $0x10] sm:$0xff]  ;;  %v354_v57 = vld [vmem:[%s2225_s1 + $0x188] sm:$0xff] }
  0x1e   : > { %1202 = vmatprep.subr.mxu1 %v360_v33  ;;  %1124 = vmatprep.subr.mxu0 %v327_v36  ;;  %v339_v55 = vld [vmem:[%s2225_s1 + $0x110] sm:$0xff]  ;;  %v306_v58 = vld [vmem:[%s2225_s1 + $0x8] sm:$0xff]  ;;  %v321_v60 = vld [vmem:[%s2225_s1 + $0x80] sm:$0xff] }
  0x1f   : > { %1203 = vmatpush3.msra.mxu1 %v344_v35  ;;  %1125 = vmatpush3.msra.mxu0 %v311_v38  ;;  %v338_v59 = vld [vmem:[%s2225_s1 + $0x108] sm:$0xff]  ;;  %v305_v62 = vld [vmem:[%s2225_s1] sm:$0xff]  ;;  %v180_v2 = vld [vmem:[%s1652_s29 + $0x18] sm:$0xff] }
  0x20   : > { %1204 = vmatprep.subr.mxu1 %v359_v37  ;;  %1126 = vmatprep.subr.mxu0 %v326_v40  ;;  %v178_v61 = vld [vmem:[%s1652_s29 + $0x8] sm:$0xff]  ;;  %v353_v63 = vld [vmem:[%s2225_s1 + $0x180] sm:$0xff]  ;;  %v400_v3 = vld [vmem:[%s2225_s1 + $0x2f8] sm:$0xff] }
  0x21   : > { %1205 = vmatpush3.msra.mxu1 %v343_v39  ;;  %1127 = vmatpush3.msra.mxu0 %v310_v42  ;;  %v177_v0 = vld [vmem:[%s1652_s29] sm:$0xff]  ;;  %v179_v4 = vld [vmem:[%s1652_s29 + $0x10] sm:$0xff]  ;;  %v384_v5 = vld [vmem:[%s2225_s1 + $0x278] sm:$0xff] }
  0x22   : > { %1206 = vmatprep.subr.mxu1 %v358_v41  ;;  %1128 = vmatprep.subr.mxu0 %v325_v44  ;;  %v337_v1 = vld [vmem:[%s2225_s1 + $0x100] sm:$0xff]  ;;  %v432_v6 = vld [vmem:[%s2225_s1 + $0x3f8] sm:$0xff]  ;;  %v186_v7 = vld [vmem:[%s1652_s29 + $0x48] sm:$0xff] }
  0x23   : > { %1207 = vmatpush3.msra.mxu1 %v342_v43  ;;  %1129 = vmatpush3.msra.mxu0 %v309_v46  ;;  %v416_v8 = vld [vmem:[%s2225_s1 + $0x378] sm:$0xff]  ;;  %v185_v9 = vld [vmem:[%s1652_s29 + $0x40] sm:$0xff]  ;;  %v399_v11 = vld [vmem:[%s2225_s1 + $0x2f0] sm:$0xff] }
  0x24   : > { %1208 = vmatprep.subr.mxu1 %v357_v45  ;;  %1130 = vmatprep.subr.mxu0 %v324_v48  ;;  %v188_v10 = vld [vmem:[%s1652_s29 + $0x58] sm:$0xff]  ;;  %v187_v12 = vld [vmem:[%s1652_s29 + $0x50] sm:$0xff]  ;;  %v194_v15 = vld [vmem:[%s1652_s29 + $0x88] sm:$0xff] }
  0x25   : > { %1209 = vmatpush3.msra.mxu1 %v341_v47  ;;  %1131 = vmatpush3.msra.mxu0 %v308_v50  ;;  %v383_v13 = vld [vmem:[%s2225_s1 + $0x270] sm:$0xff]  ;;  %v193_v17 = vld [vmem:[%s1652_s29 + $0x80] sm:$0xff]  ;;  %v196_v18 = vld [vmem:[%s1652_s29 + $0x98] sm:$0xff] }
  0x26   : > { %1210 = vmatprep.subr.mxu1 %v356_v49  ;;  %1132 = vmatprep.subr.mxu0 %v323_v52  ;;  %v431_v14 = vld [vmem:[%s2225_s1 + $0x3f0] sm:$0xff]  ;;  %v398_v19 = vld [vmem:[%s2225_s1 + $0x2e8] sm:$0xff]  ;;  %v201_v25 = vld [vmem:[%s1652_s29 + $0xc0] sm:$0xff] }
  0x27   : > { %1211 = vmatpush3.msra.mxu1 %v340_v51  ;;  %1133 = vmatpush3.msra.mxu0 %v307_v54  ;;  %v415_v16 = vld [vmem:[%s2225_s1 + $0x370] sm:$0xff]  ;;  %v382_v21 = vld [vmem:[%s2225_s1 + $0x268] sm:$0xff]  ;;  %v204_v26 = vld [vmem:[%s1652_s29 + $0xd8] sm:$0xff] }
  0x28   : > { %1212 = vmatprep.subr.mxu1 %v355_v53  ;;  %1134 = vmatprep.subr.mxu0 %v322_v56  ;;  %v195_v20 = vld [vmem:[%s1652_s29 + $0x90] sm:$0xff]  ;;  %v430_v22 = vld [vmem:[%s2225_s1 + $0x3e8] sm:$0xff]  ;;  %v397_v27 = vld [vmem:[%s2225_s1 + $0x2e0] sm:$0xff] }
  0x29   : > { %1213 = vmatpush3.msra.mxu1 %v339_v55  ;;  %1135 = vmatpush3.msra.mxu0 %v306_v58  ;;  %v202_v23 = vld [vmem:[%s1652_s29 + $0xc8] sm:$0xff]  ;;  %v203_v28 = vld [vmem:[%s1652_s29 + $0xd0] sm:$0xff]  ;;  %v381_v29 = vld [vmem:[%s2225_s1 + $0x260] sm:$0xff] }
  0x2a   : > { %1214 = vmatprep.subr.mxu1 %v354_v57  ;;  %1136 = vmatprep.subr.mxu0 %v321_v60  ;;  %v414_v24 = vld [vmem:[%s2225_s1 + $0x368] sm:$0xff]  ;;  %v429_v30 = vld [vmem:[%s2225_s1 + $0x3e0] sm:$0xff]  ;;  %v212_v34 = vld [vmem:[%s1652_s29 + $0x118] sm:$0xff] }
  0x2b   : > { %1215 = vmatpush3.msra.mxu1 %v338_v59  ;;  %504 = vmatprep.mubr.f32.mxu0 %v178_v61  ;;  %v210_v31 = vld [vmem:[%s1652_s29 + $0x108] sm:$0xff]  ;;  %v413_v32 = vld [vmem:[%s2225_s1 + $0x360] sm:$0xff]  ;;  %v396_v35 = vld [vmem:[%s2225_s1 + $0x2d8] sm:$0xff] }
  0x2c   : > { %1137 = vmatpush3.msra.mxu0 %v305_v62  ;;  %1216 = vmatprep.subr.mxu1 %v353_v63  ;;  %v209_v33 = vld [vmem:[%s1652_s29 + $0x100] sm:$0xff]  ;;  %v211_v36 = vld [vmem:[%s1652_s29 + $0x110] sm:$0xff]  ;;  %v380_v37 = vld [vmem:[%s2225_s1 + $0x258] sm:$0xff] }
  0x2d   : > { %505 = vmatmul.mubr.f32.vlgmr.msra.gmra.mxu0 %v177_v0  ;;  %1217 = vmatpush3.msra.mxu1 %v337_v1  ;;  %v428_v38 = vld [vmem:[%s2225_s1 + $0x3d8] sm:$0xff]  ;;  %v218_v39 = vld [vmem:[%s1652_s29 + $0x148] sm:$0xff]  ;;  %v217_v41 = vld [vmem:[%s1652_s29 + $0x140] sm:$0xff] }
  0x2e   : > { %649 = vmatprep.mubr.f32.mxu1 %v180_v2  ;;  %1266 = vmatprep.subr.mxu0 %v400_v3  ;;  %v412_v40 = vld [vmem:[%s2225_s1 + $0x358] sm:$0xff]  ;;  %v395_v43 = vld [vmem:[%s2225_s1 + $0x2d0] sm:$0xff]  ;;  %v226_v47 = vld [vmem:[%s1652_s29 + $0x188] sm:$0xff] }
  0x2f   : > { %650 = vmatmul.mubr.f32.vlgmr.msra.gmra.mxu1 %v179_v4  ;;  %1267 = vmatpush3.msra.mxu0 %v384_v5  ;;  %v220_v42 = vld [vmem:[%s1652_s29 + $0x158] sm:$0xff]  ;;  %v219_v44 = vld [vmem:[%s1652_s29 + $0x150] sm:$0xff]  ;;  %v225_v49 = vld [vmem:[%s1652_s29 + $0x180] sm:$0xff] }
  0x30   : > { %1346 = vmatprep.subr.mxu1 %v432_v6  ;;  %509 = vmatprep.mubr.f32.mxu0 %v186_v7  ;;  %v379_v45 = vld [vmem:[%s2225_s1 + $0x250] sm:$0xff]  ;;  %v228_v50 = vld [vmem:[%s1652_s29 + $0x198] sm:$0xff]  ;;  %v394_v51 = vld [vmem:[%s2225_s1 + $0x2c8] sm:$0xff] }
  0x31   : > { %1347 = vmatpush3.msra.mxu1 %v416_v8  ;;  %510 = vmatmul.mubr.f32.gmra.mxu0 %v185_v9  ;;  %v427_v46 = vld [vmem:[%s2225_s1 + $0x3d0] sm:$0xff]  ;;  %v378_v53 = vld [vmem:[%s2225_s1 + $0x248] sm:$0xff]  ;;  %v233_v57 = vld [vmem:[%s1652_s29 + $0x1c0] sm:$0xff] }
  0x32   : > { %654 = vmatprep.mubr.f32.mxu1 %v188_v10  ;;  %1268 = vmatprep.subr.mxu0 %v399_v11  ;;  %v411_v48 = vld [vmem:[%s2225_s1 + $0x350] sm:$0xff]  ;;  %v426_v54 = vld [vmem:[%s2225_s1 + $0x3c8] sm:$0xff]  ;;  %v236_v58 = vld [vmem:[%s1652_s29 + $0x1d8] sm:$0xff] }
  0x33   : > { %655 = vmatmul.mubr.f32.gmra.mxu1 %v187_v12  ;;  %1269 = vmatpush3.msra.mxu0 %v383_v13  ;;  %v227_v52 = vld [vmem:[%s1652_s29 + $0x190] sm:$0xff]  ;;  %v234_v55 = vld [vmem:[%s1652_s29 + $0x1c8] sm:$0xff]  ;;  %v393_v59 = vld [vmem:[%s2225_s1 + $0x2c0] sm:$0xff] }
  0x34   : > { %1348 = vmatprep.subr.mxu1 %v431_v14  ;;  %514 = vmatprep.mubr.f32.mxu0 %v194_v15  ;;  %v410_v56 = vld [vmem:[%s2225_s1 + $0x348] sm:$0xff]  ;;  %v235_v60 = vld [vmem:[%s1652_s29 + $0x1d0] sm:$0xff]  ;;  %v377_v61 = vld [vmem:[%s2225_s1 + $0x240] sm:$0xff] }
  0x35   : > { %1349 = vmatpush3.msra.mxu1 %v415_v16  ;;  %515 = vmatmul.mubr.f32.gmra.mxu0 %v193_v17  ;;  %v425_v62 = vld [vmem:[%s2225_s1 + $0x3c0] sm:$0xff]  ;;  %v242_v63 = vld [vmem:[%s1652_s29 + $0x208] sm:$0xff]  ;;  %v244_v2 = vld [vmem:[%s1652_s29 + $0x218] sm:$0xff] }
  0x36   : > { %659 = vmatprep.mubr.f32.mxu1 %v196_v18  ;;  %1270 = vmatprep.subr.mxu0 %v398_v19  ;;  %v409_v0 = vld [vmem:[%s2225_s1 + $0x340] sm:$0xff]  ;;  %v392_v3 = vld [vmem:[%s2225_s1 + $0x2b8] sm:$0xff]  ;;  %v243_v4 = vld [vmem:[%s1652_s29 + $0x210] sm:$0xff] }
  0x37   : > { %660 = vmatmul.mubr.f32.gmra.mxu1 %v195_v20  ;;  %1271 = vmatpush3.msra.mxu0 %v382_v21  ;;  %v241_v1 = vld [vmem:[%s1652_s29 + $0x200] sm:$0xff]  ;;  %v376_v5 = vld [vmem:[%s2225_s1 + $0x238] sm:$0xff]  ;;  %v250_v7 = vld [vmem:[%s1652_s29 + $0x248] sm:$0xff] }
  0x38   : > { %1350 = vmatprep.subr.mxu1 %v430_v22  ;;  %519 = vmatprep.mubr.f32.mxu0 %v202_v23  ;;  %v424_v6 = vld [vmem:[%s2225_s1 + $0x3b8] sm:$0xff]  ;;  %v249_v9 = vld [vmem:[%s1652_s29 + $0x240] sm:$0xff]  ;;  %v391_v11 = vld [vmem:[%s2225_s1 + $0x2b0] sm:$0xff] }
  0x39   : > { %1351 = vmatpush3.msra.mxu1 %v414_v24  ;;  %520 = vmatmul.mubr.f32.gmra.mxu0 %v201_v25  ;;  %v408_v8 = vld [vmem:[%s2225_s1 + $0x338] sm:$0xff]  ;;  %v251_v12 = vld [vmem:[%s1652_s29 + $0x250] sm:$0xff]  ;;  %v258_v15 = vld [vmem:[%s1652_s29 + $0x288] sm:$0xff] }
  0x3a   : > { %664 = vmatprep.mubr.f32.mxu1 %v204_v26  ;;  %1272 = vmatprep.subr.mxu0 %v397_v27  ;;  %v252_v10 = vld [vmem:[%s1652_s29 + $0x258] sm:$0xff]  ;;  %v375_v13 = vld [vmem:[%s2225_s1 + $0x230] sm:$0xff]  ;;  %v257_v17 = vld [vmem:[%s1652_s29 + $0x280] sm:$0xff] }
  0x3b   : > { %665 = vmatmul.mubr.f32.gmra.mxu1 %v203_v28  ;;  %1273 = vmatpush3.msra.mxu0 %v381_v29  ;;  %v423_v14 = vld [vmem:[%s2225_s1 + $0x3b0] sm:$0xff]  ;;  %v260_v18 = vld [vmem:[%s1652_s29 + $0x298] sm:$0xff]  ;;  %v390_v19 = vld [vmem:[%s2225_s1 + $0x2a8] sm:$0xff] }
  0x3c   : > { %1352 = vmatprep.subr.mxu1 %v429_v30  ;;  %524 = vmatprep.mubr.f32.mxu0 %v210_v31  ;;  %v407_v16 = vld [vmem:[%s2225_s1 + $0x330] sm:$0xff]  ;;  %v374_v21 = vld [vmem:[%s2225_s1 + $0x228] sm:$0xff]  ;;  %v265_v25 = vld [vmem:[%s1652_s29 + $0x2c0] sm:$0xff] }
  0x3d   : > { %1353 = vmatpush3.msra.mxu1 %v413_v32  ;;  %525 = vmatmul.mubr.f32.gmra.mxu0 %v209_v33  ;;  %v259_v20 = vld [vmem:[%s1652_s29 + $0x290] sm:$0xff]  ;;  %v422_v22 = vld [vmem:[%s2225_s1 + $0x3a8] sm:$0xff]  ;;  %v268_v26 = vld [vmem:[%s1652_s29 + $0x2d8] sm:$0xff] }
  0x3e   : > { %669 = vmatprep.mubr.f32.mxu1 %v212_v34  ;;  %1274 = vmatprep.subr.mxu0 %v396_v35  ;;  %v266_v23 = vld [vmem:[%s1652_s29 + $0x2c8] sm:$0xff]  ;;  %v389_v27 = vld [vmem:[%s2225_s1 + $0x2a0] sm:$0xff]  ;;  %v267_v28 = vld [vmem:[%s1652_s29 + $0x2d0] sm:$0xff] }
  0x3f   : > { %670 = vmatmul.mubr.f32.gmra.mxu1 %v211_v36  ;;  %1275 = vmatpush3.msra.mxu0 %v380_v37  ;;  %v406_v24 = vld [vmem:[%s2225_s1 + $0x328] sm:$0xff]  ;;  %v373_v29 = vld [vmem:[%s2225_s1 + $0x220] sm:$0xff]  ;;  %v276_v34 = vld [vmem:[%s1652_s29 + $0x318] sm:$0xff] }
  0x40   : > { %1354 = vmatprep.subr.mxu1 %v428_v38  ;;  %529 = vmatprep.mubr.f32.mxu0 %v218_v39  ;;  %v421_v30 = vld [vmem:[%s2225_s1 + $0x3a0] sm:$0xff]  ;;  %v274_v31 = vld [vmem:[%s1652_s29 + $0x308] sm:$0xff]  ;;  %v388_v35 = vld [vmem:[%s2225_s1 + $0x298] sm:$0xff] }
  0x41   : > { %1355 = vmatpush3.msra.mxu1 %v412_v40  ;;  %530 = vmatmul.mubr.f32.gmra.mxu0 %v217_v41  ;;  %v405_v32 = vld [vmem:[%s2225_s1 + $0x320] sm:$0xff]  ;;  %v275_v36 = vld [vmem:[%s1652_s29 + $0x310] sm:$0xff]  ;;  %v372_v37 = vld [vmem:[%s2225_s1 + $0x218] sm:$0xff] }
  0x42   : > { %674 = vmatprep.mubr.f32.mxu1 %v220_v42  ;;  %1276 = vmatprep.subr.mxu0 %v395_v43  ;;  %v273_v33 = vld [vmem:[%s1652_s29 + $0x300] sm:$0xff]  ;;  %v420_v38 = vld [vmem:[%s2225_s1 + $0x398] sm:$0xff]  ;;  %v282_v39 = vld [vmem:[%s1652_s29 + $0x348] sm:$0xff] }
  0x43   : > { %675 = vmatmul.mubr.f32.gmra.mxu1 %v219_v44  ;;  %1277 = vmatpush3.msra.mxu0 %v379_v45  ;;  %v404_v40 = vld [vmem:[%s2225_s1 + $0x318] sm:$0xff]  ;;  %v281_v41 = vld [vmem:[%s1652_s29 + $0x340] sm:$0xff]  ;;  %v387_v43 = vld [vmem:[%s2225_s1 + $0x290] sm:$0xff] }
  0x44   : > { %1356 = vmatprep.subr.mxu1 %v427_v46  ;;  %534 = vmatprep.mubr.f32.mxu0 %v226_v47  ;;  %v284_v42 = vld [vmem:[%s1652_s29 + $0x358] sm:$0xff]  ;;  %v283_v44 = vld [vmem:[%s1652_s29 + $0x350] sm:$0xff]  ;;  %v290_v47 = vld [vmem:[%s1652_s29 + $0x388] sm:$0xff] }
  0x45   : > { %1357 = vmatpush3.msra.mxu1 %v411_v48  ;;  %535 = vmatmul.mubr.f32.gmra.mxu0 %v225_v49  ;;  %v371_v45 = vld [vmem:[%s2225_s1 + $0x210] sm:$0xff]  ;;  %v289_v49 = vld [vmem:[%s1652_s29 + $0x380] sm:$0xff] }
  0x46   : > { %679 = vmatprep.mubr.f32.mxu1 %v228_v50  ;;  %1278 = vmatprep.subr.mxu0 %v394_v51  ;;  %v419_v46 = vld [vmem:[%s2225_s1 + $0x390] sm:$0xff]  ;;  %v292_v50 = vld [vmem:[%s1652_s29 + $0x398] sm:$0xff]  ;;  %v386_v51 = vld [vmem:[%s2225_s1 + $0x288] sm:$0xff] }
  0x47   : > { %680 = vmatmul.mubr.f32.gmra.mxu1 %v227_v52  ;;  %1279 = vmatpush3.msra.mxu0 %v378_v53  ;;  %v403_v48 = vld [vmem:[%s2225_s1 + $0x310] sm:$0xff]  ;;  %v370_v53 = vld [vmem:[%s2225_s1 + $0x208] sm:$0xff] }
  0x48   : > { %1358 = vmatprep.subr.mxu1 %v426_v54  ;;  %539 = vmatprep.mubr.f32.mxu0 %v234_v55  ;;  %v291_v52 = vld [vmem:[%s1652_s29 + $0x390] sm:$0xff]  ;;  %v418_v54 = vld [vmem:[%s2225_s1 + $0x388] sm:$0xff] }
  0x49   : > { %1359 = vmatpush3.msra.mxu1 %v410_v56  ;;  %540 = vmatmul.mubr.f32.gmra.mxu0 %v233_v57  ;;  %v298_v55 = vld [vmem:[%s1652_s29 + $0x3c8] sm:$0xff]  ;;  %v297_v57 = vld [vmem:[%s1652_s29 + $0x3c0] sm:$0xff] }
  0x4a   : > { %684 = vmatprep.mubr.f32.mxu1 %v236_v58  ;;  %1280 = vmatprep.subr.mxu0 %v393_v59  ;;  %v402_v56 = vld [vmem:[%s2225_s1 + $0x308] sm:$0xff]  ;;  %v300_v58 = vld [vmem:[%s1652_s29 + $0x3d8] sm:$0xff]  ;;  %v385_v59 = vld [vmem:[%s2225_s1 + $0x280] sm:$0xff] }
  0x4b   : > { %685 = vmatmul.mubr.f32.gmra.mxu1 %v235_v60  ;;  %1281 = vmatpush3.msra.mxu0 %v377_v61  ;;  %v299_v60 = vld [vmem:[%s1652_s29 + $0x3d0] sm:$0xff]  ;;  %v369_v61 = vld [vmem:[%s2225_s1 + $0x200] sm:$0xff] }
  0x4c   : > { %1360 = vmatprep.subr.mxu1 %v425_v62  ;;  %544 = vmatprep.mubr.f32.mxu0 %v242_v63  ;;  %v417_v62 = vld [vmem:[%s2225_s1 + $0x380] sm:$0xff]  ;;  %v182_v63 = vld [vmem:[%s1652_s29 + $0x28] sm:$0xff] }
  0x4d   : > { %1361 = vmatpush3.msra.mxu1 %v409_v0  ;;  %545 = vmatmul.mubr.f32.gmra.mxu0 %v241_v1  ;;  %v401_v0 = vld [vmem:[%s2225_s1 + $0x300] sm:$0xff] }
  0x4e   : > { %689 = vmatprep.mubr.f32.mxu1 %v244_v2  ;;  %1282 = vmatprep.subr.mxu0 %v392_v3  ;;  %v181_v1 = vld [vmem:[%s1652_s29 + $0x20] sm:$0xff]  ;;  %v184_v2 = vld [vmem:[%s1652_s29 + $0x38] sm:$0xff]  ;;  %v190_v3 = vld [vmem:[%s1652_s29 + $0x68] sm:$0xff] }
  0x4f   : > { %690 = vmatmul.mubr.f32.gmra.mxu1 %v243_v4  ;;  %1283 = vmatpush3.msra.mxu0 %v376_v5  ;;  %v183_v4 = vld [vmem:[%s1652_s29 + $0x30] sm:$0xff]  ;;  %v192_v5 = vld [vmem:[%s1652_s29 + $0x78] sm:$0xff] }
  0x50   : > { %1362 = vmatprep.subr.mxu1 %v424_v6  ;;  %549 = vmatprep.mubr.f32.mxu0 %v250_v7  ;;  %v189_v6 = vld [vmem:[%s1652_s29 + $0x60] sm:$0xff]  ;;  %v198_v7 = vld [vmem:[%s1652_s29 + $0xa8] sm:$0xff] }
  0x51   : > { %1363 = vmatpush3.msra.mxu1 %v408_v8  ;;  %550 = vmatmul.mubr.f32.gmra.mxu0 %v249_v9  ;;  %v191_v8 = vld [vmem:[%s1652_s29 + $0x70] sm:$0xff]  ;;  %v200_v9 = vld [vmem:[%s1652_s29 + $0xb8] sm:$0xff] }
  0x52   : > { %694 = vmatprep.mubr.f32.mxu1 %v252_v10  ;;  %1284 = vmatprep.subr.mxu0 %v391_v11  ;;  %v197_v10 = vld [vmem:[%s1652_s29 + $0xa0] sm:$0xff]  ;;  %v206_v11 = vld [vmem:[%s1652_s29 + $0xe8] sm:$0xff] }
  0x53   : > { %695 = vmatmul.mubr.f32.gmra.mxu1 %v251_v12  ;;  %1285 = vmatpush3.msra.mxu0 %v375_v13  ;;  %v199_v12 = vld [vmem:[%s1652_s29 + $0xb0] sm:$0xff]  ;;  %v208_v13 = vld [vmem:[%s1652_s29 + $0xf8] sm:$0xff] }
  0x54   : > { %1364 = vmatprep.subr.mxu1 %v423_v14  ;;  %554 = vmatprep.mubr.f32.mxu0 %v258_v15  ;;  %v205_v14 = vld [vmem:[%s1652_s29 + $0xe0] sm:$0xff]  ;;  %v214_v15 = vld [vmem:[%s1652_s29 + $0x128] sm:$0xff] }
  0x55   : > { %1365 = vmatpush3.msra.mxu1 %v407_v16  ;;  %555 = vmatmul.mubr.f32.gmra.mxu0 %v257_v17  ;;  %v207_v16 = vld [vmem:[%s1652_s29 + $0xf0] sm:$0xff]  ;;  %v216_v17 = vld [vmem:[%s1652_s29 + $0x138] sm:$0xff] }
  0x56   : > { %699 = vmatprep.mubr.f32.mxu1 %v260_v18  ;;  %1286 = vmatprep.subr.mxu0 %v390_v19  ;;  %v213_v18 = vld [vmem:[%s1652_s29 + $0x120] sm:$0xff]  ;;  %v222_v19 = vld [vmem:[%s1652_s29 + $0x168] sm:$0xff] }
  0x57   : > { %700 = vmatmul.mubr.f32.gmra.mxu1 %v259_v20  ;;  %1287 = vmatpush3.msra.mxu0 %v374_v21  ;;  %v215_v20 = vld [vmem:[%s1652_s29 + $0x130] sm:$0xff]  ;;  %v224_v21 = vld [vmem:[%s1652_s29 + $0x178] sm:$0xff] }
  0x58   : > { %1366 = vmatprep.subr.mxu1 %v422_v22  ;;  %559 = vmatprep.mubr.f32.mxu0 %v266_v23  ;;  %v221_v22 = vld [vmem:[%s1652_s29 + $0x160] sm:$0xff]  ;;  %v230_v23 = vld [vmem:[%s1652_s29 + $0x1a8] sm:$0xff] }
  0x59   : > { %1367 = vmatpush3.msra.mxu1 %v406_v24  ;;  %560 = vmatmul.mubr.f32.gmra.mxu0 %v265_v25  ;;  %v223_v24 = vld [vmem:[%s1652_s29 + $0x170] sm:$0xff]  ;;  %v232_v25 = vld [vmem:[%s1652_s29 + $0x1b8] sm:$0xff] }
  0x5a   : > { %704 = vmatprep.mubr.f32.mxu1 %v268_v26  ;;  %1288 = vmatprep.subr.mxu0 %v389_v27  ;;  %v229_v26 = vld [vmem:[%s1652_s29 + $0x1a0] sm:$0xff]  ;;  %v238_v27 = vld [vmem:[%s1652_s29 + $0x1e8] sm:$0xff] }
  0x5b   : > { %705 = vmatmul.mubr.f32.gmra.mxu1 %v267_v28  ;;  %1289 = vmatpush3.msra.mxu0 %v373_v29  ;;  %v231_v28 = vld [vmem:[%s1652_s29 + $0x1b0] sm:$0xff]  ;;  %v240_v29 = vld [vmem:[%s1652_s29 + $0x1f8] sm:$0xff] }
  0x5c   : > { %1368 = vmatprep.subr.mxu1 %v421_v30  ;;  %564 = vmatprep.mubr.f32.mxu0 %v274_v31  ;;  %v237_v30 = vld [vmem:[%s1652_s29 + $0x1e0] sm:$0xff]  ;;  %v246_v31 = vld [vmem:[%s1652_s29 + $0x228] sm:$0xff] }
  0x5d   : > { %1369 = vmatpush3.msra.mxu1 %v405_v32  ;;  %565 = vmatmul.mubr.f32.gmra.mxu0 %v273_v33  ;;  %v239_v32 = vld [vmem:[%s1652_s29 + $0x1f0] sm:$0xff]  ;;  %v248_v33 = vld [vmem:[%s1652_s29 + $0x238] sm:$0xff] }
  0x5e   : > { %709 = vmatprep.mubr.f32.mxu1 %v276_v34  ;;  %1290 = vmatprep.subr.mxu0 %v388_v35  ;;  %v245_v34 = vld [vmem:[%s1652_s29 + $0x220] sm:$0xff]  ;;  %v254_v35 = vld [vmem:[%s1652_s29 + $0x268] sm:$0xff] }
  0x5f   : > { %710 = vmatmul.mubr.f32.gmra.mxu1 %v275_v36  ;;  %1291 = vmatpush3.msra.mxu0 %v372_v37  ;;  %v247_v36 = vld [vmem:[%s1652_s29 + $0x230] sm:$0xff]  ;;  %v256_v37 = vld [vmem:[%s1652_s29 + $0x278] sm:$0xff] }
  0x60   : > { %1370 = vmatprep.subr.mxu1 %v420_v38  ;;  %569 = vmatprep.mubr.f32.mxu0 %v282_v39  ;;  %v253_v38 = vld [vmem:[%s1652_s29 + $0x260] sm:$0xff]  ;;  %v262_v39 = vld [vmem:[%s1652_s29 + $0x2a8] sm:$0xff] }
  0x61   : > { %1371 = vmatpush3.msra.mxu1 %v404_v40  ;;  %570 = vmatmul.mubr.f32.gmra.mxu0 %v281_v41  ;;  %v255_v40 = vld [vmem:[%s1652_s29 + $0x270] sm:$0xff]  ;;  %v264_v41 = vld [vmem:[%s1652_s29 + $0x2b8] sm:$0xff] }
  0x62   : > { %714 = vmatprep.mubr.f32.mxu1 %v284_v42  ;;  %1292 = vmatprep.subr.mxu0 %v387_v43  ;;  %v261_v42 = vld [vmem:[%s1652_s29 + $0x2a0] sm:$0xff]  ;;  %v270_v43 = vld [vmem:[%s1652_s29 + $0x2e8] sm:$0xff] }
  0x63   : > { %715 = vmatmul.mubr.f32.gmra.mxu1 %v283_v44  ;;  %1293 = vmatpush3.msra.mxu0 %v371_v45  ;;  %v263_v44 = vld [vmem:[%s1652_s29 + $0x2b0] sm:$0xff]  ;;  %v272_v45 = vld [vmem:[%s1652_s29 + $0x2f8] sm:$0xff] }
  0x64   : > { %1372 = vmatprep.subr.mxu1 %v419_v46  ;;  %574 = vmatprep.mubr.f32.mxu0 %v290_v47  ;;  %v269_v46 = vld [vmem:[%s1652_s29 + $0x2e0] sm:$0xff]  ;;  %v278_v47 = vld [vmem:[%s1652_s29 + $0x328] sm:$0xff] }
  0x65   : > { %1373 = vmatpush3.msra.mxu1 %v403_v48  ;;  %575 = vmatmul.mubr.f32.gmra.mxu0 %v289_v49  ;;  %v271_v48 = vld [vmem:[%s1652_s29 + $0x2f0] sm:$0xff]  ;;  %v280_v49 = vld [vmem:[%s1652_s29 + $0x338] sm:$0xff] }
  0x66   : > { %719 = vmatprep.mubr.f32.mxu1 %v292_v50  ;;  %1294 = vmatprep.subr.mxu0 %v386_v51  ;;  %v277_v50 = vld [vmem:[%s1652_s29 + $0x320] sm:$0xff]  ;;  %v286_v51 = vld [vmem:[%s1652_s29 + $0x368] sm:$0xff] }
  0x67   : > { %720 = vmatmul.mubr.f32.gmra.mxu1 %v291_v52  ;;  %1295 = vmatpush3.msra.mxu0 %v370_v53  ;;  %v279_v52 = vld [vmem:[%s1652_s29 + $0x330] sm:$0xff]  ;;  %v288_v53 = vld [vmem:[%s1652_s29 + $0x378] sm:$0xff] }
  0x68   : > { %1374 = vmatprep.subr.mxu1 %v418_v54  ;;  %579 = vmatprep.mubr.f32.mxu0 %v298_v55  ;;  %v285_v54 = vld [vmem:[%s1652_s29 + $0x360] sm:$0xff]  ;;  %v294_v55 = vld [vmem:[%s1652_s29 + $0x3a8] sm:$0xff] }
  0x69   : > { %1375 = vmatpush3.msra.mxu1 %v402_v56  ;;  %580 = vmatmul.mubr.f32.gmra.mxu0 %v297_v57  ;;  %v287_v56 = vld [vmem:[%s1652_s29 + $0x370] sm:$0xff]  ;;  %v296_v57 = vld [vmem:[%s1652_s29 + $0x3b8] sm:$0xff] }
  0x6a   : > { %724 = vmatprep.mubr.f32.mxu1 %v300_v58  ;;  %1296 = vmatprep.subr.mxu0 %v385_v59  ;;  %v293_v58 = vld [vmem:[%s1652_s29 + $0x3a0] sm:$0xff]  ;;  %v302_v59 = vld [vmem:[%s1652_s29 + $0x3e8] sm:$0xff] }
  0x6b   : > { %725 = vmatmul.mubr.f32.gmra.mxu1 %v299_v60  ;;  %1297 = vmatpush3.msra.mxu0 %v369_v61  ;;  %v295_v60 = vld [vmem:[%s1652_s29 + $0x3b0] sm:$0xff]  ;;  %v304_v61 = vld [vmem:[%s1652_s29 + $0x3f8] sm:$0xff] }
  0x6c   : > { %1376 = vmatprep.subr.mxu1 %v417_v62  ;;  %794 = vmatprep.mubr.f32.mxu0 %v182_v63  ;;  %v301_v62 = vld [vmem:[%s1652_s29 + $0x3e0] sm:$0xff]  ;;  %v303_v63 = vld [vmem:[%s1652_s29 + $0x3f0] sm:$0xff] }
  0x6d   : > { %1377 = vmatpush3.msra.mxu1 %v401_v0  ;;  %795 = vmatmul.mubr.f32.vlgmr.msra.gmra.mxu0 %v181_v1 }
  0x6e   : > { %939 = vmatprep.mubr.f32.mxu1 %v184_v2  ;;  %799 = vmatprep.mubr.f32.mxu0 %v190_v3 }
  0x6f   : > { %940 = vmatmul.mubr.f32.vlgmr.msra.gmra.mxu1 %v183_v4 }
  0x70   : > { %944 = vmatprep.mubr.f32.mxu1 %v192_v5 }
  0x71   : > { %800 = vmatmul.mubr.f32.gmra.mxu0 %v189_v6 }
  0x72   : > { %804 = vmatprep.mubr.f32.mxu0 %v198_v7 }
  0x73   : > { %945 = vmatmul.mubr.f32.gmra.mxu1 %v191_v8 }
  0x74   : > { %949 = vmatprep.mubr.f32.mxu1 %v200_v9 }
  0x75   : > { %805 = vmatmul.mubr.f32.gmra.mxu0 %v197_v10 }
  0x76   : > { %809 = vmatprep.mubr.f32.mxu0 %v206_v11 }
  0x77   : > { %950 = vmatmul.mubr.f32.gmra.mxu1 %v199_v12 }
  0x78   : > { %954 = vmatprep.mubr.f32.mxu1 %v208_v13 }
  0x79   : > { %810 = vmatmul.mubr.f32.gmra.mxu0 %v205_v14 }
  0x7a   : > { %814 = vmatprep.mubr.f32.mxu0 %v214_v15 }
  0x7b   : > { %955 = vmatmul.mubr.f32.gmra.mxu1 %v207_v16 }
  0x7c   : > { %959 = vmatprep.mubr.f32.mxu1 %v216_v17 }
  0x7d   : > { %815 = vmatmul.mubr.f32.gmra.mxu0 %v213_v18 }
  0x7e   : > { %819 = vmatprep.mubr.f32.mxu0 %v222_v19 }
  0x7f   : > { %960 = vmatmul.mubr.f32.gmra.mxu1 %v215_v20 }
  0x80   : > { %964 = vmatprep.mubr.f32.mxu1 %v224_v21 }
  0x81   : > { %820 = vmatmul.mubr.f32.gmra.mxu0 %v221_v22 }
  0x82   : > { %824 = vmatprep.mubr.f32.mxu0 %v230_v23 }
  0x83   : > { %965 = vmatmul.mubr.f32.gmra.mxu1 %v223_v24 }
  0x84   : > { %969 = vmatprep.mubr.f32.mxu1 %v232_v25 }
  0x85   : > { %825 = vmatmul.mubr.f32.gmra.mxu0 %v229_v26 }
  0x86   : > { %829 = vmatprep.mubr.f32.mxu0 %v238_v27 }
  0x87   : > { %970 = vmatmul.mubr.f32.gmra.mxu1 %v231_v28 }
  0x88   : > { %974 = vmatprep.mubr.f32.mxu1 %v240_v29 }
  0x89   : > { %830 = vmatmul.mubr.f32.gmra.mxu0 %v237_v30 }
  0x8a   : > { %834 = vmatprep.mubr.f32.mxu0 %v246_v31 }
  0x8b   : > { %975 = vmatmul.mubr.f32.gmra.mxu1 %v239_v32 }
  0x8c   : > { %979 = vmatprep.mubr.f32.mxu1 %v248_v33 }
  0x8d   : > { %835 = vmatmul.mubr.f32.gmra.mxu0 %v245_v34 }
  0x8e   : > { %839 = vmatprep.mubr.f32.mxu0 %v254_v35 }
  0x8f   : > { %980 = vmatmul.mubr.f32.gmra.mxu1 %v247_v36 }
  0x90   : > { %984 = vmatprep.mubr.f32.mxu1 %v256_v37 }
  0x91   : > { %840 = vmatmul.mubr.f32.gmra.mxu0 %v253_v38 }
  0x92   : > { %844 = vmatprep.mubr.f32.mxu0 %v262_v39 }
  0x93   : > { %985 = vmatmul.mubr.f32.gmra.mxu1 %v255_v40 }
  0x94   : > { %989 = vmatprep.mubr.f32.mxu1 %v264_v41 }
  0x95   : > { %845 = vmatmul.mubr.f32.gmra.mxu0 %v261_v42 }
  0x96   : > { %849 = vmatprep.mubr.f32.mxu0 %v270_v43 }
  0x97   : > { %990 = vmatmul.mubr.f32.gmra.mxu1 %v263_v44 }
  0x98   : > { %994 = vmatprep.mubr.f32.mxu1 %v272_v45 }
  0x99   : > { %850 = vmatmul.mubr.f32.gmra.mxu0 %v269_v46 }
  0x9a   : > { %854 = vmatprep.mubr.f32.mxu0 %v278_v47 }
  0x9b   : > { %995 = vmatmul.mubr.f32.gmra.mxu1 %v271_v48 }
  0x9c   : > { %999 = vmatprep.mubr.f32.mxu1 %v280_v49 }
  0x9d   : > { %855 = vmatmul.mubr.f32.gmra.mxu0 %v277_v50 }
  0x9e   : > { %859 = vmatprep.mubr.f32.mxu0 %v286_v51 }
  0x9f   : > { %1000 = vmatmul.mubr.f32.gmra.mxu1 %v279_v52 }
  0xa0   : > { %1004 = vmatprep.mubr.f32.mxu1 %v288_v53 }
  0xa1   : > { %860 = vmatmul.mubr.f32.gmra.mxu0 %v285_v54 }
  0xa2   : > { %864 = vmatprep.mubr.f32.mxu0 %v294_v55 }
  0xa3   : > { %1005 = vmatmul.mubr.f32.gmra.mxu1 %v287_v56 }
  0xa4   : > { %1009 = vmatprep.mubr.f32.mxu1 %v296_v57 }
  0xa5   : > { %865 = vmatmul.mubr.f32.gmra.mxu0 %v293_v58 }
  0xa6   : > { %869 = vmatprep.mubr.f32.mxu0 %v302_v59 }
  0xa7   : > { %1010 = vmatmul.mubr.f32.gmra.mxu1 %v295_v60  ;;  %v2111_v60 = vld [vmem:[%s2226_s2] ss:$0 sm:$0xff] }
  0xa8   : > { %1014 = vmatprep.mubr.f32.mxu1 %v304_v61 }
  0xa9   : > { %870 = vmatmul.mubr.f32.gmra.mxu0 %v301_v62 }
  0xab   : > { %1015 = vmatmul.mubr.f32.gmra.mxu1 %v303_v63 }
  0xed   : > { %v1138_v0 = vpop.f32.mrf.mxu0 }
  0xef   : > { %v1998_v1 = vpop.f32.mrf.mxu1  ;;  %v1139_v2 = vpop.f32.mrf.mxu0 }
  0xf0   : > { %v1140_v59 = vadd.f32 %v1139_v2, %v1138_v0 }
  0xf1   : > { %v2000_v3 = vpop.f32.mrf.mxu1  ;;  %v1141_v4 = vpop.f32.mrf.mxu0 }
  0xf2   : > { %v1220_v2 = vadd.f32 %v2000_v3, %v1998_v1 }
  0xf3   : > { %v2002_v5 = vpop.f32.mrf.mxu1  ;;  %v1142_v6 = vpop.f32.mrf.mxu0 }
  0xf4   : > { %v1143_v63 = vadd.f32 %v1142_v6, %v1141_v4 }
  0xf5   : > { %v2004_v7 = vpop.f32.mrf.mxu1  ;;  %v2006_v8 = vpop.f32.mrf.mxu0 }
  0xf7   : > { %v2008_v9 = vpop.f32.mrf.mxu1  ;;  %v2010_v10 = vpop.f32.mrf.mxu0 }
  0xf8   : > { %v1146_v4 = vadd.f32 %v2010_v10, %v2006_v8 }
  0xf9   : > { %v2012_v11 = vpop.f32.mrf.mxu1  ;;  %v2014_v12 = vpop.f32.mrf.mxu0 }
  0xfa   : > { %v517_v8 = vadd.f32 %v1146_v4, %v2111_v60 }
  0xfb   : > { %v2016_v13 = vpop.f32.mrf.mxu1  ;;  %v2018_v14 = vpop.f32.mrf.mxu0 }
  0xfc   : > { %v1149_v10 = vadd.f32 %v2018_v14, %v2014_v12 }
  0xfd   : > { %v2020_v15 = vpop.f32.mrf.mxu1  ;;  %v2022_v16 = vpop.f32.mrf.mxu0 }
  0xfe   : > { %v522_v4 = vadd.f32 %v1149_v10, %v2111_v60 }
  0xff   : > { %v2024_v17 = vpop.f32.mrf.mxu1  ;;  %v2026_v18 = vpop.f32.mrf.mxu0 }
 0x101   : > { %v2028_v19 = vpop.f32.mrf.mxu1  ;;  %v2030_v20 = vpop.f32.mrf.mxu0 }
 0x103   : > { %v2032_v21 = vpop.f32.mrf.mxu1  ;;  %v2034_v22 = vpop.f32.mrf.mxu0 }
 0x105   : > { %v2036_v23 = vpop.f32.mrf.mxu1  ;;  %v2038_v24 = vpop.f32.mrf.mxu0 }
 0x107   : > { %v2040_v25 = vpop.f32.mrf.mxu1  ;;  %v2042_v26 = vpop.f32.mrf.mxu0 }
 0x109   : > { %v2044_v27 = vpop.f32.mrf.mxu1  ;;  %v2046_v28 = vpop.f32.mrf.mxu0 }
 0x10b   : > { %v2048_v29 = vpop.f32.mrf.mxu1  ;;  %v2050_v30 = vpop.f32.mrf.mxu0 }
 0x10d   : > { %v2052_v31 = vpop.f32.mrf.mxu1  ;;  %v2054_v32 = vpop.f32.mrf.mxu0 }
 0x10f   : > { %v2056_v33 = vpop.f32.mrf.mxu1  ;;  %v2058_v34 = vpop.f32.mrf.mxu0 }
 0x111   : > { %v2060_v35 = vpop.f32.mrf.mxu1  ;;  %v2062_v36 = vpop.f32.mrf.mxu0 }
 0x113   : > { %v2064_v37 = vpop.f32.mrf.mxu1  ;;  %v2066_v38 = vpop.f32.mrf.mxu0 }
 0x115   : > { %v2068_v39 = vpop.f32.mrf.mxu1  ;;  %v2070_v40 = vpop.f32.mrf.mxu0 }
 0x117   : > { %v2072_v41 = vpop.f32.mrf.mxu1  ;;  %v2074_v42 = vpop.f32.mrf.mxu0 }
 0x119   : > { %v2076_v43 = vpop.f32.mrf.mxu1  ;;  %v2078_v44 = vpop.f32.mrf.mxu0 }
 0x11b   : > { %v2080_v45 = vpop.f32.mrf.mxu1  ;;  %v2082_v46 = vpop.f32.mrf.mxu0 }
 0x11d   : > { %v2084_v47 = vpop.f32.mrf.mxu1  ;;  %v2086_v48 = vpop.f32.mrf.mxu0 }
 0x11f   : > { %v2088_v49 = vpop.f32.mrf.mxu1  ;;  %v2090_v50 = vpop.f32.mrf.mxu0 }
 0x120   : > { %2228 = vst [vmem:[#allocation2_spill] sm:$0xff] %v2088_v49 }
 0x121   : > { %v2092_v51 = vpop.f32.mrf.mxu1  ;;  %v2094_v52 = vpop.f32.mrf.mxu0 }
 0x122   : > { %2229 = vst [vmem:[#allocation3_spill] sm:$0xff] %v2092_v51 }
 0x123   : > { %v2096_v53 = vpop.f32.mrf.mxu1  ;;  %v2098_v54 = vpop.f32.mrf.mxu0 }
 0x124   : > { %2230 = vst [vmem:[#allocation4_spill] sm:$0xff] %v2096_v53  ;;  %2231 = vst [vmem:[#allocation5_spill] sm:$0xff] %v2098_v54 }
 0x125   : > { %v2100_v55 = vpop.f32.mrf.mxu1  ;;  %v2102_v56 = vpop.f32.mrf.mxu0 }
 0x126   : > { %2232 = vst [vmem:[#allocation6_spill] sm:$0xff] %v2100_v55  ;;  %2233 = vst [vmem:[#allocation7_spill] sm:$0xff] %v2102_v56 }
 0x127   : > { %v2104_v57 = vpop.f32.mrf.mxu1  ;;  %v2106_v58 = vpop.f32.mrf.mxu0 }
 0x128   : > { %2234 = vst [vmem:[#allocation8_spill] sm:$0xff] %v2104_v57  ;;  %2235 = vst [vmem:[#allocation9_spill] sm:$0xff] %v2106_v58  ;;  %v507_v57 = vadd.f32 %v1140_v59, %v2111_v60  ;;  %v512_v58 = vadd.f32 %v1143_v63, %v2111_v60 }
 0x129   : > { %v2113_v61 = vpop.f32.mrf.mxu1  ;;  %v2115_v62 = vpop.f32.mrf.mxu0 }
 0x12a   : > { %2236 = vst [vmem:[#allocation10_spill] sm:$0xff] %v2113_v61  ;;  %2237 = vst [vmem:[#allocation11_spill] sm:$0xff] %v2115_v62  ;;  %v652_v61 = vadd.f32 %v1220_v2, %v507_v57 }
 0x12b   : > { %v2117_v53 = vpop.f32.mrf.mxu1  ;;  %v2119_v55 = vpop.f32.mrf.mxu0 }
 0x12c   : > { %2238 = vst [vmem:[#allocation12_spill] sm:$0xff] %v2117_v53  ;;  %2239 = vst [vmem:[#allocation13_spill] sm:$0xff] %v2119_v55  ;;  %v1223_v53 = vadd.f32 %v2004_v7, %v2002_v5 }
 0x12d   : > { %v2122_v56 = vpop.f32.mrf.mxu1  ;;  %v1298_v0 = vpop.f32.mrf.mxu0 }
 0x12e   : > { %2240 = vst [vmem:[#allocation14_spill] sm:$0xff] %v2122_v56  ;;  %v657_v54 = vadd.f32 %v1223_v53, %v512_v58 }
 0x12f   : > { %v1378_v51 = vpop.f32.mrf.mxu1  ;;  %v1299_v49 = vpop.f32.mrf.mxu0 }
 0x130   : > { %v1300_v6 = vadd.f32 %v1299_v49, %v1298_v0 }
 0x131   : > { %v1379_v59 = vpop.f32.mrf.mxu1  ;;  %v1301_v55 = vpop.f32.mrf.mxu0 }
 0x132   : > { %v797_v56 = vadd.f32 %v1300_v6, %v652_v61  ;;  %v1380_v62 = vadd.f32 %v1379_v59, %v1378_v51  ;;  %v1226_v51 = vadd.f32 %v2012_v11, %v2008_v9  ;;  %v1152_v61 = vadd.f32 %v2026_v18, %v2022_v16 }
 0x133   : > { %v1381_v1 = vpop.f32.mrf.mxu1  ;;  %v1302_v3 = vpop.f32.mrf.mxu0  ;;  %v1155_v59 = vadd.f32 %v2034_v22, %v2030_v20 }
 0x134   : > { %v942_v49 = vadd.f32 %v1380_v62, %v797_v56  ;;  %v1303_v5 = vadd.f32 %v1302_v3, %v1301_v55  ;;  %v662_v2 = vadd.f32 %v1226_v51, %v517_v8  ;;  %v1229_v62 = vadd.f32 %v2020_v15, %v2016_v13 }
 0x135   : > { %v1382_v7 = vpop.f32.mrf.mxu1  ;;  %v1304_v57 = vpop.f32.mrf.mxu0  ;;  %v1232_v8 = vadd.f32 %v2028_v19, %v2024_v17  ;;  %v532_v51 = vadd.f32 %v1155_v59, %v2111_v60  ;;  %v1235_v17 = vadd.f32 %v2036_v23, %v2032_v21 }
 0x136   : > { %1020 = vst [vmem:[%s2135_s7] sm:$0xff] %v942_v49  ;;  %v802_v53 = vadd.f32 %v1303_v5, %v657_v54  ;;  %v1383_v58 = vadd.f32 %v1382_v7, %v1381_v1  ;;  %v527_v54 = vadd.f32 %v1152_v61, %v2111_v60  ;;  %v667_v18 = vadd.f32 %v1229_v62, %v522_v4 }
 0x137   : > { %v1384_v63 = vpop.f32.mrf.mxu1  ;;  %v1305_v0 = vpop.f32.mrf.mxu0  ;;  %v1238_v62 = vadd.f32 %v2044_v27, %v2040_v25 }
 0x138   : > { %v947_v12 = vadd.f32 %v1383_v58, %v802_v53  ;;  %v1306_v14 = vadd.f32 %v1305_v0, %v1304_v57  ;;  %v672_v5 = vadd.f32 %v1232_v8, %v527_v54  ;;  %v1158_v53 = vadd.f32 %v2042_v26, %v2038_v24 }
 0x139   : > { %v1385_v55 = vpop.f32.mrf.mxu1  ;;  %v1307_v56 = vpop.f32.mrf.mxu0  ;;  %v1161_v0 = vadd.f32 %v2050_v30, %v2046_v28  ;;  %v1164_v54 = vadd.f32 %v2058_v34, %v2054_v32 }
 0x13a   : > { %1021 = vst [vmem:[%s2135_s7 + $0x8] sm:$0xff] %v947_v12  ;;  %v807_v9 = vadd.f32 %v1306_v14, %v662_v2  ;;  %v1386_v11 = vadd.f32 %v1385_v55, %v1384_v63  ;;  %v677_v12 = vadd.f32 %v1235_v17, %v532_v51  ;;  %v537_v14 = vadd.f32 %v1158_v53, %v2111_v60 }
 0x13b   : > { %v1387_v6 = vpop.f32.mrf.mxu1  ;;  %v1308_v16 = vpop.f32.mrf.mxu0  ;;  %v1247_v17 = vadd.f32 %v2068_v39, %v2064_v37 }
 0x13c   : > { %v952_v1 = vadd.f32 %v1386_v11, %v807_v9  ;;  %v1309_v3 = vadd.f32 %v1308_v16, %v1307_v56  ;;  %v542_v9 = vadd.f32 %v1161_v0, %v2111_v60  ;;  %v682_v30 = vadd.f32 %v1238_v62, %v537_v14 }
 0x13d   : > { %v1388_v10 = vpop.f32.mrf.mxu1  ;;  %v1310_v49 = vpop.f32.mrf.mxu0  ;;  %v1173_v0 = vadd.f32 %v2082_v46, %v2078_v44 }
 0x13e   : > { %1022 = vst [vmem:[%s2135_s7 + $0x10] sm:$0xff] %v952_v1  ;;  %v812_v13 = vadd.f32 %v1309_v3, %v667_v18  ;;  %v1389_v15 = vadd.f32 %v1388_v10, %v1387_v6  ;;  %v1241_v18 = vadd.f32 %v2052_v31, %v2048_v29  ;;  %v1244_v29 = vadd.f32 %v2060_v35, %v2056_v33 }
 0x13f   : > { %v1390_v7 = vpop.f32.mrf.mxu1  ;;  %v1311_v57 = vpop.f32.mrf.mxu0  ;;  %v562_v62 = vadd.f32 %v1173_v0, %v2111_v60  ;;  %v2251_v0 = vld [vmem:[#allocation10_spill] sm:$0xff] }
 0x140   : > { %v957_v20 = vadd.f32 %v1389_v15, %v812_v13  ;;  %v1312_v22 = vadd.f32 %v1311_v57, %v1310_v49  ;;  %v687_v3 = vadd.f32 %v1241_v18, %v542_v9  ;;  %v547_v49 = vadd.f32 %v1164_v54, %v2111_v60 }
 0x141   : > { %v1391_v58 = vpop.f32.mrf.mxu1  ;;  %v1313_v61 = vpop.f32.mrf.mxu0  ;;  %v1167_v13 = vadd.f32 %v2066_v38, %v2062_v36  ;;  %v1170_v57 = vadd.f32 %v2074_v42, %v2070_v40 }
 0x142   : > { %1023 = vst [vmem:[%s2135_s7 + $0x18] sm:$0xff] %v957_v20  ;;  %v817_v19 = vadd.f32 %v1312_v22, %v672_v5  ;;  %v1392_v63 = vadd.f32 %v1391_v58, %v1390_v7  ;;  %v692_v20 = vadd.f32 %v1244_v29, %v547_v49  ;;  %v2246_v29 = vld [vmem:[#allocation4_spill] sm:$0xff] }
 0x143   : > { %v1393_v2 = vpop.f32.mrf.mxu1  ;;  %v1314_v4 = vpop.f32.mrf.mxu0  ;;  %v552_v22 = vadd.f32 %v1167_v13, %v2111_v60  ;;  %v2244_v13 = vld [vmem:[#allocation7_spill] sm:$0xff] }
 0x144   : > { %v962_v24 = vadd.f32 %v1392_v63, %v817_v19  ;;  %v1315_v26 = vadd.f32 %v1314_v4, %v1313_v61  ;;  %v557_v19 = vadd.f32 %v1170_v57, %v2111_v60 }
 0x145   : > { %v1394_v55 = vpop.f32.mrf.mxu1  ;;  %v1316_v56 = vpop.f32.mrf.mxu0  ;;  %v697_v42 = vadd.f32 %v1247_v17, %v552_v22  ;;  %v2249_v17 = vld [vmem:[#allocation13_spill] sm:$0xff] }
 0x146   : > { %1024 = vst [vmem:[%s2135_s7 + $0x20] sm:$0xff] %v962_v24  ;;  %v822_v21 = vadd.f32 %v1315_v26, %v677_v12  ;;  %v1395_v23 = vadd.f32 %v1394_v55, %v1393_v2  ;;  %v1250_v12 = vadd.f32 %v2076_v43, %v2072_v41  ;;  %v1253_v41 = vadd.f32 %v2084_v47, %v2080_v45 }
 0x147   : > { %v1396_v11 = vpop.f32.mrf.mxu1  ;;  %v1317_v28 = vpop.f32.mrf.mxu0 }
 0x148   : > { %v967_v6 = vadd.f32 %v1395_v23, %v822_v21  ;;  %v1318_v16 = vadd.f32 %v1317_v28, %v1316_v56  ;;  %v702_v26 = vadd.f32 %v1250_v12, %v557_v19  ;;  %v1176_v21 = vadd.f32 %v2090_v50, %v2086_v48  ;;  %v2241_v28 = vld [vmem:[#allocation5_spill] sm:$0xff] }
 0x149   : > { %v1397_v59 = vpop.f32.mrf.mxu1  ;;  %v1319_v1 = vpop.f32.mrf.mxu0 }
 0x14a   : > { %1025 = vst [vmem:[%s2135_s7 + $0x28] sm:$0xff] %v967_v6  ;;  %v827_v25 = vadd.f32 %v1318_v16, %v682_v30  ;;  %v1398_v27 = vadd.f32 %v1397_v59, %v1396_v11  ;;  %v1179_v30 = vadd.f32 %v2241_v28, %v2094_v52  ;;  %v707_v16 = vadd.f32 %v1253_v41, %v562_v62 }
 0x14b   : > { %v1399_v8 = vpop.f32.mrf.mxu1  ;;  %v1320_v10 = vpop.f32.mrf.mxu0  ;;  %v567_v18 = vadd.f32 %v1176_v21, %v2111_v60  ;;  %v2252_v21 = vld [vmem:[#allocation12_spill] sm:$0xff] }
 0x14c   : > { %v972_v32 = vadd.f32 %v1398_v27, %v827_v25  ;;  %v1321_v34 = vadd.f32 %v1320_v10, %v1319_v1  ;;  %v2242_v25 = vld [vmem:[#allocation2_spill] sm:$0xff]  ;;  %v2243_v27 = vld [vmem:[#allocation3_spill] sm:$0xff] }
 0x14d   : > { %v1400_v15 = vpop.f32.mrf.mxu1  ;;  %v1322_v5 = vpop.f32.mrf.mxu0 }
 0x14e   : > { %1026 = vst [vmem:[%s2135_s7 + $0x30] sm:$0xff] %v972_v32  ;;  %v832_v31 = vadd.f32 %v1321_v34, %v687_v3  ;;  %v1401_v7 = vadd.f32 %v1400_v15, %v1399_v8  ;;  %v1256_v3 = vadd.f32 %v2243_v27, %v2242_v25  ;;  %v572_v8 = vadd.f32 %v1179_v30, %v2111_v60  ;;  %v2245_v32 = vld [vmem:[#allocation9_spill] sm:$0xff] }
 0x14f   : > { %v1402_v51 = vpop.f32.mrf.mxu1  ;;  %v1323_v53 = vpop.f32.mrf.mxu0  ;;  %v1182_v34 = vadd.f32 %v2245_v32, %v2244_v13 }
 0x150   : > { %v977_v36 = vadd.f32 %v1401_v7, %v832_v31  ;;  %v1324_v38 = vadd.f32 %v1323_v53, %v1322_v5  ;;  %v712_v49 = vadd.f32 %v1256_v3, %v567_v18  ;;  %v2247_v31 = vld [vmem:[#allocation6_spill] sm:$0xff] }
 0x151   : > { %v1403_v58 = vpop.f32.mrf.mxu1  ;;  %v1325_v61 = vpop.f32.mrf.mxu0  ;;  %v1259_v7 = vadd.f32 %v2247_v31, %v2246_v29 }
 0x152   : > { %1027 = vst [vmem:[%s2135_s7 + $0x38] sm:$0xff] %v977_v36  ;;  %v837_v33 = vadd.f32 %v1324_v38, %v692_v20  ;;  %v1404_v35 = vadd.f32 %v1403_v58, %v1402_v51  ;;  %v577_v58 = vadd.f32 %v1182_v34, %v2111_v60 }
 0x153   : > { %v1405_v63 = vpop.f32.mrf.mxu1  ;;  %v1326_v40 = vpop.f32.mrf.mxu0  ;;  %v717_v22 = vadd.f32 %v1259_v7, %v572_v8 }
 0x154   : > { %v982_v2 = vadd.f32 %v1404_v35, %v837_v33  ;;  %v1327_v4 = vadd.f32 %v1326_v40, %v1325_v61  ;;  %v2248_v61 = vld [vmem:[#allocation11_spill] sm:$0xff] }
 0x155   : > { %v1406_v14 = vpop.f32.mrf.mxu1  ;;  %v1328_v24 = vpop.f32.mrf.mxu0  ;;  %v1185_v33 = vadd.f32 %v2249_v17, %v2248_v61 }
 0x156   : > { %1028 = vst [vmem:[%s2135_s7 + $0x40] sm:$0xff] %v982_v2  ;;  %v842_v37 = vadd.f32 %v1327_v4, %v697_v42  ;;  %v1407_v39 = vadd.f32 %v1406_v14, %v1405_v63  ;;  %v2250_v42 = vld [vmem:[#allocation8_spill] sm:$0xff] }
 0x157   : > { %v1408_v55 = vpop.f32.mrf.mxu1  ;;  %v1329_v56 = vpop.f32.mrf.mxu0  ;;  %v1262_v2 = vadd.f32 %v2251_v0, %v2250_v42 }
 0x158   : > { %v987_v44 = vadd.f32 %v1407_v39, %v842_v37  ;;  %v1330_v46 = vadd.f32 %v1329_v56, %v1328_v24  ;;  %v582_v39 = vadd.f32 %v1185_v33, %v2111_v60 }
 0x159   : > { %v1409_v23 = vpop.f32.mrf.mxu1  ;;  %v1331_v9 = vpop.f32.mrf.mxu0  ;;  %v722_v37 = vadd.f32 %v1262_v2, %v577_v58 }
 0x15a   : > { %1029 = vst [vmem:[%s2135_s7 + $0x48] sm:$0xff] %v987_v44  ;;  %v847_v43 = vadd.f32 %v1330_v46, %v702_v26  ;;  %v1410_v11 = vadd.f32 %v1409_v23, %v1408_v55  ;;  %v2253_v44 = vld [vmem:[#allocation14_spill] sm:$0xff] }
 0x15b   : > { %v1411_v54 = vpop.f32.mrf.mxu1  ;;  %v1332_v6 = vpop.f32.mrf.mxu0  ;;  %v1265_v46 = vadd.f32 %v2253_v44, %v2252_v21 }
 0x15c   : > { %v992_v48 = vadd.f32 %v1410_v11, %v847_v43  ;;  %v1333_v50 = vadd.f32 %v1332_v6, %v1331_v9 }
 0x15d   : > { %v1412_v59 = vpop.f32.mrf.mxu1  ;;  %v1334_v1 = vpop.f32.mrf.mxu0  ;;  %v727_v11 = vadd.f32 %v1265_v46, %v582_v39 }
 0x15e   : > { %1030 = vst [vmem:[%s2135_s7 + $0x50] sm:$0xff] %v992_v48  ;;  %v852_v45 = vadd.f32 %v1333_v50, %v707_v16  ;;  %v1413_v47 = vadd.f32 %v1412_v59, %v1411_v54 }
 0x15f   : > { %v1414_v10 = vpop.f32.mrf.mxu1  ;;  %v1335_v52 = vpop.f32.mrf.mxu0 }
 0x160   : > { %v997_v15 = vadd.f32 %v1413_v47, %v852_v45  ;;  %v1336_v5 = vadd.f32 %v1335_v52, %v1334_v1 }
 0x161   : > { %v1415_v57 = vpop.f32.mrf.mxu1  ;;  %v1337_v51 = vpop.f32.mrf.mxu0 }
 0x162   : > { %1031 = vst [vmem:[%s2135_s7 + $0x58] sm:$0xff] %v997_v15  ;;  %v857_v53 = vadd.f32 %v1336_v5, %v712_v49  ;;  %v1416_v20 = vadd.f32 %v1415_v57, %v1414_v10 }
 0x163   : > { %v1417_v36 = vpop.f32.mrf.mxu1  ;;  %v1338_v38 = vpop.f32.mrf.mxu0 }
 0x164   : > { %v1002_v35 = vadd.f32 %v1416_v20, %v857_v53  ;;  %v1339_v19 = vadd.f32 %v1338_v38, %v1337_v51 }
 0x165   : > { %v1418_v63 = vpop.f32.mrf.mxu1  ;;  %v1340_v40 = vpop.f32.mrf.mxu0 }
 0x166   : > { %1032 = vst [vmem:[%s2135_s7 + $0x60] sm:$0xff] %v1002_v35  ;;  %v862_v4 = vadd.f32 %v1339_v19, %v717_v22  ;;  %v1419_v12 = vadd.f32 %v1418_v63, %v1417_v36 }
 0x167   : > { %v1420_v14 = vpop.f32.mrf.mxu1  ;;  %v1341_v24 = vpop.f32.mrf.mxu0 }
 0x168   : > { %v1007_v26 = vadd.f32 %v1419_v12, %v862_v4  ;;  %v1342_v55 = vadd.f32 %v1341_v24, %v1340_v40 }
 0x169   : > { %v1421_v56 = vpop.f32.mrf.mxu1  ;;  %v1343_v62 = vpop.f32.mrf.mxu0 }
 0x16a   : > { %1033 = vst [vmem:[%s2135_s7 + $0x68] sm:$0xff] %v1007_v26  ;;  %v867_v23 = vadd.f32 %v1342_v55, %v722_v37  ;;  %v1422_v9 = vadd.f32 %v1421_v56, %v1420_v14 }
 0x16b   : > { %v1423_v41 = vpop.f32.mrf.mxu1  ;;  %v1344_v43 = vpop.f32.mrf.mxu0 }
 0x16c   : > { %v1012_v28 = vadd.f32 %v1422_v9, %v867_v23  ;;  %v1345_v30 = vadd.f32 %v1344_v43, %v1343_v62 }
 0x16d   : > { %v1424_v54 = vpop.f32.mrf.mxu1 }
 0x16e   : > { %1034 = vst [vmem:[%s2135_s7 + $0x70] sm:$0xff] %v1012_v28  ;;  %v872_v6 = vadd.f32 %v1345_v30, %v727_v11  ;;  %v1425_v60 = vadd.f32 %v1424_v54, %v1423_v41 }
 0x170   : > { %v1017_v16 = vadd.f32 %v1425_v60, %v872_v6 }
 0x172   : > { %1035 = vst [vmem:[%s2135_s7 + $0x78] sm:$0xff] %v1017_v16 }
 0x173 PF: > { %s13_s12 = sadd.s32 1, %s1440_s12  }
 0x174   : > { %p10_p4 = scmp.ge.s32.totalorder %s13_s12, 6  }
 0x176   :  { %12 = sbr.rel (!%p10_p4) target bundleno = 1 (0x1), region = 62 }

</bundles_post_ra>
